<compile_context>
chip_gen: v7x
topology: tpu7x:2x2x1
jax: 0.10.0
libtpu: 0.0.40
codegen_flags: <defaults>
</compile_context>

<pallas_src>
import functools

import jax
import jax.numpy as jnp
from jax.experimental import pallas as pl
from jax.experimental.pallas import tpu as pltpu


# ----------------------------- fused TPU kernel ----------------------------- #

def _stgnn_kernel(x_ref, ww_ref, wb_ref, lng_ref, lnb_ref, o_ref, *,
                  L, V, ks, dm, gdep, alpha, eps, off, t_lens, t_offs, Tpad):
    """Whole STGNN forward for one batch element (grid=(B,), 1 program/batch).

    x_ref   : (1, Tpad, V, Cin)      per-batch padded input (time, node, chan)
    ww_ref  : (1, 2L, V, V)          per-batch [W1_i, W2_i^T] adjacency factors
    wb_ref  : (R, 128)               packed shared weights/biases (static offsets)
    lng_ref : (sum_i T_i, V, rc)     packed LayerNorm gammas
    lnb_ref : (sum_i T_i, V, rc)     packed LayerNorm betas
    o_ref   : (1, V, P)              output
    """
    f32 = jnp.float32

    def get(name):
        r0, nr, nc = off[name]
        return wb_ref[r0:r0 + nr, :nc]

    def bmm(x3, w2):
        """(T, V, K) x (K, N) -> (T, V, N): time-batched MXU matmul."""
        wb = jnp.broadcast_to(w2, (x3.shape[0],) + w2.shape)
        return jnp.einsum("tvk,tkn->tvn", x3, wb, preferred_element_type=f32)

    def nconv(x3, M):
        """Node mixing: out[t, w, c] = sum_v M[w, v] * x[t, v, c]."""
        Mb = jnp.broadcast_to(M, (x3.shape[0],) + M.shape)
        return jnp.einsum("twv,tvc->twc", Mb, x3, preferred_element_type=f32)

    def time_flatten(x3):
        """(T, V, C) -> (V, T*C); lane index t*C + c matches packed weight rows."""
        T = x3.shape[0]
        return jnp.concatenate([x3[t] for t in range(T)], axis=-1)

    def conv1x1(x3, wname, bname):
        return bmm(x3, get(wname)) + get(bname)

    def full_conv(x3, wname, bname):
        """Full-width temporal conv (kernel width == T): one (V,T*C)@(T*C,N) dot."""
        xf = time_flatten(x3)
        return jnp.dot(xf, get(wname), preferred_element_type=f32) + get(bname)

    def gated_tconv(x3, i, dil):
        """Dilated temporal conv; filter & gate fused into one matmul."""
        T = x3.shape[0]
        Tout = T - (ks - 1) * dil
        xcat = jnp.concatenate(
            [x3[k * dil:k * dil + Tout] for k in range(ks)], axis=-1)
        fg = bmm(xcat, get(f"tc_w{i}")) + get(f"tc_b{i}")      # (Tout, V, 2*cc)
        cc = fg.shape[-1] // 2
        return jnp.tanh(fg[..., :cc]) * jax.nn.sigmoid(fg[..., cc:])

    def mixprop(x3, M, wname, bname):
        """K-hop mixprop; hop-major weight rows, one bmm per hop, one nconv/hop."""
        w_all = get(wname)                                     # ((gdep+1)*cc, rc)
        cc = x3.shape[-1]
        out = bmm(x3, w_all[0:cc, :])
        h = x3
        for j in range(1, gdep + 1):
            h = alpha * x3 + (1.0 - alpha) * nconv(h, M)
            out = out + bmm(h, w_all[j * cc:(j + 1) * cc, :])
        return out + get(bname)

    def layer_norm(x3, g3, b3):
        """LayerNorm over (C, V, T) jointly for this batch element."""
        mean = jnp.mean(x3)
        d = x3 - mean
        var = jnp.mean(d * d)
        inv = jax.lax.rsqrt(var + eps)
        return d * inv * g3 + b3

    def adjacency(w1, w2t):
        """softmax(relu(W1 @ W2^T), axis=-1); W2 arrives pre-transposed."""
        prod = jnp.maximum(jnp.dot(w1, w2t, preferred_element_type=f32), 0.0)
        m = jnp.max(prod, axis=-1, keepdims=True)
        e = jnp.exp(prod - m)
        return e / jnp.sum(e, axis=-1, keepdims=True)

    # --------------------------------- forward ------------------------------ #
    x_in = x_ref[0]                                    # (Tpad, V, Cin)
    x = conv1x1(x_in, "ic_w", "ic_b")                  # (Tpad, V, rc)
    skip = full_conv(x_in, "ss_w", "ss_b")             # (V, sc); dropout = identity

    dil = 1
    t_prev = Tpad
    for i in range(L):
        A = adjacency(ww_ref[0, 2 * i], ww_ref[0, 2 * i + 1])   # (V, V) per batch
        At = A.T
        residual = x
        x = gated_tconv(x, i, dil)                     # (T_i, V, cc)
        skip = skip + full_conv(x, f"sk_w{i}", f"sk_b{i}")
        gf = mixprop(x, At, f"g1_w{i}", f"g1_b{i}")    # forward diffusion
        gb = mixprop(x, A, f"g2_w{i}", f"g2_b{i}")     # backward diffusion
        t_i = t_lens[i]
        x = gf + gb + residual[t_prev - t_i:, :, :]    # outer-dim tail slice (free)
        x = layer_norm(x,
                       lng_ref[t_offs[i]:t_offs[i] + t_i],
                       lnb_ref[t_offs[i]:t_offs[i] + t_i])
        t_prev = t_i
        dil *= dm

    skip = skip + full_conv(x, "es_w", "es_b")          # (V, sc)
    h = jnp.dot(jnp.maximum(skip, 0.0), get("o1_w"),
                preferred_element_type=f32) + get("o1_b")        # (V, ec)
    out = jnp.dot(jnp.maximum(h, 0.0), get("o2_w"),
                  preferred_element_type=f32) + get("o2_b")      # (V, P)
    o_ref[0] = out                                      # single lane-dense store


# ------------------------------ host wrapper -------------------------------- #

def stgnn_forward(params, x, cfg):
    L = cfg["num_layers"]
    V = cfg["num_nodes"]
    ks = cfg["kernel_size"]
    dm = cfg["dilation_multiplier"]
    rf = cfg["receptive_field"]
    gdep = cfg["gc_order"]
    alpha = cfg["beta"]
    P = cfg["pred_length"]
    B, Cin, _, T = x.shape
    f32 = jnp.float32

    if T < rf:  # left-pad the time axis up to the receptive field
        x = jnp.pad(x, ((0, 0), (0, 0), (0, 0), (rf - T, 0)))
    Tpad = max(T, rf)
    x_k = jnp.transpose(x, (0, 3, 2, 1)).astype(f32)        # (B, Tpad, V, Cin)

    # per-layer output time lengths
    t_lens = []
    t = Tpad
    d = 1
    for _ in range(L):
        t = t - (ks - 1) * d
        t_lens.append(t)
        d *= dm
    t_offs = [sum(t_lens[:i]) for i in range(L)]

    def bias(b):
        return jnp.asarray(b, f32).reshape(1, -1)

    def tconv_flat(w):   # torch (Cout, Cin, 1, kw) -> (kw*Cin, Cout), row = t*Cin+c
        w = jnp.asarray(w, f32)
        co, ci, _, kw = w.shape
        return jnp.transpose(w[:, :, 0, :], (2, 1, 0)).reshape(kw * ci, co)

    items = [
        ("ic_w", jnp.asarray(params["input_conv_w"], f32).T),
        ("ic_b", bias(params["input_conv_b"])),
        ("ss_w", tconv_flat(params["start_skip_w"])),
        ("ss_b", bias(params["start_skip_b"])),
        ("es_w", tconv_flat(params["end_skip_w"])),
        ("es_b", bias(params["end_skip_b"])),
        ("o1_w", jnp.asarray(params["out1_w"], f32).T),
        ("o1_b", bias(params["out1_b"])),
        ("o2_w", jnp.asarray(params["out2_w"], f32).T),
        ("o2_b", bias(params["out2_b"])),
    ]
    for i in range(L):
        wf = tconv_flat(params["tc_filt_w"][i])
        wg = tconv_flat(params["tc_gate_w"][i])
        items += [
            (f"tc_w{i}", jnp.concatenate([wf, wg], axis=1)),       # (ks*rc, 2cc)
            (f"tc_b{i}", jnp.concatenate([bias(params["tc_filt_b"][i]),
                                          bias(params["tc_gate_b"][i])], axis=1)),
            (f"sk_w{i}", tconv_flat(params["skip_w"][i])),          # (T_i*cc, sc)
            (f"sk_b{i}", bias(params["skip_b"][i])),
            (f"g1_w{i}", jnp.asarray(params["gc1_w"][i], f32).T),   # ((gdep+1)*cc, rc)
            (f"g1_b{i}", bias(params["gc1_b"][i])),
            (f"g2_w{i}", jnp.asarray(params["gc2_w"][i], f32).T),
            (f"g2_b{i}", bias(params["gc2_b"][i])),
        ]

    # Pack all shared weights into ONE lane-dense (rows, 128) blob with
    # 8-row-aligned static offsets (single DMA / single VMEM tile).
    off = {}
    rows = []
    r = 0
    for name, a in items:
        nr, nc = a.shape
        assert nc <= 128
        pr = (-nr) % 8
        rows.append(jnp.pad(a, ((0, pr), (0, 128 - nc))))
        off[name] = (r, nr, nc)
        r += nr + pr
    blob = jnp.concatenate(rows, axis=0)                    # (R, 128)
    R = blob.shape[0]

    # per-batch learned adjacency factors: (B, 2L, V, V) = [W1_0, W2_0^T, ...]
    ww = jnp.stack(
        [m for i in range(L)
         for m in (jnp.asarray(params["mat_weights"][i][0], f32),
                   jnp.transpose(jnp.asarray(params["mat_weights"][i][1], f32),
                                 (0, 2, 1)))],
        axis=1)

    # LayerNorm affine params packed along the time axis: (sum_i T_i, V, rc)
    lng = jnp.concatenate(
        [jnp.transpose(jnp.asarray(params["ln_g"][i], f32), (2, 1, 0))
         for i in range(L)], axis=0)
    lnb = jnp.concatenate(
        [jnp.transpose(jnp.asarray(params["ln_b"][i], f32), (2, 1, 0))
         for i in range(L)], axis=0)

    kernel = functools.partial(
        _stgnn_kernel, L=L, V=V, ks=ks, dm=dm, gdep=gdep, alpha=float(alpha),
        eps=1e-5, off=off, t_lens=tuple(t_lens), t_offs=tuple(t_offs), Tpad=Tpad)

    out = pl.pallas_call(
        kernel,
        out_shape=jax.ShapeDtypeStruct((B, V, P), jnp.float32),
        grid=(B,),
        in_specs=[
            pl.BlockSpec((1, Tpad, V, Cin), lambda b: (b, 0, 0, 0)),
            pl.BlockSpec((1, 2 * L, V, V), lambda b: (b, 0, 0, 0)),
            pl.BlockSpec((R, 128), lambda b: (0, 0)),
            pl.BlockSpec(lng.shape, lambda b: (0, 0, 0)),
            pl.BlockSpec(lnb.shape, lambda b: (0, 0, 0)),
        ],
        out_specs=pl.BlockSpec((1, V, P), lambda b: (b, 0, 0)),
        # TODO(synk): on v7x, pltpu.CORE_PARALLEL on the batch axis would place
        # one batch element per TensorCore; kept "parallel" for portability.
        compiler_params=pltpu.CompilerParams(
            dimension_semantics=("parallel",)),
    )(x_k, ww, blob, lng, lnb)

    return jnp.transpose(out, (0, 2, 1))                    # (B, pred_length, V)


# ----------------------------- parameter init ------------------------------- #

def init_params(key, cfg):
    B = cfg["batch_size"]; V = cfg["num_nodes"]; Cin = cfg["c_in"]
    rc = cfg["residual_chans"]; cc = cfg["conv_chans"]; sc = cfg["skip_chans"]
    ec = cfg["end_chans"]; L = cfg["num_layers"]; ks = cfg["kernel_size"]
    T = cfg["sequence_length"]; rf = cfg["receptive_field"]
    pred = cfg["pred_length"]; go = cfg["gc_order"]
    Tpad = max(T, rf)

    keys = iter(jax.random.split(key, 512))

    def w(*shape, scale=0.1):
        return scale * jax.random.normal(next(keys), shape, dtype=jnp.float32)

    # time length after each layer
    t_lens = []
    t = Tpad
    d = 1
    for _ in range(L):
        t = t - (ks - 1) * d
        t_lens.append(t)
        d *= cfg["dilation_multiplier"]

    p = {}
    p["mat_weights"] = [(w(B, V, V, scale=1.0), w(B, V, V, scale=1.0))
                        for _ in range(L)]
    p["input_conv_w"] = w(rc, Cin); p["input_conv_b"] = w(rc)
    p["start_skip_w"] = w(sc, Cin, 1, Tpad); p["start_skip_b"] = w(sc)
    p["tc_filt_w"] = [w(cc, rc, 1, ks) for _ in range(L)]
    p["tc_filt_b"] = [w(cc) for _ in range(L)]
    p["tc_gate_w"] = [w(cc, rc, 1, ks) for _ in range(L)]
    p["tc_gate_b"] = [w(cc) for _ in range(L)]
    p["skip_w"] = [w(sc, cc, 1, t_lens[i]) for i in range(L)]
    p["skip_b"] = [w(sc) for _ in range(L)]
    p["gc1_w"] = [w(rc, (go + 1) * cc) for _ in range(L)]
    p["gc1_b"] = [w(rc) for _ in range(L)]
    p["gc2_w"] = [w(rc, (go + 1) * cc) for _ in range(L)]
    p["gc2_b"] = [w(rc) for _ in range(L)]
    p["ln_g"] = [jnp.ones((rc, V, t_lens[i]), jnp.float32) for i in range(L)]
    p["ln_b"] = [jnp.zeros((rc, V, t_lens[i]), jnp.float32) for i in range(L)]
    p["end_skip_w"] = w(sc, rc, 1, t_lens[-1]); p["end_skip_b"] = w(sc)
    p["out1_w"] = w(ec, sc); p["out1_b"] = w(ec)
    p["out2_w"] = w(pred, ec); p["out2_b"] = w(pred)
    return p


# ---------------------------------- main ------------------------------------ #

if __name__ == "__main__":
    cfg = dict(
        c_in=4, num_nodes=3, batch_size=2, sequence_length=16,
        residual_chans=8, conv_chans=8, skip_chans=16, end_chans=32,
        num_layers=2, dilation_multiplier=1, pred_length=4,
        kernel_size=7, gc_order=2, beta=0.05,
    )
    dm = cfg["dilation_multiplier"]; ks = cfg["kernel_size"]; L = cfg["num_layers"]
    if dm > 1:
        cfg["receptive_field"] = int(1 + (ks - 1) * (dm ** L - 1) / (dm - 1))
    else:
        cfg["receptive_field"] = L * (ks - 1) + 1

    key = jax.random.PRNGKey(0)
    kp, kx = jax.random.split(key)
    params = init_params(kp, cfg)
    x = jax.random.normal(
        kx,
        (cfg["batch_size"], cfg["c_in"], cfg["num_nodes"], cfg["sequence_length"]),
        dtype=jnp.float32,
    )

    fwd = jax.jit(functools.partial(stgnn_forward, cfg=cfg))
    out = jax.block_until_ready(fwd(params, x))
    assert out.shape == (cfg["batch_size"], cfg["pred_length"], cfg["num_nodes"]), out.shape
    assert bool(jnp.all(jnp.isfinite(out)))
    print("KERNEL_OK")
</pallas_src>

<mosaic_0001>
module attributes {stable_mosaic.version = 11 : i64} {
  func.func @_stgnn_kernel(%arg0: i32, %arg1: memref<1x16x3x4xf32, #tpu.memory_space<vmem>>, %arg2: memref<1x4x3x3xf32, #tpu.memory_space<vmem>>, %arg3: memref<576x128xf32, #tpu.memory_space<vmem>>, %arg4: memref<14x3x8xf32, #tpu.memory_space<vmem>>, %arg5: memref<14x3x8xf32, #tpu.memory_space<vmem>>, %arg6: memref<1x3x4xf32, #tpu.memory_space<vmem>>) attributes {dimension_semantics = [#tpu.dimension_semantics<parallel>], iteration_bounds = array<i64: 2>, scalar_prefetch = 0 : i64, scratch_operands = 0 : i64, tpu.core_type = #tpu.core_type<tc>, window_params = [{transform_indices = @transform_0, window_bounds = array<i64: 1, 16, 3, 4>}, {transform_indices = @transform_1, window_bounds = array<i64: 1, 4, 3, 3>}, {pipeline_mode = #tpu.pipeline_mode<synchronous>, transform_indices = @transform_2, window_bounds = array<i64: 576, 128>}, {pipeline_mode = #tpu.pipeline_mode<synchronous>, transform_indices = @transform_3, window_bounds = array<i64: 14, 3, 8>}, {pipeline_mode = #tpu.pipeline_mode<synchronous>, transform_indices = @transform_4, window_bounds = array<i64: 14, 3, 8>}, {transform_indices = @transform_5, window_bounds = array<i64: 1, 3, 4>}]} {
    %c0 = arith.constant 0 : index
    %c0_0 = arith.constant 0 : index
    %c0_1 = arith.constant 0 : index
    %c0_2 = arith.constant 0 : index
    %0 = vector.load %arg1[%c0, %c0_0, %c0_1, %c0_2] : memref<1x16x3x4xf32, #tpu.memory_space<vmem>>, vector<1x16x3x4xf32>
    %1 = vector.shape_cast %0 : vector<1x16x3x4xf32> to vector<16x3x4xf32>
    %c0_3 = arith.constant 0 : index
    %c0_4 = arith.constant 0 : index
    %2 = vector.load %arg3[%c0_3, %c0_4] : memref<576x128xf32, #tpu.memory_space<vmem>>, vector<4x8xf32>
    %3 = vector.shape_cast %2 : vector<4x8xf32> to vector<1x4x8xf32>
    %4 = vector.broadcast %3 : vector<1x4x8xf32> to vector<16x4x8xf32>
    "tpu.trace_start"() <{level = 10 : i32, message = "tvk,tkn->tvn"}> : () -> ()
    %cst = arith.constant dense<0.000000e+00> : vector<16x3x8xf32>
    %5 = tpu.matmul %1, %4, %cst {dimension_numbers = #tpu.dot_dimension_numbers<[2], [1], [1], [2], [0, 0, 0, 1, 1, 2], [0], [0]>} : vector<16x3x4xf32>, vector<16x4x8xf32>, vector<16x3x8xf32> -> vector<16x3x8xf32>
    "tpu.trace_stop"() : () -> ()
    %c8 = arith.constant 8 : index
    %c0_5 = arith.constant 0 : index
    %6 = vector.load %arg3[%c8, %c0_5] : memref<576x128xf32, #tpu.memory_space<vmem>>, vector<1x8xf32>
    %7 = vector.shape_cast %6 : vector<1x8xf32> to vector<1x1x8xf32>
    %8 = vector.broadcast %7 : vector<1x1x8xf32> to vector<16x3x8xf32>
    %9 = arith.addf %5, %8 : vector<16x3x8xf32>
    %10 = vector.extract_strided_slice %1 {offsets = [0, 0, 0], sizes = [1, 3, 4], strides = [1, 1, 1]} : vector<16x3x4xf32> to vector<1x3x4xf32>
    %11 = vector.shape_cast %10 : vector<1x3x4xf32> to vector<3x4xf32>
    %12 = vector.extract_strided_slice %1 {offsets = [1, 0, 0], sizes = [1, 3, 4], strides = [1, 1, 1]} : vector<16x3x4xf32> to vector<1x3x4xf32>
    %13 = vector.shape_cast %12 : vector<1x3x4xf32> to vector<3x4xf32>
    %14 = vector.extract_strided_slice %1 {offsets = [2, 0, 0], sizes = [1, 3, 4], strides = [1, 1, 1]} : vector<16x3x4xf32> to vector<1x3x4xf32>
    %15 = vector.shape_cast %14 : vector<1x3x4xf32> to vector<3x4xf32>
    %16 = vector.extract_strided_slice %1 {offsets = [3, 0, 0], sizes = [1, 3, 4], strides = [1, 1, 1]} : vector<16x3x4xf32> to vector<1x3x4xf32>
    %17 = vector.shape_cast %16 : vector<1x3x4xf32> to vector<3x4xf32>
    %18 = vector.extract_strided_slice %1 {offsets = [4, 0, 0], sizes = [1, 3, 4], strides = [1, 1, 1]} : vector<16x3x4xf32> to vector<1x3x4xf32>
    %19 = vector.shape_cast %18 : vector<1x3x4xf32> to vector<3x4xf32>
    %20 = vector.extract_strided_slice %1 {offsets = [5, 0, 0], sizes = [1, 3, 4], strides = [1, 1, 1]} : vector<16x3x4xf32> to vector<1x3x4xf32>
    %21 = vector.shape_cast %20 : vector<1x3x4xf32> to vector<3x4xf32>
    %22 = vector.extract_strided_slice %1 {offsets = [6, 0, 0], sizes = [1, 3, 4], strides = [1, 1, 1]} : vector<16x3x4xf32> to vector<1x3x4xf32>
    %23 = vector.shape_cast %22 : vector<1x3x4xf32> to vector<3x4xf32>
    %24 = vector.extract_strided_slice %1 {offsets = [7, 0, 0], sizes = [1, 3, 4], strides = [1, 1, 1]} : vector<16x3x4xf32> to vector<1x3x4xf32>
    %25 = vector.shape_cast %24 : vector<1x3x4xf32> to vector<3x4xf32>
    %26 = vector.extract_strided_slice %1 {offsets = [8, 0, 0], sizes = [1, 3, 4], strides = [1, 1, 1]} : vector<16x3x4xf32> to vector<1x3x4xf32>
    %27 = vector.shape_cast %26 : vector<1x3x4xf32> to vector<3x4xf32>
    %28 = vector.extract_strided_slice %1 {offsets = [9, 0, 0], sizes = [1, 3, 4], strides = [1, 1, 1]} : vector<16x3x4xf32> to vector<1x3x4xf32>
    %29 = vector.shape_cast %28 : vector<1x3x4xf32> to vector<3x4xf32>
    %30 = vector.extract_strided_slice %1 {offsets = [10, 0, 0], sizes = [1, 3, 4], strides = [1, 1, 1]} : vector<16x3x4xf32> to vector<1x3x4xf32>
    %31 = vector.shape_cast %30 : vector<1x3x4xf32> to vector<3x4xf32>
    %32 = vector.extract_strided_slice %1 {offsets = [11, 0, 0], sizes = [1, 3, 4], strides = [1, 1, 1]} : vector<16x3x4xf32> to vector<1x3x4xf32>
    %33 = vector.shape_cast %32 : vector<1x3x4xf32> to vector<3x4xf32>
    %34 = vector.extract_strided_slice %1 {offsets = [12, 0, 0], sizes = [1, 3, 4], strides = [1, 1, 1]} : vector<16x3x4xf32> to vector<1x3x4xf32>
    %35 = vector.shape_cast %34 : vector<1x3x4xf32> to vector<3x4xf32>
    %36 = vector.extract_strided_slice %1 {offsets = [13, 0, 0], sizes = [1, 3, 4], strides = [1, 1, 1]} : vector<16x3x4xf32> to vector<1x3x4xf32>
    %37 = vector.shape_cast %36 : vector<1x3x4xf32> to vector<3x4xf32>
    %38 = vector.extract_strided_slice %1 {offsets = [14, 0, 0], sizes = [1, 3, 4], strides = [1, 1, 1]} : vector<16x3x4xf32> to vector<1x3x4xf32>
    %39 = vector.shape_cast %38 : vector<1x3x4xf32> to vector<3x4xf32>
    %40 = vector.extract_strided_slice %1 {offsets = [15, 0, 0], sizes = [1, 3, 4], strides = [1, 1, 1]} : vector<16x3x4xf32> to vector<1x3x4xf32>
    %41 = vector.shape_cast %40 : vector<1x3x4xf32> to vector<3x4xf32>
    %42 = tpu.concatenate %11, %13, %15, %17, %19, %21, %23, %25, %27, %29, %31, %33, %35, %37, %39, %41 in 1 : vector<3x4xf32>, vector<3x4xf32>, vector<3x4xf32>, vector<3x4xf32>, vector<3x4xf32>, vector<3x4xf32>, vector<3x4xf32>, vector<3x4xf32>, vector<3x4xf32>, vector<3x4xf32>, vector<3x4xf32>, vector<3x4xf32>, vector<3x4xf32>, vector<3x4xf32>, vector<3x4xf32>, vector<3x4xf32> -> vector<3x64xf32>
    %c16 = arith.constant 16 : index
    %c0_6 = arith.constant 0 : index
    %43 = vector.load %arg3[%c16, %c0_6] : memref<576x128xf32, #tpu.memory_space<vmem>>, vector<64x16xf32>
    %cst_7 = arith.constant dense<0.000000e+00> : vector<3x16xf32>
    %44 = tpu.matmul %42, %43, %cst_7 {dimension_numbers = #tpu.dot_dimension_numbers<[1], [0], [0], [1], [0, 0, 1, 1], [], []>} : vector<3x64xf32>, vector<64x16xf32>, vector<3x16xf32> -> vector<3x16xf32>
    %c80 = arith.constant 80 : index
    %c0_8 = arith.constant 0 : index
    %45 = vector.load %arg3[%c80, %c0_8] : memref<576x128xf32, #tpu.memory_space<vmem>>, vector<1x16xf32>
    %46 = vector.broadcast %45 : vector<1x16xf32> to vector<3x16xf32>
    %47 = arith.addf %44, %46 : vector<3x16xf32>
    %c0_9 = arith.constant 0 : index
    %c0_10 = arith.constant 0 : index
    %c0_11 = arith.constant 0 : index
    %c0_12 = arith.constant 0 : index
    %48 = vector.load %arg2[%c0_9, %c0_10, %c0_11, %c0_12] : memref<1x4x3x3xf32, #tpu.memory_space<vmem>>, vector<1x1x3x3xf32>
    %49 = vector.shape_cast %48 : vector<1x1x3x3xf32> to vector<3x3xf32>
    %c0_13 = arith.constant 0 : index
    %c1 = arith.constant 1 : index
    %c0_14 = arith.constant 0 : index
    %c0_15 = arith.constant 0 : index
    %50 = vector.load %arg2[%c0_13, %c1, %c0_14, %c0_15] : memref<1x4x3x3xf32, #tpu.memory_space<vmem>>, vector<1x1x3x3xf32>
    %51 = vector.shape_cast %50 : vector<1x1x3x3xf32> to vector<3x3xf32>
    %cst_16 = arith.constant dense<0.000000e+00> : vector<3x3xf32>
    %52 = tpu.matmul %49, %51, %cst_16 {dimension_numbers = #tpu.dot_dimension_numbers<[1], [0], [0], [1], [0, 0, 1, 1], [], []>} : vector<3x3xf32>, vector<3x3xf32>, vector<3x3xf32> -> vector<3x3xf32>
    %cst_17 = arith.constant 0.000000e+00 : f32
    %53 = vector.broadcast %cst_17 : f32 to vector<3x3xf32>
    %54 = arith.maximumf %52, %53 : vector<3x3xf32>
    %cst_18 = arith.constant dense<0xFF800000> : vector<3xf32>
    %55 = vector.multi_reduction <maximumf>, %54, %cst_18 [1] : vector<3x3xf32> to vector<3xf32>
    %56 = vector.shape_cast %55 : vector<3xf32> to vector<3x1xf32>
    %57 = vector.broadcast %56 : vector<3x1xf32> to vector<3x3xf32>
    %58 = arith.subf %54, %57 : vector<3x3xf32>
    %59 = math.exp %58 : vector<3x3xf32>
    %cst_19 = arith.constant dense<0.000000e+00> : vector<3xf32>
    %60 = vector.multi_reduction <add>, %59, %cst_19 [1] : vector<3x3xf32> to vector<3xf32>
    %61 = vector.shape_cast %60 : vector<3xf32> to vector<3x1xf32>
    %62 = vector.broadcast %61 : vector<3x1xf32> to vector<3x3xf32>
    %63 = arith.divf %59, %62 : vector<3x3xf32>
    %64 = tpu.transpose %63, [1, 0] : vector<3x3xf32> -> vector<3x3xf32>
    %65 = vector.extract_strided_slice %9 {offsets = [0, 0, 0], sizes = [10, 3, 8], strides = [1, 1, 1]} : vector<16x3x8xf32> to vector<10x3x8xf32>
    %66 = vector.extract_strided_slice %9 {offsets = [1, 0, 0], sizes = [10, 3, 8], strides = [1, 1, 1]} : vector<16x3x8xf32> to vector<10x3x8xf32>
    %67 = vector.extract_strided_slice %9 {offsets = [2, 0, 0], sizes = [10, 3, 8], strides = [1, 1, 1]} : vector<16x3x8xf32> to vector<10x3x8xf32>
    %68 = vector.extract_strided_slice %9 {offsets = [3, 0, 0], sizes = [10, 3, 8], strides = [1, 1, 1]} : vector<16x3x8xf32> to vector<10x3x8xf32>
    %69 = vector.extract_strided_slice %9 {offsets = [4, 0, 0], sizes = [10, 3, 8], strides = [1, 1, 1]} : vector<16x3x8xf32> to vector<10x3x8xf32>
    %70 = vector.extract_strided_slice %9 {offsets = [5, 0, 0], sizes = [10, 3, 8], strides = [1, 1, 1]} : vector<16x3x8xf32> to vector<10x3x8xf32>
    %71 = vector.extract_strided_slice %9 {offsets = [6, 0, 0], sizes = [10, 3, 8], strides = [1, 1, 1]} : vector<16x3x8xf32> to vector<10x3x8xf32>
    %72 = tpu.concatenate %65, %66, %67, %68, %69, %70, %71 in 2 : vector<10x3x8xf32>, vector<10x3x8xf32>, vector<10x3x8xf32>, vector<10x3x8xf32>, vector<10x3x8xf32>, vector<10x3x8xf32>, vector<10x3x8xf32> -> vector<10x3x56xf32>
    %c192 = arith.constant 192 : index
    %c0_20 = arith.constant 0 : index
    %73 = vector.load %arg3[%c192, %c0_20] : memref<576x128xf32, #tpu.memory_space<vmem>>, vector<56x16xf32>
    %74 = vector.shape_cast %73 : vector<56x16xf32> to vector<1x56x16xf32>
    %75 = vector.broadcast %74 : vector<1x56x16xf32> to vector<10x56x16xf32>
    "tpu.trace_start"() <{level = 10 : i32, message = "tvk,tkn->tvn"}> : () -> ()
    %cst_21 = arith.constant dense<0.000000e+00> : vector<10x3x16xf32>
    %76 = tpu.matmul %72, %75, %cst_21 {dimension_numbers = #tpu.dot_dimension_numbers<[2], [1], [1], [2], [0, 0, 0, 1, 1, 2], [0], [0]>} : vector<10x3x56xf32>, vector<10x56x16xf32>, vector<10x3x16xf32> -> vector<10x3x16xf32>
    "tpu.trace_stop"() : () -> ()
    %c248 = arith.constant 248 : index
    %c0_22 = arith.constant 0 : index
    %77 = vector.load %arg3[%c248, %c0_22] : memref<576x128xf32, #tpu.memory_space<vmem>>, vector<1x16xf32>
    %78 = vector.shape_cast %77 : vector<1x16xf32> to vector<1x1x16xf32>
    %79 = vector.broadcast %78 : vector<1x1x16xf32> to vector<10x3x16xf32>
    %80 = arith.addf %76, %79 : vector<10x3x16xf32>
    %81 = vector.extract_strided_slice %80 {offsets = [0, 0, 0], sizes = [10, 3, 8], strides = [1, 1, 1]} : vector<10x3x16xf32> to vector<10x3x8xf32>
    %82 = math.tanh %81 : vector<10x3x8xf32>
    %83 = vector.extract_strided_slice %80 {offsets = [0, 0, 8], sizes = [10, 3, 8], strides = [1, 1, 1]} : vector<10x3x16xf32> to vector<10x3x8xf32>
    %84 = arith.negf %83 : vector<10x3x8xf32>
    %85 = math.exp %84 : vector<10x3x8xf32>
    %cst_23 = arith.constant 1.000000e+00 : f32
    %86 = vector.broadcast %cst_23 : f32 to vector<10x3x8xf32>
    %87 = arith.addf %86, %85 : vector<10x3x8xf32>
    %88 = arith.divf %86, %87 : vector<10x3x8xf32>
    %89 = arith.mulf %82, %88 : vector<10x3x8xf32>
    %90 = vector.extract_strided_slice %89 {offsets = [0, 0, 0], sizes = [1, 3, 8], strides = [1, 1, 1]} : vector<10x3x8xf32> to vector<1x3x8xf32>
    %91 = vector.shape_cast %90 : vector<1x3x8xf32> to vector<3x8xf32>
    %92 = vector.extract_strided_slice %89 {offsets = [1, 0, 0], sizes = [1, 3, 8], strides = [1, 1, 1]} : vector<10x3x8xf32> to vector<1x3x8xf32>
    %93 = vector.shape_cast %92 : vector<1x3x8xf32> to vector<3x8xf32>
    %94 = vector.extract_strided_slice %89 {offsets = [2, 0, 0], sizes = [1, 3, 8], strides = [1, 1, 1]} : vector<10x3x8xf32> to vector<1x3x8xf32>
    %95 = vector.shape_cast %94 : vector<1x3x8xf32> to vector<3x8xf32>
    %96 = vector.extract_strided_slice %89 {offsets = [3, 0, 0], sizes = [1, 3, 8], strides = [1, 1, 1]} : vector<10x3x8xf32> to vector<1x3x8xf32>
    %97 = vector.shape_cast %96 : vector<1x3x8xf32> to vector<3x8xf32>
    %98 = vector.extract_strided_slice %89 {offsets = [4, 0, 0], sizes = [1, 3, 8], strides = [1, 1, 1]} : vector<10x3x8xf32> to vector<1x3x8xf32>
    %99 = vector.shape_cast %98 : vector<1x3x8xf32> to vector<3x8xf32>
    %100 = vector.extract_strided_slice %89 {offsets = [5, 0, 0], sizes = [1, 3, 8], strides = [1, 1, 1]} : vector<10x3x8xf32> to vector<1x3x8xf32>
    %101 = vector.shape_cast %100 : vector<1x3x8xf32> to vector<3x8xf32>
    %102 = vector.extract_strided_slice %89 {offsets = [6, 0, 0], sizes = [1, 3, 8], strides = [1, 1, 1]} : vector<10x3x8xf32> to vector<1x3x8xf32>
    %103 = vector.shape_cast %102 : vector<1x3x8xf32> to vector<3x8xf32>
    %104 = vector.extract_strided_slice %89 {offsets = [7, 0, 0], sizes = [1, 3, 8], strides = [1, 1, 1]} : vector<10x3x8xf32> to vector<1x3x8xf32>
    %105 = vector.shape_cast %104 : vector<1x3x8xf32> to vector<3x8xf32>
    %106 = vector.extract_strided_slice %89 {offsets = [8, 0, 0], sizes = [1, 3, 8], strides = [1, 1, 1]} : vector<10x3x8xf32> to vector<1x3x8xf32>
    %107 = vector.shape_cast %106 : vector<1x3x8xf32> to vector<3x8xf32>
    %108 = vector.extract_strided_slice %89 {offsets = [9, 0, 0], sizes = [1, 3, 8], strides = [1, 1, 1]} : vector<10x3x8xf32> to vector<1x3x8xf32>
    %109 = vector.shape_cast %108 : vector<1x3x8xf32> to vector<3x8xf32>
    %110 = tpu.concatenate %91, %93, %95, %97, %99, %101, %103, %105, %107, %109 in 1 : vector<3x8xf32>, vector<3x8xf32>, vector<3x8xf32>, vector<3x8xf32>, vector<3x8xf32>, vector<3x8xf32>, vector<3x8xf32>, vector<3x8xf32>, vector<3x8xf32>, vector<3x8xf32> -> vector<3x80xf32>
    %c256 = arith.constant 256 : index
    %c0_24 = arith.constant 0 : index
    %111 = vector.load %arg3[%c256, %c0_24] : memref<576x128xf32, #tpu.memory_space<vmem>>, vector<80x16xf32>
    %cst_25 = arith.constant dense<0.000000e+00> : vector<3x16xf32>
    %112 = tpu.matmul %110, %111, %cst_25 {dimension_numbers = #tpu.dot_dimension_numbers<[1], [0], [0], [1], [0, 0, 1, 1], [], []>} : vector<3x80xf32>, vector<80x16xf32>, vector<3x16xf32> -> vector<3x16xf32>
    %c336 = arith.constant 336 : index
    %c0_26 = arith.constant 0 : index
    %113 = vector.load %arg3[%c336, %c0_26] : memref<576x128xf32, #tpu.memory_space<vmem>>, vector<1x16xf32>
    %114 = vector.broadcast %113 : vector<1x16xf32> to vector<3x16xf32>
    %115 = arith.addf %112, %114 : vector<3x16xf32>
    %116 = arith.addf %47, %115 : vector<3x16xf32>
    %c344 = arith.constant 344 : index
    %c0_27 = arith.constant 0 : index
    %117 = vector.load %arg3[%c344, %c0_27] : memref<576x128xf32, #tpu.memory_space<vmem>>, vector<24x8xf32>
    %118 = vector.extract_strided_slice %117 {offsets = [0, 0], sizes = [8, 8], strides = [1, 1]} : vector<24x8xf32> to vector<8x8xf32>
    %119 = vector.shape_cast %118 : vector<8x8xf32> to vector<1x8x8xf32>
    %120 = vector.broadcast %119 : vector<1x8x8xf32> to vector<10x8x8xf32>
    "tpu.trace_start"() <{level = 10 : i32, message = "tvk,tkn->tvn"}> : () -> ()
    %cst_28 = arith.constant dense<0.000000e+00> : vector<10x3x8xf32>
    %121 = tpu.matmul %89, %120, %cst_28 {dimension_numbers = #tpu.dot_dimension_numbers<[2], [1], [1], [2], [0, 0, 0, 1, 1, 2], [0], [0]>} : vector<10x3x8xf32>, vector<10x8x8xf32>, vector<10x3x8xf32> -> vector<10x3x8xf32>
    "tpu.trace_stop"() : () -> ()
    %cst_29 = arith.constant 5.000000e-02 : f32
    %122 = vector.broadcast %cst_29 : f32 to vector<10x3x8xf32>
    %123 = arith.mulf %122, %89 : vector<10x3x8xf32>
    %124 = vector.shape_cast %64 : vector<3x3xf32> to vector<1x3x3xf32>
    %125 = vector.broadcast %124 : vector<1x3x3xf32> to vector<10x3x3xf32>
    "tpu.trace_start"() <{level = 10 : i32, message = "twv,tvc->twc"}> : () -> ()
    %cst_30 = arith.constant dense<0.000000e+00> : vector<10x3x8xf32>
    %126 = tpu.matmul %125, %89, %cst_30 {dimension_numbers = #tpu.dot_dimension_numbers<[2], [1], [1], [2], [0, 0, 0, 1, 1, 2], [0], [0]>} : vector<10x3x3xf32>, vector<10x3x8xf32>, vector<10x3x8xf32> -> vector<10x3x8xf32>
    "tpu.trace_stop"() : () -> ()
    %cst_31 = arith.constant 0.949999988 : f32
    %127 = vector.broadcast %cst_31 : f32 to vector<10x3x8xf32>
    %128 = arith.mulf %127, %126 : vector<10x3x8xf32>
    %129 = arith.addf %123, %128 : vector<10x3x8xf32>
    %130 = vector.extract_strided_slice %117 {offsets = [8, 0], sizes = [8, 8], strides = [1, 1]} : vector<24x8xf32> to vector<8x8xf32>
    %131 = vector.shape_cast %130 : vector<8x8xf32> to vector<1x8x8xf32>
    %132 = vector.broadcast %131 : vector<1x8x8xf32> to vector<10x8x8xf32>
    "tpu.trace_start"() <{level = 10 : i32, message = "tvk,tkn->tvn"}> : () -> ()
    %cst_32 = arith.constant dense<0.000000e+00> : vector<10x3x8xf32>
    %133 = tpu.matmul %129, %132, %cst_32 {dimension_numbers = #tpu.dot_dimension_numbers<[2], [1], [1], [2], [0, 0, 0, 1, 1, 2], [0], [0]>} : vector<10x3x8xf32>, vector<10x8x8xf32>, vector<10x3x8xf32> -> vector<10x3x8xf32>
    "tpu.trace_stop"() : () -> ()
    %134 = arith.addf %121, %133 : vector<10x3x8xf32>
    %cst_33 = arith.constant 5.000000e-02 : f32
    %135 = vector.broadcast %cst_33 : f32 to vector<10x3x8xf32>
    %136 = arith.mulf %135, %89 : vector<10x3x8xf32>
    %137 = vector.shape_cast %64 : vector<3x3xf32> to vector<1x3x3xf32>
    %138 = vector.broadcast %137 : vector<1x3x3xf32> to vector<10x3x3xf32>
    "tpu.trace_start"() <{level = 10 : i32, message = "twv,tvc->twc"}> : () -> ()
    %cst_34 = arith.constant dense<0.000000e+00> : vector<10x3x8xf32>
    %139 = tpu.matmul %138, %129, %cst_34 {dimension_numbers = #tpu.dot_dimension_numbers<[2], [1], [1], [2], [0, 0, 0, 1, 1, 2], [0], [0]>} : vector<10x3x3xf32>, vector<10x3x8xf32>, vector<10x3x8xf32> -> vector<10x3x8xf32>
    "tpu.trace_stop"() : () -> ()
    %cst_35 = arith.constant 0.949999988 : f32
    %140 = vector.broadcast %cst_35 : f32 to vector<10x3x8xf32>
    %141 = arith.mulf %140, %139 : vector<10x3x8xf32>
    %142 = arith.addf %136, %141 : vector<10x3x8xf32>
    %143 = vector.extract_strided_slice %117 {offsets = [16, 0], sizes = [8, 8], strides = [1, 1]} : vector<24x8xf32> to vector<8x8xf32>
    %144 = vector.shape_cast %143 : vector<8x8xf32> to vector<1x8x8xf32>
    %145 = vector.broadcast %144 : vector<1x8x8xf32> to vector<10x8x8xf32>
    "tpu.trace_start"() <{level = 10 : i32, message = "tvk,tkn->tvn"}> : () -> ()
    %cst_36 = arith.constant dense<0.000000e+00> : vector<10x3x8xf32>
    %146 = tpu.matmul %142, %145, %cst_36 {dimension_numbers = #tpu.dot_dimension_numbers<[2], [1], [1], [2], [0, 0, 0, 1, 1, 2], [0], [0]>} : vector<10x3x8xf32>, vector<10x8x8xf32>, vector<10x3x8xf32> -> vector<10x3x8xf32>
    "tpu.trace_stop"() : () -> ()
    %147 = arith.addf %134, %146 : vector<10x3x8xf32>
    %c368 = arith.constant 368 : index
    %c0_37 = arith.constant 0 : index
    %148 = vector.load %arg3[%c368, %c0_37] : memref<576x128xf32, #tpu.memory_space<vmem>>, vector<1x8xf32>
    %149 = vector.shape_cast %148 : vector<1x8xf32> to vector<1x1x8xf32>
    %150 = vector.broadcast %149 : vector<1x1x8xf32> to vector<10x3x8xf32>
    %151 = arith.addf %147, %150 : vector<10x3x8xf32>
    %c376 = arith.constant 376 : index
    %c0_38 = arith.constant 0 : index
    %152 = vector.load %arg3[%c376, %c0_38] : memref<576x128xf32, #tpu.memory_space<vmem>>, vector<24x8xf32>
    %153 = vector.extract_strided_slice %152 {offsets = [0, 0], sizes = [8, 8], strides = [1, 1]} : vector<24x8xf32> to vector<8x8xf32>
    %154 = vector.shape_cast %153 : vector<8x8xf32> to vector<1x8x8xf32>
    %155 = vector.broadcast %154 : vector<1x8x8xf32> to vector<10x8x8xf32>
    "tpu.trace_start"() <{level = 10 : i32, message = "tvk,tkn->tvn"}> : () -> ()
    %cst_39 = arith.constant dense<0.000000e+00> : vector<10x3x8xf32>
    %156 = tpu.matmul %89, %155, %cst_39 {dimension_numbers = #tpu.dot_dimension_numbers<[2], [1], [1], [2], [0, 0, 0, 1, 1, 2], [0], [0]>} : vector<10x3x8xf32>, vector<10x8x8xf32>, vector<10x3x8xf32> -> vector<10x3x8xf32>
    "tpu.trace_stop"() : () -> ()
    %cst_40 = arith.constant 5.000000e-02 : f32
    %157 = vector.broadcast %cst_40 : f32 to vector<10x3x8xf32>
    %158 = arith.mulf %157, %89 : vector<10x3x8xf32>
    %159 = vector.shape_cast %63 : vector<3x3xf32> to vector<1x3x3xf32>
    %160 = vector.broadcast %159 : vector<1x3x3xf32> to vector<10x3x3xf32>
    "tpu.trace_start"() <{level = 10 : i32, message = "twv,tvc->twc"}> : () -> ()
    %cst_41 = arith.constant dense<0.000000e+00> : vector<10x3x8xf32>
    %161 = tpu.matmul %160, %89, %cst_41 {dimension_numbers = #tpu.dot_dimension_numbers<[2], [1], [1], [2], [0, 0, 0, 1, 1, 2], [0], [0]>} : vector<10x3x3xf32>, vector<10x3x8xf32>, vector<10x3x8xf32> -> vector<10x3x8xf32>
    "tpu.trace_stop"() : () -> ()
    %cst_42 = arith.constant 0.949999988 : f32
    %162 = vector.broadcast %cst_42 : f32 to vector<10x3x8xf32>
    %163 = arith.mulf %162, %161 : vector<10x3x8xf32>
    %164 = arith.addf %158, %163 : vector<10x3x8xf32>
    %165 = vector.extract_strided_slice %152 {offsets = [8, 0], sizes = [8, 8], strides = [1, 1]} : vector<24x8xf32> to vector<8x8xf32>
    %166 = vector.shape_cast %165 : vector<8x8xf32> to vector<1x8x8xf32>
    %167 = vector.broadcast %166 : vector<1x8x8xf32> to vector<10x8x8xf32>
    "tpu.trace_start"() <{level = 10 : i32, message = "tvk,tkn->tvn"}> : () -> ()
    %cst_43 = arith.constant dense<0.000000e+00> : vector<10x3x8xf32>
    %168 = tpu.matmul %164, %167, %cst_43 {dimension_numbers = #tpu.dot_dimension_numbers<[2], [1], [1], [2], [0, 0, 0, 1, 1, 2], [0], [0]>} : vector<10x3x8xf32>, vector<10x8x8xf32>, vector<10x3x8xf32> -> vector<10x3x8xf32>
    "tpu.trace_stop"() : () -> ()
    %169 = arith.addf %156, %168 : vector<10x3x8xf32>
    %cst_44 = arith.constant 5.000000e-02 : f32
    %170 = vector.broadcast %cst_44 : f32 to vector<10x3x8xf32>
    %171 = arith.mulf %170, %89 : vector<10x3x8xf32>
    %172 = vector.shape_cast %63 : vector<3x3xf32> to vector<1x3x3xf32>
    %173 = vector.broadcast %172 : vector<1x3x3xf32> to vector<10x3x3xf32>
    "tpu.trace_start"() <{level = 10 : i32, message = "twv,tvc->twc"}> : () -> ()
    %cst_45 = arith.constant dense<0.000000e+00> : vector<10x3x8xf32>
    %174 = tpu.matmul %173, %164, %cst_45 {dimension_numbers = #tpu.dot_dimension_numbers<[2], [1], [1], [2], [0, 0, 0, 1, 1, 2], [0], [0]>} : vector<10x3x3xf32>, vector<10x3x8xf32>, vector<10x3x8xf32> -> vector<10x3x8xf32>
    "tpu.trace_stop"() : () -> ()
    %cst_46 = arith.constant 0.949999988 : f32
    %175 = vector.broadcast %cst_46 : f32 to vector<10x3x8xf32>
    %176 = arith.mulf %175, %174 : vector<10x3x8xf32>
    %177 = arith.addf %171, %176 : vector<10x3x8xf32>
    %178 = vector.extract_strided_slice %152 {offsets = [16, 0], sizes = [8, 8], strides = [1, 1]} : vector<24x8xf32> to vector<8x8xf32>
    %179 = vector.shape_cast %178 : vector<8x8xf32> to vector<1x8x8xf32>
    %180 = vector.broadcast %179 : vector<1x8x8xf32> to vector<10x8x8xf32>
    "tpu.trace_start"() <{level = 10 : i32, message = "tvk,tkn->tvn"}> : () -> ()
    %cst_47 = arith.constant dense<0.000000e+00> : vector<10x3x8xf32>
    %181 = tpu.matmul %177, %180, %cst_47 {dimension_numbers = #tpu.dot_dimension_numbers<[2], [1], [1], [2], [0, 0, 0, 1, 1, 2], [0], [0]>} : vector<10x3x8xf32>, vector<10x8x8xf32>, vector<10x3x8xf32> -> vector<10x3x8xf32>
    "tpu.trace_stop"() : () -> ()
    %182 = arith.addf %169, %181 : vector<10x3x8xf32>
    %c400 = arith.constant 400 : index
    %c0_48 = arith.constant 0 : index
    %183 = vector.load %arg3[%c400, %c0_48] : memref<576x128xf32, #tpu.memory_space<vmem>>, vector<1x8xf32>
    %184 = vector.shape_cast %183 : vector<1x8xf32> to vector<1x1x8xf32>
    %185 = vector.broadcast %184 : vector<1x1x8xf32> to vector<10x3x8xf32>
    %186 = arith.addf %182, %185 : vector<10x3x8xf32>
    %187 = arith.addf %151, %186 : vector<10x3x8xf32>
    %188 = vector.extract_strided_slice %9 {offsets = [6, 0, 0], sizes = [10, 3, 8], strides = [1, 1, 1]} : vector<16x3x8xf32> to vector<10x3x8xf32>
    %189 = arith.addf %187, %188 : vector<10x3x8xf32>
    %c0_49 = arith.constant 0 : index
    %c0_50 = arith.constant 0 : index
    %c0_51 = arith.constant 0 : index
    %190 = vector.load %arg4[%c0_49, %c0_50, %c0_51] : memref<14x3x8xf32, #tpu.memory_space<vmem>>, vector<10x3x8xf32>
    %c0_52 = arith.constant 0 : index
    %c0_53 = arith.constant 0 : index
    %c0_54 = arith.constant 0 : index
    %191 = vector.load %arg5[%c0_52, %c0_53, %c0_54] : memref<14x3x8xf32, #tpu.memory_space<vmem>>, vector<10x3x8xf32>
    %192 = vector.shape_cast %189 : vector<10x3x8xf32> to vector<1x10x3x8xf32>
    %cst_55 = arith.constant dense<0.000000e+00> : vector<1xf32>
    %193 = vector.multi_reduction <add>, %192, %cst_55 [1, 2, 3] : vector<1x10x3x8xf32> to vector<1xf32>
    %194 = vector.shape_cast %193 : vector<1xf32> to vector<1x1x1x1xf32>
    %195 = vector.extract %194[0, 0, 0, 0] : f32 from vector<1x1x1x1xf32>
    %cst_56 = arith.constant 2.400000e+02 : f32
    %196 = arith.divf %195, %cst_56 : f32
    %197 = vector.broadcast %196 : f32 to vector<10x3x8xf32>
    %198 = arith.subf %189, %197 : vector<10x3x8xf32>
    %199 = arith.mulf %198, %198 : vector<10x3x8xf32>
    %200 = vector.shape_cast %199 : vector<10x3x8xf32> to vector<1x10x3x8xf32>
    %cst_57 = arith.constant dense<0.000000e+00> : vector<1xf32>
    %201 = vector.multi_reduction <add>, %200, %cst_57 [1, 2, 3] : vector<1x10x3x8xf32> to vector<1xf32>
    %202 = vector.shape_cast %201 : vector<1xf32> to vector<1x1x1x1xf32>
    %203 = vector.extract %202[0, 0, 0, 0] : f32 from vector<1x1x1x1xf32>
    %cst_58 = arith.constant 2.400000e+02 : f32
    %204 = arith.divf %203, %cst_58 : f32
    %cst_59 = arith.constant 9.99999974E-6 : f32
    %205 = arith.addf %204, %cst_59 : f32
    %206 = math.rsqrt %205 : f32
    %207 = vector.broadcast %206 : f32 to vector<10x3x8xf32>
    %208 = arith.mulf %198, %207 : vector<10x3x8xf32>
    %209 = arith.mulf %208, %190 : vector<10x3x8xf32>
    %210 = arith.addf %209, %191 : vector<10x3x8xf32>
    %c0_60 = arith.constant 0 : index
    %c2 = arith.constant 2 : index
    %c0_61 = arith.constant 0 : index
    %c0_62 = arith.constant 0 : index
    %211 = vector.load %arg2[%c0_60, %c2, %c0_61, %c0_62] : memref<1x4x3x3xf32, #tpu.memory_space<vmem>>, vector<1x1x3x3xf32>
    %212 = vector.shape_cast %211 : vector<1x1x3x3xf32> to vector<3x3xf32>
    %c0_63 = arith.constant 0 : index
    %c3 = arith.constant 3 : index
    %c0_64 = arith.constant 0 : index
    %c0_65 = arith.constant 0 : index
    %213 = vector.load %arg2[%c0_63, %c3, %c0_64, %c0_65] : memref<1x4x3x3xf32, #tpu.memory_space<vmem>>, vector<1x1x3x3xf32>
    %214 = vector.shape_cast %213 : vector<1x1x3x3xf32> to vector<3x3xf32>
    %cst_66 = arith.constant dense<0.000000e+00> : vector<3x3xf32>
    %215 = tpu.matmul %212, %214, %cst_66 {dimension_numbers = #tpu.dot_dimension_numbers<[1], [0], [0], [1], [0, 0, 1, 1], [], []>} : vector<3x3xf32>, vector<3x3xf32>, vector<3x3xf32> -> vector<3x3xf32>
    %cst_67 = arith.constant 0.000000e+00 : f32
    %216 = vector.broadcast %cst_67 : f32 to vector<3x3xf32>
    %217 = arith.maximumf %215, %216 : vector<3x3xf32>
    %cst_68 = arith.constant dense<0xFF800000> : vector<3xf32>
    %218 = vector.multi_reduction <maximumf>, %217, %cst_68 [1] : vector<3x3xf32> to vector<3xf32>
    %219 = vector.shape_cast %218 : vector<3xf32> to vector<3x1xf32>
    %220 = vector.broadcast %219 : vector<3x1xf32> to vector<3x3xf32>
    %221 = arith.subf %217, %220 : vector<3x3xf32>
    %222 = math.exp %221 : vector<3x3xf32>
    %cst_69 = arith.constant dense<0.000000e+00> : vector<3xf32>
    %223 = vector.multi_reduction <add>, %222, %cst_69 [1] : vector<3x3xf32> to vector<3xf32>
    %224 = vector.shape_cast %223 : vector<3xf32> to vector<3x1xf32>
    %225 = vector.broadcast %224 : vector<3x1xf32> to vector<3x3xf32>
    %226 = arith.divf %222, %225 : vector<3x3xf32>
    %227 = tpu.transpose %226, [1, 0] : vector<3x3xf32> -> vector<3x3xf32>
    %228 = vector.extract_strided_slice %210 {offsets = [0, 0, 0], sizes = [4, 3, 8], strides = [1, 1, 1]} : vector<10x3x8xf32> to vector<4x3x8xf32>
    %229 = vector.extract_strided_slice %210 {offsets = [1, 0, 0], sizes = [4, 3, 8], strides = [1, 1, 1]} : vector<10x3x8xf32> to vector<4x3x8xf32>
    %230 = vector.extract_strided_slice %210 {offsets = [2, 0, 0], sizes = [4, 3, 8], strides = [1, 1, 1]} : vector<10x3x8xf32> to vector<4x3x8xf32>
    %231 = vector.extract_strided_slice %210 {offsets = [3, 0, 0], sizes = [4, 3, 8], strides = [1, 1, 1]} : vector<10x3x8xf32> to vector<4x3x8xf32>
    %232 = vector.extract_strided_slice %210 {offsets = [4, 0, 0], sizes = [4, 3, 8], strides = [1, 1, 1]} : vector<10x3x8xf32> to vector<4x3x8xf32>
    %233 = vector.extract_strided_slice %210 {offsets = [5, 0, 0], sizes = [4, 3, 8], strides = [1, 1, 1]} : vector<10x3x8xf32> to vector<4x3x8xf32>
    %234 = vector.extract_strided_slice %210 {offsets = [6, 0, 0], sizes = [4, 3, 8], strides = [1, 1, 1]} : vector<10x3x8xf32> to vector<4x3x8xf32>
    %235 = tpu.concatenate %228, %229, %230, %231, %232, %233, %234 in 2 : vector<4x3x8xf32>, vector<4x3x8xf32>, vector<4x3x8xf32>, vector<4x3x8xf32>, vector<4x3x8xf32>, vector<4x3x8xf32>, vector<4x3x8xf32> -> vector<4x3x56xf32>
    %c408 = arith.constant 408 : index
    %c0_70 = arith.constant 0 : index
    %236 = vector.load %arg3[%c408, %c0_70] : memref<576x128xf32, #tpu.memory_space<vmem>>, vector<56x16xf32>
    %237 = vector.shape_cast %236 : vector<56x16xf32> to vector<1x56x16xf32>
    %238 = vector.broadcast %237 : vector<1x56x16xf32> to vector<4x56x16xf32>
    "tpu.trace_start"() <{level = 10 : i32, message = "tvk,tkn->tvn"}> : () -> ()
    %cst_71 = arith.constant dense<0.000000e+00> : vector<4x3x16xf32>
    %239 = tpu.matmul %235, %238, %cst_71 {dimension_numbers = #tpu.dot_dimension_numbers<[2], [1], [1], [2], [0, 0, 0, 1, 1, 2], [0], [0]>} : vector<4x3x56xf32>, vector<4x56x16xf32>, vector<4x3x16xf32> -> vector<4x3x16xf32>
    "tpu.trace_stop"() : () -> ()
    %c464 = arith.constant 464 : index
    %c0_72 = arith.constant 0 : index
    %240 = vector.load %arg3[%c464, %c0_72] : memref<576x128xf32, #tpu.memory_space<vmem>>, vector<1x16xf32>
    %241 = vector.shape_cast %240 : vector<1x16xf32> to vector<1x1x16xf32>
    %242 = vector.broadcast %241 : vector<1x1x16xf32> to vector<4x3x16xf32>
    %243 = arith.addf %239, %242 : vector<4x3x16xf32>
    %244 = vector.extract_strided_slice %243 {offsets = [0, 0, 0], sizes = [4, 3, 8], strides = [1, 1, 1]} : vector<4x3x16xf32> to vector<4x3x8xf32>
    %245 = math.tanh %244 : vector<4x3x8xf32>
    %246 = vector.extract_strided_slice %243 {offsets = [0, 0, 8], sizes = [4, 3, 8], strides = [1, 1, 1]} : vector<4x3x16xf32> to vector<4x3x8xf32>
    %247 = arith.negf %246 : vector<4x3x8xf32>
    %248 = math.exp %247 : vector<4x3x8xf32>
    %cst_73 = arith.constant 1.000000e+00 : f32
    %249 = vector.broadcast %cst_73 : f32 to vector<4x3x8xf32>
    %250 = arith.addf %249, %248 : vector<4x3x8xf32>
    %251 = arith.divf %249, %250 : vector<4x3x8xf32>
    %252 = arith.mulf %245, %251 : vector<4x3x8xf32>
    %253 = vector.extract_strided_slice %252 {offsets = [0, 0, 0], sizes = [1, 3, 8], strides = [1, 1, 1]} : vector<4x3x8xf32> to vector<1x3x8xf32>
    %254 = vector.shape_cast %253 : vector<1x3x8xf32> to vector<3x8xf32>
    %255 = vector.extract_strided_slice %252 {offsets = [1, 0, 0], sizes = [1, 3, 8], strides = [1, 1, 1]} : vector<4x3x8xf32> to vector<1x3x8xf32>
    %256 = vector.shape_cast %255 : vector<1x3x8xf32> to vector<3x8xf32>
    %257 = vector.extract_strided_slice %252 {offsets = [2, 0, 0], sizes = [1, 3, 8], strides = [1, 1, 1]} : vector<4x3x8xf32> to vector<1x3x8xf32>
    %258 = vector.shape_cast %257 : vector<1x3x8xf32> to vector<3x8xf32>
    %259 = vector.extract_strided_slice %252 {offsets = [3, 0, 0], sizes = [1, 3, 8], strides = [1, 1, 1]} : vector<4x3x8xf32> to vector<1x3x8xf32>
    %260 = vector.shape_cast %259 : vector<1x3x8xf32> to vector<3x8xf32>
    %261 = tpu.concatenate %254, %256, %258, %260 in 1 : vector<3x8xf32>, vector<3x8xf32>, vector<3x8xf32>, vector<3x8xf32> -> vector<3x32xf32>
    %c472 = arith.constant 472 : index
    %c0_74 = arith.constant 0 : index
    %262 = vector.load %arg3[%c472, %c0_74] : memref<576x128xf32, #tpu.memory_space<vmem>>, vector<32x16xf32>
    %cst_75 = arith.constant dense<0.000000e+00> : vector<3x16xf32>
    %263 = tpu.matmul %261, %262, %cst_75 {dimension_numbers = #tpu.dot_dimension_numbers<[1], [0], [0], [1], [0, 0, 1, 1], [], []>} : vector<3x32xf32>, vector<32x16xf32>, vector<3x16xf32> -> vector<3x16xf32>
    %c504 = arith.constant 504 : index
    %c0_76 = arith.constant 0 : index
    %264 = vector.load %arg3[%c504, %c0_76] : memref<576x128xf32, #tpu.memory_space<vmem>>, vector<1x16xf32>
    %265 = vector.broadcast %264 : vector<1x16xf32> to vector<3x16xf32>
    %266 = arith.addf %263, %265 : vector<3x16xf32>
    %267 = arith.addf %116, %266 : vector<3x16xf32>
    %c512 = arith.constant 512 : index
    %c0_77 = arith.constant 0 : index
    %268 = vector.load %arg3[%c512, %c0_77] : memref<576x128xf32, #tpu.memory_space<vmem>>, vector<24x8xf32>
    %269 = vector.extract_strided_slice %268 {offsets = [0, 0], sizes = [8, 8], strides = [1, 1]} : vector<24x8xf32> to vector<8x8xf32>
    %270 = vector.shape_cast %269 : vector<8x8xf32> to vector<1x8x8xf32>
    %271 = vector.broadcast %270 : vector<1x8x8xf32> to vector<4x8x8xf32>
    "tpu.trace_start"() <{level = 10 : i32, message = "tvk,tkn->tvn"}> : () -> ()
    %cst_78 = arith.constant dense<0.000000e+00> : vector<4x3x8xf32>
    %272 = tpu.matmul %252, %271, %cst_78 {dimension_numbers = #tpu.dot_dimension_numbers<[2], [1], [1], [2], [0, 0, 0, 1, 1, 2], [0], [0]>} : vector<4x3x8xf32>, vector<4x8x8xf32>, vector<4x3x8xf32> -> vector<4x3x8xf32>
    "tpu.trace_stop"() : () -> ()
    %cst_79 = arith.constant 5.000000e-02 : f32
    %273 = vector.broadcast %cst_79 : f32 to vector<4x3x8xf32>
    %274 = arith.mulf %273, %252 : vector<4x3x8xf32>
    %275 = vector.shape_cast %227 : vector<3x3xf32> to vector<1x3x3xf32>
    %276 = vector.broadcast %275 : vector<1x3x3xf32> to vector<4x3x3xf32>
    "tpu.trace_start"() <{level = 10 : i32, message = "twv,tvc->twc"}> : () -> ()
    %cst_80 = arith.constant dense<0.000000e+00> : vector<4x3x8xf32>
    %277 = tpu.matmul %276, %252, %cst_80 {dimension_numbers = #tpu.dot_dimension_numbers<[2], [1], [1], [2], [0, 0, 0, 1, 1, 2], [0], [0]>} : vector<4x3x3xf32>, vector<4x3x8xf32>, vector<4x3x8xf32> -> vector<4x3x8xf32>
    "tpu.trace_stop"() : () -> ()
    %cst_81 = arith.constant 0.949999988 : f32
    %278 = vector.broadcast %cst_81 : f32 to vector<4x3x8xf32>
    %279 = arith.mulf %278, %277 : vector<4x3x8xf32>
    %280 = arith.addf %274, %279 : vector<4x3x8xf32>
    %281 = vector.extract_strided_slice %268 {offsets = [8, 0], sizes = [8, 8], strides = [1, 1]} : vector<24x8xf32> to vector<8x8xf32>
    %282 = vector.shape_cast %281 : vector<8x8xf32> to vector<1x8x8xf32>
    %283 = vector.broadcast %282 : vector<1x8x8xf32> to vector<4x8x8xf32>
    "tpu.trace_start"() <{level = 10 : i32, message = "tvk,tkn->tvn"}> : () -> ()
    %cst_82 = arith.constant dense<0.000000e+00> : vector<4x3x8xf32>
    %284 = tpu.matmul %280, %283, %cst_82 {dimension_numbers = #tpu.dot_dimension_numbers<[2], [1], [1], [2], [0, 0, 0, 1, 1, 2], [0], [0]>} : vector<4x3x8xf32>, vector<4x8x8xf32>, vector<4x3x8xf32> -> vector<4x3x8xf32>
    "tpu.trace_stop"() : () -> ()
    %285 = arith.addf %272, %284 : vector<4x3x8xf32>
    %cst_83 = arith.constant 5.000000e-02 : f32
    %286 = vector.broadcast %cst_83 : f32 to vector<4x3x8xf32>
    %287 = arith.mulf %286, %252 : vector<4x3x8xf32>
    %288 = vector.shape_cast %227 : vector<3x3xf32> to vector<1x3x3xf32>
    %289 = vector.broadcast %288 : vector<1x3x3xf32> to vector<4x3x3xf32>
    "tpu.trace_start"() <{level = 10 : i32, message = "twv,tvc->twc"}> : () -> ()
    %cst_84 = arith.constant dense<0.000000e+00> : vector<4x3x8xf32>
    %290 = tpu.matmul %289, %280, %cst_84 {dimension_numbers = #tpu.dot_dimension_numbers<[2], [1], [1], [2], [0, 0, 0, 1, 1, 2], [0], [0]>} : vector<4x3x3xf32>, vector<4x3x8xf32>, vector<4x3x8xf32> -> vector<4x3x8xf32>
    "tpu.trace_stop"() : () -> ()
    %cst_85 = arith.constant 0.949999988 : f32
    %291 = vector.broadcast %cst_85 : f32 to vector<4x3x8xf32>
    %292 = arith.mulf %291, %290 : vector<4x3x8xf32>
    %293 = arith.addf %287, %292 : vector<4x3x8xf32>
    %294 = vector.extract_strided_slice %268 {offsets = [16, 0], sizes = [8, 8], strides = [1, 1]} : vector<24x8xf32> to vector<8x8xf32>
    %295 = vector.shape_cast %294 : vector<8x8xf32> to vector<1x8x8xf32>
    %296 = vector.broadcast %295 : vector<1x8x8xf32> to vector<4x8x8xf32>
    "tpu.trace_start"() <{level = 10 : i32, message = "tvk,tkn->tvn"}> : () -> ()
    %cst_86 = arith.constant dense<0.000000e+00> : vector<4x3x8xf32>
    %297 = tpu.matmul %293, %296, %cst_86 {dimension_numbers = #tpu.dot_dimension_numbers<[2], [1], [1], [2], [0, 0, 0, 1, 1, 2], [0], [0]>} : vector<4x3x8xf32>, vector<4x8x8xf32>, vector<4x3x8xf32> -> vector<4x3x8xf32>
    "tpu.trace_stop"() : () -> ()
    %298 = arith.addf %285, %297 : vector<4x3x8xf32>
    %c536 = arith.constant 536 : index
    %c0_87 = arith.constant 0 : index
    %299 = vector.load %arg3[%c536, %c0_87] : memref<576x128xf32, #tpu.memory_space<vmem>>, vector<1x8xf32>
    %300 = vector.shape_cast %299 : vector<1x8xf32> to vector<1x1x8xf32>
    %301 = vector.broadcast %300 : vector<1x1x8xf32> to vector<4x3x8xf32>
    %302 = arith.addf %298, %301 : vector<4x3x8xf32>
    %c544 = arith.constant 544 : index
    %c0_88 = arith.constant 0 : index
    %303 = vector.load %arg3[%c544, %c0_88] : memref<576x128xf32, #tpu.memory_space<vmem>>, vector<24x8xf32>
    %304 = vector.extract_strided_slice %303 {offsets = [0, 0], sizes = [8, 8], strides = [1, 1]} : vector<24x8xf32> to vector<8x8xf32>
    %305 = vector.shape_cast %304 : vector<8x8xf32> to vector<1x8x8xf32>
    %306 = vector.broadcast %305 : vector<1x8x8xf32> to vector<4x8x8xf32>
    "tpu.trace_start"() <{level = 10 : i32, message = "tvk,tkn->tvn"}> : () -> ()
    %cst_89 = arith.constant dense<0.000000e+00> : vector<4x3x8xf32>
    %307 = tpu.matmul %252, %306, %cst_89 {dimension_numbers = #tpu.dot_dimension_numbers<[2], [1], [1], [2], [0, 0, 0, 1, 1, 2], [0], [0]>} : vector<4x3x8xf32>, vector<4x8x8xf32>, vector<4x3x8xf32> -> vector<4x3x8xf32>
    "tpu.trace_stop"() : () -> ()
    %cst_90 = arith.constant 5.000000e-02 : f32
    %308 = vector.broadcast %cst_90 : f32 to vector<4x3x8xf32>
    %309 = arith.mulf %308, %252 : vector<4x3x8xf32>
    %310 = vector.shape_cast %226 : vector<3x3xf32> to vector<1x3x3xf32>
    %311 = vector.broadcast %310 : vector<1x3x3xf32> to vector<4x3x3xf32>
    "tpu.trace_start"() <{level = 10 : i32, message = "twv,tvc->twc"}> : () -> ()
    %cst_91 = arith.constant dense<0.000000e+00> : vector<4x3x8xf32>
    %312 = tpu.matmul %311, %252, %cst_91 {dimension_numbers = #tpu.dot_dimension_numbers<[2], [1], [1], [2], [0, 0, 0, 1, 1, 2], [0], [0]>} : vector<4x3x3xf32>, vector<4x3x8xf32>, vector<4x3x8xf32> -> vector<4x3x8xf32>
    "tpu.trace_stop"() : () -> ()
    %cst_92 = arith.constant 0.949999988 : f32
    %313 = vector.broadcast %cst_92 : f32 to vector<4x3x8xf32>
    %314 = arith.mulf %313, %312 : vector<4x3x8xf32>
    %315 = arith.addf %309, %314 : vector<4x3x8xf32>
    %316 = vector.extract_strided_slice %303 {offsets = [8, 0], sizes = [8, 8], strides = [1, 1]} : vector<24x8xf32> to vector<8x8xf32>
    %317 = vector.shape_cast %316 : vector<8x8xf32> to vector<1x8x8xf32>
    %318 = vector.broadcast %317 : vector<1x8x8xf32> to vector<4x8x8xf32>
    "tpu.trace_start"() <{level = 10 : i32, message = "tvk,tkn->tvn"}> : () -> ()
    %cst_93 = arith.constant dense<0.000000e+00> : vector<4x3x8xf32>
    %319 = tpu.matmul %315, %318, %cst_93 {dimension_numbers = #tpu.dot_dimension_numbers<[2], [1], [1], [2], [0, 0, 0, 1, 1, 2], [0], [0]>} : vector<4x3x8xf32>, vector<4x8x8xf32>, vector<4x3x8xf32> -> vector<4x3x8xf32>
    "tpu.trace_stop"() : () -> ()
    %320 = arith.addf %307, %319 : vector<4x3x8xf32>
    %cst_94 = arith.constant 5.000000e-02 : f32
    %321 = vector.broadcast %cst_94 : f32 to vector<4x3x8xf32>
    %322 = arith.mulf %321, %252 : vector<4x3x8xf32>
    %323 = vector.shape_cast %226 : vector<3x3xf32> to vector<1x3x3xf32>
    %324 = vector.broadcast %323 : vector<1x3x3xf32> to vector<4x3x3xf32>
    "tpu.trace_start"() <{level = 10 : i32, message = "twv,tvc->twc"}> : () -> ()
    %cst_95 = arith.constant dense<0.000000e+00> : vector<4x3x8xf32>
    %325 = tpu.matmul %324, %315, %cst_95 {dimension_numbers = #tpu.dot_dimension_numbers<[2], [1], [1], [2], [0, 0, 0, 1, 1, 2], [0], [0]>} : vector<4x3x3xf32>, vector<4x3x8xf32>, vector<4x3x8xf32> -> vector<4x3x8xf32>
    "tpu.trace_stop"() : () -> ()
    %cst_96 = arith.constant 0.949999988 : f32
    %326 = vector.broadcast %cst_96 : f32 to vector<4x3x8xf32>
    %327 = arith.mulf %326, %325 : vector<4x3x8xf32>
    %328 = arith.addf %322, %327 : vector<4x3x8xf32>
    %329 = vector.extract_strided_slice %303 {offsets = [16, 0], sizes = [8, 8], strides = [1, 1]} : vector<24x8xf32> to vector<8x8xf32>
    %330 = vector.shape_cast %329 : vector<8x8xf32> to vector<1x8x8xf32>
    %331 = vector.broadcast %330 : vector<1x8x8xf32> to vector<4x8x8xf32>
    "tpu.trace_start"() <{level = 10 : i32, message = "tvk,tkn->tvn"}> : () -> ()
    %cst_97 = arith.constant dense<0.000000e+00> : vector<4x3x8xf32>
    %332 = tpu.matmul %328, %331, %cst_97 {dimension_numbers = #tpu.dot_dimension_numbers<[2], [1], [1], [2], [0, 0, 0, 1, 1, 2], [0], [0]>} : vector<4x3x8xf32>, vector<4x8x8xf32>, vector<4x3x8xf32> -> vector<4x3x8xf32>
    "tpu.trace_stop"() : () -> ()
    %333 = arith.addf %320, %332 : vector<4x3x8xf32>
    %c568 = arith.constant 568 : index
    %c0_98 = arith.constant 0 : index
    %334 = vector.load %arg3[%c568, %c0_98] : memref<576x128xf32, #tpu.memory_space<vmem>>, vector<1x8xf32>
    %335 = vector.shape_cast %334 : vector<1x8xf32> to vector<1x1x8xf32>
    %336 = vector.broadcast %335 : vector<1x1x8xf32> to vector<4x3x8xf32>
    %337 = arith.addf %333, %336 : vector<4x3x8xf32>
    %338 = arith.addf %302, %337 : vector<4x3x8xf32>
    %339 = vector.extract_strided_slice %210 {offsets = [6, 0, 0], sizes = [4, 3, 8], strides = [1, 1, 1]} : vector<10x3x8xf32> to vector<4x3x8xf32>
    %340 = arith.addf %338, %339 : vector<4x3x8xf32>
    %c10 = arith.constant 10 : index
    %c0_99 = arith.constant 0 : index
    %c0_100 = arith.constant 0 : index
    %341 = vector.load %arg4[%c10, %c0_99, %c0_100] : memref<14x3x8xf32, #tpu.memory_space<vmem>>, vector<4x3x8xf32>
    %c10_101 = arith.constant 10 : index
    %c0_102 = arith.constant 0 : index
    %c0_103 = arith.constant 0 : index
    %342 = vector.load %arg5[%c10_101, %c0_102, %c0_103] : memref<14x3x8xf32, #tpu.memory_space<vmem>>, vector<4x3x8xf32>
    %343 = vector.shape_cast %340 : vector<4x3x8xf32> to vector<1x4x3x8xf32>
    %cst_104 = arith.constant dense<0.000000e+00> : vector<1xf32>
    %344 = vector.multi_reduction <add>, %343, %cst_104 [1, 2, 3] : vector<1x4x3x8xf32> to vector<1xf32>
    %345 = vector.shape_cast %344 : vector<1xf32> to vector<1x1x1x1xf32>
    %346 = vector.extract %345[0, 0, 0, 0] : f32 from vector<1x1x1x1xf32>
    %cst_105 = arith.constant 9.600000e+01 : f32
    %347 = arith.divf %346, %cst_105 : f32
    %348 = vector.broadcast %347 : f32 to vector<4x3x8xf32>
    %349 = arith.subf %340, %348 : vector<4x3x8xf32>
    %350 = arith.mulf %349, %349 : vector<4x3x8xf32>
    %351 = vector.shape_cast %350 : vector<4x3x8xf32> to vector<1x4x3x8xf32>
    %cst_106 = arith.constant dense<0.000000e+00> : vector<1xf32>
    %352 = vector.multi_reduction <add>, %351, %cst_106 [1, 2, 3] : vector<1x4x3x8xf32> to vector<1xf32>
    %353 = vector.shape_cast %352 : vector<1xf32> to vector<1x1x1x1xf32>
    %354 = vector.extract %353[0, 0, 0, 0] : f32 from vector<1x1x1x1xf32>
    %cst_107 = arith.constant 9.600000e+01 : f32
    %355 = arith.divf %354, %cst_107 : f32
    %cst_108 = arith.constant 9.99999974E-6 : f32
    %356 = arith.addf %355, %cst_108 : f32
    %357 = math.rsqrt %356 : f32
    %358 = vector.broadcast %357 : f32 to vector<4x3x8xf32>
    %359 = arith.mulf %349, %358 : vector<4x3x8xf32>
    %360 = arith.mulf %359, %341 : vector<4x3x8xf32>
    %361 = arith.addf %360, %342 : vector<4x3x8xf32>
    %362 = vector.extract_strided_slice %361 {offsets = [0, 0, 0], sizes = [1, 3, 8], strides = [1, 1, 1]} : vector<4x3x8xf32> to vector<1x3x8xf32>
    %363 = vector.shape_cast %362 : vector<1x3x8xf32> to vector<3x8xf32>
    %364 = vector.extract_strided_slice %361 {offsets = [1, 0, 0], sizes = [1, 3, 8], strides = [1, 1, 1]} : vector<4x3x8xf32> to vector<1x3x8xf32>
    %365 = vector.shape_cast %364 : vector<1x3x8xf32> to vector<3x8xf32>
    %366 = vector.extract_strided_slice %361 {offsets = [2, 0, 0], sizes = [1, 3, 8], strides = [1, 1, 1]} : vector<4x3x8xf32> to vector<1x3x8xf32>
    %367 = vector.shape_cast %366 : vector<1x3x8xf32> to vector<3x8xf32>
    %368 = vector.extract_strided_slice %361 {offsets = [3, 0, 0], sizes = [1, 3, 8], strides = [1, 1, 1]} : vector<4x3x8xf32> to vector<1x3x8xf32>
    %369 = vector.shape_cast %368 : vector<1x3x8xf32> to vector<3x8xf32>
    %370 = tpu.concatenate %363, %365, %367, %369 in 1 : vector<3x8xf32>, vector<3x8xf32>, vector<3x8xf32>, vector<3x8xf32> -> vector<3x32xf32>
    %c88 = arith.constant 88 : index
    %c0_109 = arith.constant 0 : index
    %371 = vector.load %arg3[%c88, %c0_109] : memref<576x128xf32, #tpu.memory_space<vmem>>, vector<32x16xf32>
    %cst_110 = arith.constant dense<0.000000e+00> : vector<3x16xf32>
    %372 = tpu.matmul %370, %371, %cst_110 {dimension_numbers = #tpu.dot_dimension_numbers<[1], [0], [0], [1], [0, 0, 1, 1], [], []>} : vector<3x32xf32>, vector<32x16xf32>, vector<3x16xf32> -> vector<3x16xf32>
    %c120 = arith.constant 120 : index
    %c0_111 = arith.constant 0 : index
    %373 = vector.load %arg3[%c120, %c0_111] : memref<576x128xf32, #tpu.memory_space<vmem>>, vector<1x16xf32>
    %374 = vector.broadcast %373 : vector<1x16xf32> to vector<3x16xf32>
    %375 = arith.addf %372, %374 : vector<3x16xf32>
    %376 = arith.addf %267, %375 : vector<3x16xf32>
    %cst_112 = arith.constant 0.000000e+00 : f32
    %377 = vector.broadcast %cst_112 : f32 to vector<3x16xf32>
    %378 = arith.maximumf %376, %377 : vector<3x16xf32>
    %c128 = arith.constant 128 : index
    %c0_113 = arith.constant 0 : index
    %379 = vector.load %arg3[%c128, %c0_113] : memref<576x128xf32, #tpu.memory_space<vmem>>, vector<16x32xf32>
    %cst_114 = arith.constant dense<0.000000e+00> : vector<3x32xf32>
    %380 = tpu.matmul %378, %379, %cst_114 {dimension_numbers = #tpu.dot_dimension_numbers<[1], [0], [0], [1], [0, 0, 1, 1], [], []>} : vector<3x16xf32>, vector<16x32xf32>, vector<3x32xf32> -> vector<3x32xf32>
    %c144 = arith.constant 144 : index
    %c0_115 = arith.constant 0 : index
    %381 = vector.load %arg3[%c144, %c0_115] : memref<576x128xf32, #tpu.memory_space<vmem>>, vector<1x32xf32>
    %382 = vector.broadcast %381 : vector<1x32xf32> to vector<3x32xf32>
    %383 = arith.addf %380, %382 : vector<3x32xf32>
    %cst_116 = arith.constant 0.000000e+00 : f32
    %384 = vector.broadcast %cst_116 : f32 to vector<3x32xf32>
    %385 = arith.maximumf %383, %384 : vector<3x32xf32>
    %c152 = arith.constant 152 : index
    %c0_117 = arith.constant 0 : index
    %386 = vector.load %arg3[%c152, %c0_117] : memref<576x128xf32, #tpu.memory_space<vmem>>, vector<32x4xf32>
    %cst_118 = arith.constant dense<0.000000e+00> : vector<3x4xf32>
    %387 = tpu.matmul %385, %386, %cst_118 {dimension_numbers = #tpu.dot_dimension_numbers<[1], [0], [0], [1], [0, 0, 1, 1], [], []>} : vector<3x32xf32>, vector<32x4xf32>, vector<3x4xf32> -> vector<3x4xf32>
    %c184 = arith.constant 184 : index
    %c0_119 = arith.constant 0 : index
    %388 = vector.load %arg3[%c184, %c0_119] : memref<576x128xf32, #tpu.memory_space<vmem>>, vector<1x4xf32>
    %389 = vector.broadcast %388 : vector<1x4xf32> to vector<3x4xf32>
    %390 = arith.addf %387, %389 : vector<3x4xf32>
    %c0_120 = arith.constant 0 : index
    %c0_121 = arith.constant 0 : index
    %c0_122 = arith.constant 0 : index
    %391 = vector.load %arg6[%c0_120, %c0_121, %c0_122] : memref<1x3x4xf32, #tpu.memory_space<vmem>>, vector<1x3x4xf32>
    %392 = vector.shape_cast %391 : vector<1x3x4xf32> to vector<3x4xf32>
    %393 = vector.shape_cast %390 : vector<3x4xf32> to vector<1x3x4xf32>
    tpu.vector_store %arg6[%c0_120, %c0_121, %c0_122], %393 {strides = array<i32>} : memref<1x3x4xf32, #tpu.memory_space<vmem>>, vector<1x3x4xf32>,
    return
  }
  func.func @transform_0(%arg0: i32) -> (i32, i32, i32, i32) {
    %c0_i32 = arith.constant 0 : i32
    %c0_i32_0 = arith.constant 0 : i32
    %c0_i32_1 = arith.constant 0 : i32
    %c0_i32_2 = arith.constant 0 : i32
    return %arg0, %c0_i32, %c0_i32_0, %c0_i32_1 : i32, i32, i32, i32
  }
  func.func @transform_1(%arg0: i32) -> (i32, i32, i32, i32) {
    %c0_i32 = arith.constant 0 : i32
    %c0_i32_0 = arith.constant 0 : i32
    %c0_i32_1 = arith.constant 0 : i32
    %c0_i32_2 = arith.constant 0 : i32
    return %arg0, %c0_i32, %c0_i32_0, %c0_i32_1 : i32, i32, i32, i32
  }
  func.func @transform_2(%arg0: i32) -> (i32, i32) {
    %c0_i32 = arith.constant 0 : i32
    %c0_i32_0 = arith.constant 0 : i32
    %c0_i32_1 = arith.constant 0 : i32
    return %c0_i32, %c0_i32_0 : i32, i32
  }
  func.func @transform_3(%arg0: i32) -> (i32, i32, i32) {
    %c0_i32 = arith.constant 0 : i32
    %c0_i32_0 = arith.constant 0 : i32
    %c0_i32_1 = arith.constant 0 : i32
    %c0_i32_2 = arith.constant 0 : i32
    return %c0_i32, %c0_i32_0, %c0_i32_1 : i32, i32, i32
  }
  func.func @transform_4(%arg0: i32) -> (i32, i32, i32) {
    %c0_i32 = arith.constant 0 : i32
    %c0_i32_0 = arith.constant 0 : i32
    %c0_i32_1 = arith.constant 0 : i32
    %c0_i32_2 = arith.constant 0 : i32
    return %c0_i32, %c0_i32_0, %c0_i32_1 : i32, i32, i32
  }
  func.func @transform_5(%arg0: i32) -> (i32, i32, i32) {
    %c0_i32 = arith.constant 0 : i32
    %c0_i32_0 = arith.constant 0 : i32
    %c0_i32_1 = arith.constant 0 : i32
    return %arg0, %c0_i32, %c0_i32_0 : i32, i32, i32
  }
}

</mosaic_0001>

<bundles_post_ra>
// kernel: stgnn_forward.1
= control target key start
LH: loop header
LB: loop body
LE: loop exit
PB: predicated region body
PF: predicated region fallthrough
CT: control target
= control target key end

     0   :  { %s16795_s18 = smov 0   ;;  %s19199_s0 = inlined_call_operand.vmem [shape: f32[2,16,3,4], index: 0, kind: input, shape index: {}]   ;;  %s19200_s1 = inlined_call_operand.vmem [shape: f32[2,4,3,3], index: 1, kind: input, shape index: {}]   ;;  %s19201_s2 = inlined_call_operand.vmem [shape: f32[576,128], index: 2, kind: input, shape index: {}]   ;;  %s19202_s3 = inlined_call_operand.vmem [shape: f32[14,3,8], index: 3, kind: input, shape index: {}]   ;;  %s19203_s4 = inlined_call_operand.vmem [shape: f32[14,3,8], index: 4, kind: input, shape index: {}]   ;;  %s19204_s5 = inlined_call_operand.vmem [shape: f32[2,3,4], index: 5, kind: output, shape index: {}]  }
   0x1 LB: > { %s14535_s19 = sadd.s32 4294967295, %s16742_s18   ;;  %p14539_p0 = scmp.ge.s32.totalorder %s16742_s18, 1  ;;  %s16742_s18 = sphi %s16795_s18, %s15_s18  }
   0x2   : > { %p197_p1 = scmp.lt.s32.totalorder %s16742_s18, 3 }
   0x4   : > { %p198_p2 = pnand %p14539_p0, %p197_p1 }
   0x5   : > { %v16806_v0 = vld [vmem:[%s19201_s2] sm:$0xf] (!%p198_p2)  ;;  %vm269_vm0 = vcmask (!%p198_p2), 1043456   ;;  %p229_p3 = scmp.lt.s32.totalorder (!%p198_p2), %s14535_s19, 1  ;;  %v16744_v1 = vmov (!%p198_p2), 0.0   ;;  %vm16745_vm1 = vmmov (!%p198_p2), 0  }
   0x6   : > { %201 = sbr.rel (%p198_p2) target bundleno = 5758 (0x167e), region = 40  ;;  %15305 = vmatprep.subr.mxu0 (!%p198_p2), %v16744_v1  ;;  %15310 = vmatprep.subr.mxu1 (!%p198_p2), %v16744_v1  ;;  %vm265_vm2 = vcmask (!%p198_p2), 31744   ;;  %vm1606_vm3 = vcmask (!%p198_p2), 1042432   ;;  %s16746_s30 = smov (!%p198_p2), 4   ;;  %vm1602_vm4 = vcmask (!%p198_p2), 23552   ;;  %vm1484_vm5 = vcmask (!%p198_p2), 64512  }
   0x7   : > { %15306 = vmatpush3.msk.msra.mxu0 (!%p198_p2), %vm269_vm0, %v16806_v0  ;;  %15307 = vmatprep.mubr.msk.f32.mxu0 (!%p198_p2), %vm16745_vm1, %v16744_v1  ;;  %s16747_s6 = smov (!%p198_p2), 12   ;;  %s16748_s7 = smov (!%p198_p2), 8   ;;  %vm1486_vm6 = vcmask (!%p198_p2), 97280   ;;  %vm1488_vm7 = vcmask (!%p198_p2), 130048   ;;  %vm1490_vm8 = vcmask (!%p198_p2), 162816   ;;  %vm1492_vm9 = vcmask (!%p198_p2), 195584  }
   0x8   : > { %15311 = vmatpush3.msk.msra.mxu1 (!%p198_p2), %vm269_vm0, %v16806_v0  ;;  %15312 = vmatprep.mubr.msk.f32.mxu1 (!%p198_p2), %vm16745_vm1, %v16744_v1  ;;  %s16749_s8 = smov (!%p198_p2), 16   ;;  %s16750_s9 = smov (!%p198_p2), 20   ;;  %vm1494_vm10 = vcmask (!%p198_p2), 228352   ;;  %vm1496_vm11 = vcmask (!%p198_p2), 261120   ;;  %v1512_v35 = vld [vmem:[%s19201_s2 + $0x10] sm:$0xff] (!%p198_p2)  ;;  %v1513_v36 = vld [vmem:[%s19201_s2 + $0x18] sm:$0xff] (!%p198_p2) }
   0x9   : > { %15315 = vmatprep.subr.mxu0 (!%p198_p2), %v16744_v1  ;;  %15320 = vmatprep.subr.mxu1 (!%p198_p2), %v16744_v1  ;;  %s16751_s10 = smov (!%p198_p2), 24   ;;  %s16752_s11 = smov (!%p198_p2), 28   ;;  %vm1498_vm12 = vcmask (!%p198_p2), 293888   ;;  %v16761_v38 = vmov (!%p198_p2), 0.0|0.0   ;;  %v16416_v40 = vpack.c.bf16 (!%p198_p2), %v1513_v36, %v1512_v35  ;;  %vm1500_vm13 = vcmask (!%p198_p2), 326656   ;;  %v1514_v43 = vld [vmem:[%s19201_s2 + $0x20] sm:$0xff] (!%p198_p2) }
   0xa   : > { %s16753_s12 = smov (!%p198_p2), 32   ;;  %s16754_s13 = smov (!%p198_p2), 36   ;;  %v1515_v44 = vld [vmem:[%s19201_s2 + $0x28] sm:$0xff] (!%p198_p2)  ;;  %vm1502_vm14 = vcmask (!%p198_p2), 359424   ;;  %vm1504_vm15 = vcmask (!%p198_p2), 392192   ;;  %v1516_v50 = vld [vmem:[%s19201_s2 + $0x30] sm:$0xff] (!%p198_p2) }
   0xb   : > { %s16755_s14 = smov (!%p198_p2), 40   ;;  %s16756_s15 = smov (!%p198_p2), 44   ;;  %v16419_v47 = vpack.c.bf16 (!%p198_p2), %v1515_v44, %v1514_v43  ;;  %v1517_v51 = vld [vmem:[%s19201_s2 + $0x38] sm:$0xff] (!%p198_p2)  ;;  %v1518_v57 = vld [vmem:[%s19201_s2 + $0x40] sm:$0xff] (!%p198_p2)  ;;  %v1519_v58 = vld [vmem:[%s19201_s2 + $0x48] sm:$0xff] (!%p198_p2) }
   0xc   : > { %s16757_s16 = smov (!%p198_p2), 48   ;;  %s16758_s17 = smov (!%p198_p2), 52   ;;  %v16422_v54 = vpack.c.bf16 (!%p198_p2), %v1517_v51, %v1516_v50  ;;  %v16425_v61 = vpack.c.bf16 (!%p198_p2), %v1519_v58, %v1518_v57  ;;  %v17032_v63 = vld [vmem:[%s19201_s2 + $0x8] ss:$0 sm:$0xff] (!%p198_p2)  ;;  %v17115_v43 = vld [vmem:[%s19201_s2 + $0xf0] sm:$0xff] (!%p198_p2) }
   0xd   : > { %s19206_s19 = smov (!%p229_p3, %s14535_s19), 1  ;;  %s16759_s20 = smov 56  }
   0xe   : > { %s14837_s22 = sshll.u32 %s19206_s19, 6  ;;  %s14838_s26 = sshll.u32 %s19206_s19, 4 }
   0xf   : > { %s16826_s25 = scalar_lea.vmem %s19199_s0, %s14837_s22  ;;  %s16945_s29 = scalar_lea.vmem %s19200_s1, %s14838_s26 }
  0x10   : > { %v16829_v2 = vld [vmem:[%s16826_s25] sm:$0x7]  ;;  %v16832_v3 = vld [vmem:[%s16826_s25 + $0x4] sm:$0x7]  ;;  %v16843_v4 = vld [vmem:[%s16826_s25 + $0x8] sm:$0x7] }
  0x11   : > { %15308 = vmatmul.mubr.msk.f32.vlgmr.msra.gmra.mrb[0].mxu0 %vm265_vm2, %v16829_v2  ;;  %15313 = vmatmul.mubr.msk.f32.vlgmr.msra.gmra.mrb[0].mxu1 %vm265_vm2, %v16832_v3  ;;  %v16846_v5 = vld [vmem:[%s16826_s25 + $0xc] sm:$0x7]  ;;  %v16863_v6 = vld [vmem:[%s16826_s25 + $0x10] sm:$0x7]  ;;  %v16866_v7 = vld [vmem:[%s16826_s25 + $0x14] sm:$0x7] }
  0x12   : > { %15316 = vmatpush3.msk.msra.mxu0 %vm269_vm0, %v16806_v0  ;;  %15317 = vmatprep.mubr.msk.f32.mxu0 %vm16745_vm1, %v16744_v1  ;;  %v16883_v8 = vld [vmem:[%s16826_s25 + $0x18] sm:$0x7]  ;;  %v16886_v9 = vld [vmem:[%s16826_s25 + $0x1c] sm:$0x7]  ;;  %v251_v10 = vld [vmem:[%s16826_s25 + $0x20] sm:$0x7] }
  0x13   : > { %15321 = vmatpush3.msk.msra.mxu1 %vm269_vm0, %v16806_v0  ;;  %15322 = vmatprep.mubr.msk.f32.mxu1 %vm16745_vm1, %v16744_v1  ;;  %v16904_v11 = vld [vmem:[%s16826_s25 + $0x24] sm:$0x7]  ;;  %v253_v12 = vld [vmem:[%s16826_s25 + $0x28] sm:$0x7]  ;;  %v254_v13 = vld [vmem:[%s16826_s25 + $0x2c] sm:$0x7] }
  0x14   : > { %15325 = vmatprep.subr.mxu0 %v16744_v1  ;;  %15330 = vmatprep.subr.mxu1 %v16744_v1  ;;  %v255_v14 = vld [vmem:[%s16826_s25 + $0x30] sm:$0x7]  ;;  %v256_v15 = vld [vmem:[%s16826_s25 + $0x34] sm:$0x7]  ;;  %v257_v16 = vld [vmem:[%s16826_s25 + $0x38] sm:$0x7] }
  0x15   : > { %15318 = vmatmul.mubr.msk.f32.vlgmr.msra.gmra.mrb[2].mxu0 %vm265_vm2, %v16843_v4  ;;  %15323 = vmatmul.mubr.msk.f32.vlgmr.msra.gmra.mrb[2].mxu1 %vm265_vm2, %v16846_v5  ;;  %v258_v17 = vld [vmem:[%s16826_s25 + $0x3c] sm:$0x7]  ;;  %v14580_v18 = vld [vmem:[%s16945_s29 + $0x4] sm:$0x7]  ;;  %v1599_v19 = vld [vmem:[%s16945_s29] sm:$0x7] }
  0x16   : > { %15326 = vmatpush3.msk.msra.mxu0 %vm269_vm0, %v16806_v0  ;;  %15327 = vmatprep.mubr.msk.f32.mxu0 %vm16745_vm1, %v16744_v1  ;;  %s16760_s21 = smov 60   ;;  %s16762_s26 = smov 120  }
  0x17   : > { %15331 = vmatpush3.msk.msra.mxu1 %vm269_vm0, %v16806_v0  ;;  %15332 = vmatprep.mubr.msk.f32.mxu1 %vm16745_vm1, %v16744_v1 }
  0x18   : > { %15335 = vmatprep.subr.mxu0 %v16744_v1  ;;  %15340 = vmatprep.subr.mxu1 %v16744_v1 }
  0x19   : > { %15328 = vmatmul.mubr.msk.f32.vlgmr.msra.gmra.mrb[4].mxu0 %vm265_vm2, %v16863_v6  ;;  %15333 = vmatmul.mubr.msk.f32.vlgmr.msra.gmra.mrb[4].mxu1 %vm265_vm2, %v16866_v7 }
  0x1a   : > { %15336 = vmatpush3.msk.msra.mxu0 %vm269_vm0, %v16806_v0  ;;  %15337 = vmatprep.mubr.msk.f32.mxu0 %vm16745_vm1, %v16744_v1 }
  0x1b   : > { %15341 = vmatpush3.msk.msra.mxu1 %vm269_vm0, %v16806_v0  ;;  %15342 = vmatprep.mubr.msk.f32.mxu1 %vm16745_vm1, %v16744_v1 }
  0x1c   : > { %15345 = vmatprep.subr.mxu0 %v16744_v1  ;;  %15350 = vmatprep.subr.mxu1 %v16744_v1 }
  0x1d   : > { %15338 = vmatmul.mubr.msk.f32.vlgmr.msra.gmra.mrb[6].mxu0 %vm265_vm2, %v16883_v8  ;;  %15343 = vmatmul.mubr.msk.f32.vlgmr.msra.gmra.mrb[6].mxu1 %vm265_vm2, %v16886_v9 }
  0x1e   : > { %15346 = vmatpush3.msk.msra.mxu0 %vm269_vm0, %v16806_v0  ;;  %15347 = vmatprep.mubr.msk.f32.mxu0 %vm16745_vm1, %v16744_v1 }
  0x1f   : > { %15351 = vmatpush3.msk.msra.mxu1 %vm269_vm0, %v16806_v0  ;;  %15352 = vmatprep.mubr.msk.f32.mxu1 %vm16745_vm1, %v16744_v1 }
  0x20   : > { %15355 = vmatprep.subr.mxu0 %v16744_v1  ;;  %15360 = vmatprep.subr.mxu1 %v16744_v1 }
  0x21   : > { %15348 = vmatmul.mubr.msk.f32.vlgmr.msra.gmra.mrb[8].mxu0 %vm265_vm2, %v251_v10  ;;  %15353 = vmatmul.mubr.msk.f32.vlgmr.msra.gmra.mrb[8].mxu1 %vm265_vm2, %v16904_v11 }
  0x22   : > { %15356 = vmatpush3.msk.msra.mxu0 %vm269_vm0, %v16806_v0  ;;  %15357 = vmatprep.mubr.msk.f32.mxu0 %vm16745_vm1, %v16744_v1 }
  0x23   : > { %15361 = vmatpush3.msk.msra.mxu1 %vm269_vm0, %v16806_v0  ;;  %15362 = vmatprep.mubr.msk.f32.mxu1 %vm16745_vm1, %v16744_v1 }
  0x24   : > { %15365 = vmatprep.subr.mxu0 %v16744_v1  ;;  %15370 = vmatprep.subr.mxu1 %v16744_v1 }
  0x25   : > { %15358 = vmatmul.mubr.msk.f32.vlgmr.msra.gmra.mrb[10].mxu0 %vm265_vm2, %v253_v12  ;;  %15363 = vmatmul.mubr.msk.f32.vlgmr.msra.gmra.mrb[10].mxu1 %vm265_vm2, %v254_v13 }
  0x26   : > { %15366 = vmatpush3.msk.msra.mxu0 %vm269_vm0, %v16806_v0  ;;  %15367 = vmatprep.mubr.msk.f32.mxu0 %vm16745_vm1, %v16744_v1 }
  0x27   : > { %15371 = vmatpush3.msk.msra.mxu1 %vm269_vm0, %v16806_v0  ;;  %15372 = vmatprep.mubr.msk.f32.mxu1 %vm16745_vm1, %v16744_v1 }
  0x28   : > { %15375 = vmatprep.subr.mxu0 %v16744_v1  ;;  %15380 = vmatprep.subr.mxu1 %v16744_v1 }
  0x29   : > { %15368 = vmatmul.mubr.msk.f32.vlgmr.msra.gmra.mrb[12].mxu0 %vm265_vm2, %v255_v14  ;;  %15373 = vmatmul.mubr.msk.f32.vlgmr.msra.gmra.mrb[12].mxu1 %vm265_vm2, %v256_v15 }
  0x2a   : > { %15376 = vmatpush3.msk.msra.mxu0 %vm269_vm0, %v16806_v0  ;;  %15377 = vmatprep.mubr.msk.f32.mxu0 %vm16745_vm1, %v16744_v1 }
  0x2b   : > { %15381 = vmatpush3.msk.msra.mxu1 %vm269_vm0, %v16806_v0  ;;  %15382 = vmatprep.mubr.msk.f32.mxu1 %vm16745_vm1, %v16744_v1  ;;  %vm1506_vm0 = vcmask 424960  }
  0x2c   : > { %15404 = vmatprep.subr.mxu1 %v16744_v1  ;;  %1438 = vrot.lane.b32.xlu0 %v16832_v3, %s16746_s30 }
  0x2d   : > { %15378 = vmatmul.mubr.msk.f32.vlgmr.msra.gmra.mrb[14].mxu0 %vm265_vm2, %v257_v16  ;;  %15383 = vmatmul.mubr.msk.f32.vlgmr.msra.gmra.mrb[14].mxu1 %vm265_vm2, %v258_v17 }
  0x2e   : > { %15405 = vmatpush3.msk.msra.mxu1 %vm1606_vm3, %v14580_v18  ;;  %15406 = vmatprep.mubr.msk.f32.mxu1 %vm16745_vm1, %v16744_v1 }
  0x2f   : > { %1444 = vrot.lane.b32.xlu1 %v16846_v5, %s16747_s6  ;;  %15401 = vmatprep.mubr.msk.f32.mxu0 %vm16745_vm1, %v16744_v1 }
  0x30   : > { %1441 = vrot.lane.b32.xlu0 %v16843_v4, %s16748_s7  ;;  %16415 = vmatprep.subr.bf16.mxu0 %v16761_v38 }
  0x31   : > { %15407 = vmatmul.mubr.msk.f32.vlgmr.msra.gmra.mrb[16].mxu1 %vm1602_vm4, %v1599_v19  ;;  %16427 = vmatprep.subr.bf16.mxu1 %v16761_v38 }
  0x32   : > { %15423 = vmatprep.mubr.msk.f32.mxu1 %vm16745_vm1, %v16744_v1  ;;  %16417 = vmatpush3.bf16.msra.mxu0 %v16416_v40 }
  0x33   : > { %1447 = vrot.lane.b32.xlu1 %v16863_v6, %s16749_s8  ;;  %16418 = vmatprep.subr.bf16.mxu0 %v16761_v38 }
  0x34   : > { %1450 = vrot.lane.b32.xlu0 %v16866_v7, %s16750_s9 }
  0x36   : > { %16420 = vmatpush3.bf16.msra.mxu0 %v16419_v47 }
  0x37   : > { %1453 = vrot.lane.b32.xlu1 %v16883_v8, %s16751_s10  ;;  %16421 = vmatprep.subr.bf16.mxu0 %v16761_v38 }
  0x38   : > { %1456 = vrot.lane.b32.xlu0 %v16886_v9, %s16752_s11 }
  0x3a   : > { %16423 = vmatpush3.bf16.msra.mxu0 %v16422_v54 }
  0x3b   : > { %1459 = vrot.lane.b32.xlu1 %v251_v10, %s16753_s12  ;;  %16424 = vmatprep.subr.bf16.mxu0 %v16761_v38 }
  0x3c   : > { %1462 = vrot.lane.b32.xlu0 %v16904_v11, %s16754_s13  ;;  %s16763_s13 = smov 64  }
  0x3e   : > { %16426 = vmatpush3.bf16.msra.mxu0 %v16425_v61 }
  0x3f   : > { %1465 = vrot.lane.b32.xlu1 %v253_v12, %s16755_s14  ;;  %16436 = vmatprep.subr.bf16.mxu0 %v16761_v38 }
  0x40   : > { %1468 = vrot.lane.b32.xlu0 %v254_v13, %s16756_s15  ;;  %v1980_v13 = vld [vmem:[%s19201_s2 + $0xc0] sm:$0xff] }
  0x43   : > { %1471 = vrot.lane.b32.xlu1 %v255_v14, %s16757_s16  ;;  %v1981_v14 = vld [vmem:[%s19201_s2 + $0xc8] sm:$0xff] }
  0x44   : > { %1474 = vrot.lane.b32.xlu0 %v256_v15, %s16758_s17 }
  0x47   : > { %1477 = vrot.lane.b32.xlu1 %v257_v16, %s16759_s20 }
  0x48   : > { %1480 = vrot.lane.b32.xlu0 %v258_v17, %s16760_s21  ;;  %v17058_v17 = vpack.c.bf16 %v1981_v14, %v1980_v13 }
  0x4a   : > { %16429 = vmatpush3.bf16.msra.mxu1 %v17058_v17 }
  0x4b   : > { %16430 = vmatprep.subr.bf16.mxu1 %v16761_v38 }
  0x9e   : > { %v1439_v20 = vpop.permute.xlu0 %1438 }
  0x9f   : > { %v1483_v21 = vsel %vm265_vm2, %v16829_v2, %v1439_v20  ;;  %vm1508_vm2 = vcmask 457728  }
  0xa1   : > { %v1445_v22 = vpop.permute.xlu1 %1444 }
  0xa2   : > { %v1442_v23 = vpop.permute.xlu0 %1441 }
  0xa3   : > { %v1485_v24 = vsel %vm1484_vm5, %v1483_v21, %v1442_v23  ;;  %v1982_v21 = vld [vmem:[%s19201_s2 + $0xd0] sm:$0xff] }
  0xa4   : > { %v1487_v27 = vsel %vm1486_vm6, %v1485_v24, %v1445_v22  ;;  %vm1510_vm6 = vcmask 490496   ;;  %v1983_v22 = vld [vmem:[%s19201_s2 + $0xd8] sm:$0xff] }
  0xa5   : > { %v1448_v25 = vpop.permute.xlu1 %1447 }
  0xa6   : > { %v1451_v26 = vpop.permute.xlu0 %1450  ;;  %v1489_v28 = vsel %vm1488_vm7, %v1487_v27, %v1448_v25  ;;  %v17076_v25 = vpack.c.bf16 %v1983_v22, %v1982_v21 }
  0xa7   : > { %v1491_v29 = vsel %vm1490_vm8, %v1489_v28, %v1451_v26  ;;  %vm1525_vm8 = vcmask 523264  }
  0xa8   : > { %16432 = vmatpush3.bf16.msra.mxu1 %v17076_v25 }
  0xa9   : > { %v1454_v30 = vpop.permute.xlu1 %1453  ;;  %16433 = vmatprep.subr.bf16.mxu1 %v16761_v38 }
  0xaa   : > { %v1457_v31 = vpop.permute.xlu0 %1456  ;;  %v1493_v32 = vsel %vm1492_vm9, %v1491_v29, %v1454_v30  ;;  %v1984_v29 = vld [vmem:[%s19201_s2 + $0xe0] sm:$0xff]  ;;  %v1985_v30 = vld [vmem:[%s19201_s2 + $0xe8] sm:$0xff] }
  0xab   : > { %v1495_v33 = vsel %vm1494_vm10, %v1493_v32, %v1457_v31  ;;  %vm1681_vm10 = vcmask 18432  }
  0xad   : > { %v1460_v34 = vpop.permute.xlu1 %1459 }
  0xae   : > { %v1463_v37 = vpop.permute.xlu0 %1462  ;;  %v1497_v39 = vsel %vm1496_vm11, %v1495_v33, %v1460_v34  ;;  %v17095_v33 = vpack.c.bf16 %v1985_v30, %v1984_v29 }
  0xaf   : > { %v1499_v41 = vsel %vm1498_vm12, %v1497_v39, %v1463_v37  ;;  %vm2886_vm12 = vcmask 588800  }
  0xb0   : > { %16435 = vmatpush3.bf16.msra.mxu1 %v17095_v33 }
  0xb1   : > { %v1466_v42 = vpop.permute.xlu1 %1465  ;;  %15421 = vmatprep.subr.mxu1 %v16744_v1 }
  0xb2   : > { %v1469_v45 = vpop.permute.xlu0 %1468  ;;  %v1501_v46 = vsel %vm1500_vm13, %v1499_v41, %v1466_v42 }
  0xb3   : > { %v1503_v48 = vsel %vm1502_vm14, %v1501_v46, %v1469_v45  ;;  %vm2903_vm14 = vcmask 654336  }
  0xb4   : > { %15422 = vmatpush3.msra.mxu1 %v17115_v43 }
  0xb5   : > { %v1472_v49 = vpop.permute.xlu1 %1471  ;;  %16445 = vmatprep.subr.bf16.mxu1 %v16761_v38 }
  0xb6   : > { %v1475_v52 = vpop.permute.xlu0 %1474  ;;  %v1505_v53 = vsel %vm1504_vm15, %v1503_v48, %v1472_v49 }
  0xb7   : > { %v1507_v55 = vsel %vm1506_vm0, %v1505_v53, %v1475_v52  ;;  %vm10371_vm0 = vcmask 59392  }
  0xb9   : > { %v1478_v56 = vpop.permute.xlu1 %1477 }
  0xba   : > { %v1481_v59 = vpop.permute.xlu0 %1480  ;;  %v1509_v60 = vsel %vm1508_vm2, %v1507_v55, %v1478_v56 }
  0xbb   : > { %v1511_v62 = vsel %vm1510_vm6, %v1509_v60, %v1481_v59 }
  0xbc   : > { %15402 = vmatmul.mubr.msk.f32.vlgmr.msra.gmra.mrb[16].mxu0 %vm1525_vm8, %v1511_v62 }
  0xbd   : > { %15440 = vmatprep.mubr.msk.f32.mxu0 %vm16745_vm1, %v16744_v1  ;;  %16438 = vmatpush3.bf16.msra.mxu0 %v17058_v17 }
  0xbe   : > { %16439 = vmatprep.subr.bf16.mxu0 %v16761_v38 }
  0xc1   : > { %16441 = vmatpush3.bf16.msra.mxu0 %v17076_v25 }
  0xc2   : > { %16442 = vmatprep.subr.bf16.mxu0 %v16761_v38 }
  0xc5   : > { %16444 = vmatpush3.bf16.msra.mxu0 %v17095_v33 }
  0xc6   : > { %15438 = vmatprep.subr.mxu0 %v16744_v1 }
  0xc9   : > { %15439 = vmatpush3.msra.mxu0 %v17115_v43 }
  0xca   : > { %16454 = vmatprep.subr.bf16.mxu0 %v16761_v38 }
  0xe4   : > { %v339_v0 = vpop.f32.mrb[0].mxu0  ;;  %v412_v2 = vpop.f32.mrb[0].mxu1 }
  0xe5   : > { %v17035_v3 = vadd.f32 %v17032_v63, %v339_v0  ;;  %v17038_v4 = vadd.f32 %v17032_v63, %v412_v2  ;;  %v15309_v5 = vpop.f32.mrb[1].mxu0  ;;  %v15314_v6 = vpop.f32.mrb[1].mxu1 }
  0xe7   : > { %1735 = vrot.lane.b32.xlu1 %v17038_v4, %s16748_s7 }
  0xe8   : > { %v485_v7 = vpop.f32.mrb[2].mxu0  ;;  %v558_v8 = vpop.f32.mrb[2].mxu1 }
  0xe9   : > { %v17043_v9 = vadd.f32 %v17032_v63, %v485_v7  ;;  %v15319_v10 = vpop.f32.mrb[3].mxu0  ;;  %v15324_v11 = vpop.f32.mrb[3].mxu1  ;;  %v17046_v12 = vadd.f32 %v17032_v63, %v558_v8 }
  0xeb   : > { %1766 = vrot.lane.b32.xlu1 %v17043_v9, %s16749_s8  ;;  %1737 = vrot.lane.b32.xlu0 %v17043_v9, %s16748_s7 }
  0xec   : > { %v631_v15 = vpop.f32.mrb[4].mxu0  ;;  %v704_v16 = vpop.f32.mrb[4].mxu1 }
  0xed   : > { %v15329_v18 = vpop.f32.mrb[5].mxu0  ;;  %v15334_v19 = vpop.f32.mrb[5].mxu1  ;;  %v17067_v20 = vadd.f32 %v17032_v63, %v631_v15  ;;  %v17082_v28 = vadd.f32 %v17032_v63, %v704_v16 }
  0xef   : > { %1797 = vrot.lane.b32.xlu1 %v17046_v12, %s16751_s10  ;;  %1768 = vrot.lane.b32.xlu0 %v17046_v12, %s16749_s8 }
  0xf0   : > { %v777_v23 = vpop.f32.mrb[6].mxu0  ;;  %v850_v24 = vpop.f32.mrb[6].mxu1 }
  0xf1   : > { %v15339_v26 = vpop.f32.mrb[7].mxu0  ;;  %v15344_v27 = vpop.f32.mrb[7].mxu1  ;;  %v17136_v50 = vadd.f32 %v17032_v63, %v777_v23  ;;  %v17145_v57 = vadd.f32 %v17032_v63, %v850_v24 }
  0xf3   : > { %1739 = vrot.lane.b32.xlu1 %v17046_v12, %s16748_s7  ;;  %1799 = vrot.lane.b32.xlu0 %v17067_v20, %s16751_s10 }
  0xf4   : > { %v923_v31 = vpop.f32.mrb[8].mxu0  ;;  %v996_v32 = vpop.f32.mrb[8].mxu1 }
  0xf5   : > { %v15349_v34 = vpop.f32.mrb[9].mxu0  ;;  %v15354_v35 = vpop.f32.mrb[9].mxu1  ;;  %v17174_v60 = vadd.f32 %v17032_v63, %v923_v31  ;;  %v17177_v61 = vadd.f32 %v17032_v63, %v996_v32 }
  0xf7   : > { %1828 = vrot.lane.b32.xlu1 %v17067_v20, %s16753_s12  ;;  %1830 = vrot.lane.b32.xlu0 %v17082_v28, %s16753_s12 }
  0xf8   : > { %v1069_v36 = vpop.f32.mrb[10].mxu0  ;;  %v1142_v37 = vpop.f32.mrb[10].mxu1 }
  0xf9   : > { %v17107_v39 = vadd.f32 %v17032_v63, %v1069_v36  ;;  %v15359_v40 = vpop.f32.mrb[11].mxu0  ;;  %v17110_v41 = vadd.f32 %v17032_v63, %v1142_v37  ;;  %v15364_v42 = vpop.f32.mrb[11].mxu1 }
  0xfb   : > { %1859 = vrot.lane.b32.xlu1 %v17082_v28, %s16755_s14  ;;  %1741 = vrot.lane.b32.xlu0 %v17067_v20, %s16748_s7 }
  0xfc   : > { %v1215_v44 = vpop.f32.mrb[12].mxu0  ;;  %v1288_v45 = vpop.f32.mrb[12].mxu1 }
  0xfd   : > { %v17126_v46 = vadd.f32 %v17032_v63, %v1215_v44  ;;  %v17129_v47 = vadd.f32 %v17032_v63, %v1288_v45  ;;  %v15369_v48 = vpop.f32.mrb[13].mxu0  ;;  %v15374_v49 = vpop.f32.mrb[13].mxu1 }
  0xff   : > { %1770 = vrot.lane.b32.xlu1 %v17067_v20, %s16749_s8  ;;  %1772 = vrot.lane.b32.xlu0 %v17082_v28, %s16749_s8 }
 0x100   : > { %v1361_v51 = vpop.f32.mrb[14].mxu0  ;;  %v1434_v52 = vpop.f32.mrb[14].mxu1 }
 0x101   : > { %v17139_v53 = vadd.f32 %v17032_v63, %v1361_v51  ;;  %v17142_v54 = vadd.f32 %v17032_v63, %v1434_v52  ;;  %v15384_v55 = vpop.f32.mrb[15].mxu1  ;;  %v15379_v56 = vpop.f32.mrb[15].mxu0 }
 0x103   : > { %1801 = vrot.lane.b32.xlu1 %v17082_v28, %s16751_s10  ;;  %1861 = vrot.lane.b32.xlu0 %v17136_v50, %s16755_s14 }
 0x104   : > { %v17151_v58 = vpop.f32.mrb[16].mxu1 }
 0x105   : > { %v15408_v59 = vpop.f32.mrb[17].mxu1  ;;  %v1680_v24 = vmax.f32 %v17151_v58, 0.0 }
 0x107   : > { %1743 = vrot.lane.b32.xlu1 %v17082_v28, %s16748_s7  ;;  %1892 = vrot.lane.b32.xlu0 %v17145_v57, %s16757_s16 }
 0x10b   : > { %1890 = vrot.lane.b32.xlu1 %v17136_v50, %s16757_s16  ;;  %1803 = vrot.lane.b32.xlu0 %v17136_v50, %s16751_s10 }
 0x10f   : > { %1832 = vrot.lane.b32.xlu1 %v17136_v50, %s16753_s12  ;;  %1834 = vrot.lane.b32.xlu0 %v17145_v57, %s16753_s12 }
 0x113   : > { %1863 = vrot.lane.b32.xlu1 %v17145_v57, %s16755_s14  ;;  %1745 = vrot.lane.b32.xlu0 %v17136_v50, %s16748_s7 }
 0x117   : > { %1774 = vrot.lane.b32.xlu1 %v17136_v50, %s16749_s8  ;;  %1776 = vrot.lane.b32.xlu0 %v17145_v57, %s16749_s8 }
 0x11b   : > { %1805 = vrot.lane.b32.xlu1 %v17145_v57, %s16751_s10  ;;  %1865 = vrot.lane.b32.xlu0 %v17174_v60, %s16755_s14 }
 0x11f   : > { %1747 = vrot.lane.b32.xlu1 %v17145_v57, %s16748_s7  ;;  %1896 = vrot.lane.b32.xlu0 %v17177_v61, %s16757_s16 }
 0x123   : > { %1894 = vrot.lane.b32.xlu1 %v17174_v60, %s16757_s16  ;;  %1807 = vrot.lane.b32.xlu0 %v17174_v60, %s16751_s10 }
 0x127   : > { %1836 = vrot.lane.b32.xlu1 %v17174_v60, %s16753_s12  ;;  %1838 = vrot.lane.b32.xlu0 %v17177_v61, %s16753_s12 }
 0x12b   : > { %1867 = vrot.lane.b32.xlu1 %v17177_v61, %s16755_s14  ;;  %1749 = vrot.lane.b32.xlu0 %v17174_v60, %s16748_s7 }
 0x12f   : > { %1778 = vrot.lane.b32.xlu1 %v17174_v60, %s16749_s8  ;;  %1780 = vrot.lane.b32.xlu0 %v17177_v61, %s16749_s8 }
 0x133   : > { %1809 = vrot.lane.b32.xlu1 %v17177_v61, %s16751_s10  ;;  %1869 = vrot.lane.b32.xlu0 %v17107_v39, %s16755_s14 }
 0x137   : > { %1751 = vrot.lane.b32.xlu1 %v17177_v61, %s16748_s7  ;;  %1900 = vrot.lane.b32.xlu0 %v17110_v41, %s16757_s16 }
 0x13b   : > { %1898 = vrot.lane.b32.xlu1 %v17107_v39, %s16757_s16  ;;  %1811 = vrot.lane.b32.xlu0 %v17107_v39, %s16751_s10 }
 0x13f   : > { %1840 = vrot.lane.b32.xlu1 %v17107_v39, %s16753_s12  ;;  %1842 = vrot.lane.b32.xlu0 %v17110_v41, %s16753_s12 }
 0x143   : > { %1871 = vrot.lane.b32.xlu1 %v17110_v41, %s16755_s14  ;;  %1753 = vrot.lane.b32.xlu0 %v17107_v39, %s16748_s7 }
 0x147   : > { %1782 = vrot.lane.b32.xlu1 %v17107_v39, %s16749_s8  ;;  %1784 = vrot.lane.b32.xlu0 %v17110_v41, %s16749_s8 }
 0x14b   : > { %1902 = vrot.lane.b32.xlu1 %v17126_v46, %s16757_s16  ;;  %1873 = vrot.lane.b32.xlu0 %v17126_v46, %s16755_s14 }
 0x14f   : > { %1813 = vrot.lane.b32.xlu1 %v17110_v41, %s16751_s10  ;;  %1904 = vrot.lane.b32.xlu0 %v17129_v47, %s16757_s16 }
 0x153   : > { %1844 = vrot.lane.b32.xlu1 %v17126_v46, %s16753_s12  ;;  %1815 = vrot.lane.b32.xlu0 %v17126_v46, %s16751_s10 }
 0x157   : > { %1875 = vrot.lane.b32.xlu1 %v17129_v47, %s16755_s14  ;;  %1846 = vrot.lane.b32.xlu0 %v17129_v47, %s16753_s12 }
 0x159   : > { %v1736_v62 = vpop.permute.xlu1 %1735 }
 0x15a   : > { %v1920_v26 = vsel %vm1484_vm5, %v17035_v3, %v1736_v62  ;;  %v1682_v3 = vsel %vm1681_vm10, %v1680_v24, -inf }
 0x15b   : > { %1906 = vrot.lane.b32.xlu1 %v17139_v53, %s16757_s16  ;;  %1877 = vrot.lane.b32.xlu0 %v17139_v53, %s16755_s14 }
 0x15d   : > { %v1767_v63 = vpop.permute.xlu1 %1766  ;;  %v1738_v0 = vpop.permute.xlu0 %1737 }
 0x15e   : > { %v1921_v16 = vsel %vm1484_vm5, %v17038_v4, %v1738_v0  ;;  %v1930_v4 = vsel %vm1488_vm7, %v1920_v26, %v1767_v63 }
 0x15f   : > { %1908 = vrot.lane.b32.xlu0 %v17142_v54, %s16757_s16 }
 0x161   : > { %v1798_v2 = vpop.permute.xlu1 %1797  ;;  %v1769_v5 = vpop.permute.xlu0 %1768 }
 0x162   : > { %v1931_v21 = vsel %vm1488_vm7, %v1921_v16, %v1769_v5  ;;  %v1940_v32 = vsel %vm1492_vm9, %v1930_v4, %v1798_v2 }
 0x165   : > { %v17249_v6 = vpop.permute.xlu1 %1739  ;;  %v1800_v7 = vpop.permute.xlu0 %1799 }
 0x166   : > { %v1941_v22 = vsel %vm1492_vm9, %v1931_v21, %v1800_v7  ;;  %v1922_v0 = vsel %vm1484_vm5, %v17043_v9, %v17249_v6 }
 0x169   : > { %v1829_v8 = vpop.permute.xlu1 %1828  ;;  %v1831_v10 = vpop.permute.xlu0 %1830 }
 0x16a   : > { %v1951_v23 = vsel %vm1496_vm11, %v1941_v22, %v1831_v10  ;;  %v1950_v34 = vsel %vm1496_vm11, %v1940_v32, %v1829_v8 }
 0x16d   : > { %v1860_v11 = vpop.permute.xlu1 %1859  ;;  %v1742_v13 = vpop.permute.xlu0 %1741 }
 0x16e   : > { %v1960_v35 = vsel %vm1500_vm13, %v1950_v34, %v1860_v11  ;;  %v1923_v52 = vsel %vm1484_vm5, %v17046_v12, %v1742_v13 }
 0x171   : > { %v1771_v14 = vpop.permute.xlu1 %1770  ;;  %v1773_v15 = vpop.permute.xlu0 %1772 }
 0x172   : > { %v1933_v59 = vsel %vm1488_vm7, %v1923_v52, %v1773_v15  ;;  %v1932_v12 = vsel %vm1488_vm7, %v1922_v0, %v1771_v14 }
 0x175   : > { %v1802_v18 = vpop.permute.xlu1 %1801  ;;  %v1862_v19 = vpop.permute.xlu0 %1861 }
 0x176   : > { %v1961_v27 = vsel %vm1500_vm13, %v1951_v23, %v1862_v19  ;;  %v1942_v10 = vsel %vm1492_vm9, %v1932_v12, %v1802_v18 }
 0x179   : > { %v17260_v29 = vpop.permute.xlu1 %1743  ;;  %v1893_v30 = vpop.permute.xlu0 %1892 }
 0x17a   : > { %v1971_v31 = vsel %vm1504_vm15, %v1961_v27, %v1893_v30  ;;  %v1924_v32 = vsel %vm1484_vm5, %v17067_v20, %v17260_v29 }
 0x17b   : > { %15441 = vmatmul.mubr.msk.f32.vlgmr.msra.gmra.mrb[18].mxu0 %vm1508_vm2, %v1971_v31 }
 0x17c   : > { %16456 = vmatpush3.bf16.msra.mxu0 %v17058_v17  ;;  %15474 = vmatprep.mubr.msk.f32.mxu0 %vm16745_vm1, %v16744_v1 }
 0x17d   : > { %v1891_v36 = vpop.permute.xlu1 %1890  ;;  %v1804_v37 = vpop.permute.xlu0 %1803  ;;  %16457 = vmatprep.subr.bf16.mxu0 %v16761_v38 }
 0x17e   : > { %v1970_v40 = vsel %vm1504_vm15, %v1960_v35, %v1891_v36  ;;  %v1943_v62 = vsel %vm1492_vm9, %v1933_v59, %v1804_v37 }
 0x17f   : > { %15424 = vmatmul.mubr.msk.f32.vlgmr.msra.gmra.mrb[18].mxu1 %vm1508_vm2, %v1970_v40  ;;  %1683 = vmax.xlane.f32.xlu1 %v1682_v3 }
 0x180   : > { %16447 = vmatpush3.bf16.msra.mxu1 %v17058_v17  ;;  %16459 = vmatpush3.bf16.msra.mxu0 %v17076_v25 }
 0x181   : > { %v1833_v42 = vpop.permute.xlu1 %1832  ;;  %v1835_v44 = vpop.permute.xlu0 %1834  ;;  %16448 = vmatprep.subr.bf16.mxu1 %v16761_v38  ;;  %16460 = vmatprep.subr.bf16.mxu0 %v16761_v38 }
 0x182   : > { %15457 = vmatprep.mubr.msk.f32.mxu1 %vm16745_vm1, %v16744_v1  ;;  %v1953_v63 = vsel %vm1496_vm11, %v1943_v62, %v1835_v44  ;;  %v1952_v11 = vsel %vm1496_vm11, %v1942_v10, %v1833_v42 }
 0x184   : > { %16450 = vmatpush3.bf16.msra.mxu1 %v17076_v25  ;;  %16462 = vmatpush3.bf16.msra.mxu0 %v17095_v33 }
 0x185   : > { %v1864_v45 = vpop.permute.xlu1 %1863  ;;  %v1746_v48 = vpop.permute.xlu0 %1745  ;;  %16451 = vmatprep.subr.bf16.mxu1 %v16761_v38  ;;  %15472 = vmatprep.subr.mxu0 %v16744_v1 }
 0x186   : > { %v1962_v9 = vsel %vm1500_vm13, %v1952_v11, %v1864_v45  ;;  %v1925_v23 = vsel %vm1484_vm5, %v17082_v28, %v1746_v48 }
 0x188   : > { %16453 = vmatpush3.bf16.msra.mxu1 %v17095_v33  ;;  %15473 = vmatpush3.msra.mxu0 %v17115_v43 }
 0x189   : > { %v1775_v49 = vpop.permute.xlu1 %1774  ;;  %v1777_v51 = vpop.permute.xlu0 %1776  ;;  %15455 = vmatprep.subr.mxu1 %v16744_v1  ;;  %16472 = vmatprep.subr.bf16.mxu0 %v16761_v38 }
 0x18a   : > { %v1935_v30 = vsel %vm1488_vm7, %v1925_v23, %v1777_v51  ;;  %v1934_v28 = vsel %vm1488_vm7, %v1924_v32, %v1775_v49 }
 0x18c   : > { %15456 = vmatpush3.msra.mxu1 %v17115_v43 }
 0x18d   : > { %v1806_v55 = vpop.permute.xlu1 %1805  ;;  %v1866_v56 = vpop.permute.xlu0 %1865  ;;  %16463 = vmatprep.subr.bf16.mxu1 %v16761_v38 }
 0x18e   : > { %v1963_v2 = vsel %vm1500_vm13, %v1953_v63, %v1866_v56  ;;  %v1944_v37 = vsel %vm1492_vm9, %v1934_v28, %v1806_v55 }
 0x191   : > { %v17302_v5 = vpop.permute.xlu1 %1747  ;;  %v1897_v7 = vpop.permute.xlu0 %1896 }
 0x192   : > { %v1973_v8 = vsel %vm1504_vm15, %v1963_v2, %v1897_v7  ;;  %v1926_v52 = vsel %vm1484_vm5, %v17136_v50, %v17302_v5 }
 0x193   : > { %15475 = vmatmul.mubr.msk.f32.vlgmr.msra.gmra.mrb[20].mxu0 %vm1508_vm2, %v1973_v8 }
 0x194   : > { %16474 = vmatpush3.bf16.msra.mxu0 %v17058_v17  ;;  %15508 = vmatprep.mubr.msk.f32.mxu0 %vm16745_vm1, %v16744_v1 }
 0x195   : > { %v1895_v6 = vpop.permute.xlu1 %1894  ;;  %v1808_v13 = vpop.permute.xlu0 %1807  ;;  %16475 = vmatprep.subr.bf16.mxu0 %v16761_v38 }
 0x196   : > { %v1972_v14 = vsel %vm1504_vm15, %v1962_v9, %v1895_v6  ;;  %v1945_v4 = vsel %vm1492_vm9, %v1935_v30, %v1808_v13 }
 0x197   : > { %15458 = vmatmul.mubr.msk.f32.vlgmr.msra.gmra.mrb[20].mxu1 %vm1508_vm2, %v1972_v14 }
 0x198   : > { %16465 = vmatpush3.bf16.msra.mxu1 %v17058_v17  ;;  %16477 = vmatpush3.bf16.msra.mxu0 %v17076_v25 }
 0x199   : > { %v1837_v15 = vpop.permute.xlu1 %1836  ;;  %v1839_v16 = vpop.permute.xlu0 %1838  ;;  %16466 = vmatprep.subr.bf16.mxu1 %v16761_v38  ;;  %16478 = vmatprep.subr.bf16.mxu0 %v16761_v38 }
 0x19a   : > { %15491 = vmatprep.mubr.msk.f32.mxu1 %vm16745_vm1, %v16744_v1  ;;  %v1955_v31 = vsel %vm1496_vm11, %v1945_v4, %v1839_v16  ;;  %v1954_v40 = vsel %vm1496_vm11, %v1944_v37, %v1837_v15 }
 0x19c   : > { %16468 = vmatpush3.bf16.msra.mxu1 %v17076_v25  ;;  %16480 = vmatpush3.bf16.msra.mxu0 %v17095_v33 }
 0x19d   : > { %v1868_v18 = vpop.permute.xlu1 %1867  ;;  %v1750_v19 = vpop.permute.xlu0 %1749  ;;  %16469 = vmatprep.subr.bf16.mxu1 %v16761_v38  ;;  %15506 = vmatprep.subr.mxu0 %v16744_v1 }
 0x19e   : > { %v1964_v20 = vsel %vm1500_vm13, %v1954_v40, %v1868_v18  ;;  %v1927_v0 = vsel %vm1484_vm5, %v17145_v57, %v1750_v19 }
 0x1a0   : > { %16471 = vmatpush3.bf16.msra.mxu1 %v17095_v33  ;;  %15507 = vmatpush3.msra.mxu0 %v17115_v43 }
 0x1a1   : > { %v1779_v21 = vpop.permute.xlu1 %1778  ;;  %v1781_v22 = vpop.permute.xlu0 %1780  ;;  %15489 = vmatprep.subr.mxu1 %v16744_v1  ;;  %16490 = vmatprep.subr.bf16.mxu0 %v16761_v38 }
 0x1a2   : > { %v1936_v59 = vsel %vm1488_vm7, %v1926_v52, %v1779_v21  ;;  %v1937_v12 = vsel %vm1488_vm7, %v1927_v0, %v1781_v22 }
 0x1a4   : > { %15490 = vmatpush3.msra.mxu1 %v17115_v43 }
 0x1a5   : > { %v1810_v26 = vpop.permute.xlu1 %1809  ;;  %v1870_v27 = vpop.permute.xlu0 %1869  ;;  %16481 = vmatprep.subr.bf16.mxu1 %v16761_v38 }
 0x1a6   : > { %v1965_v34 = vsel %vm1500_vm13, %v1955_v31, %v1870_v27  ;;  %v1946_v62 = vsel %vm1492_vm9, %v1936_v59, %v1810_v26 }
 0x1a9   : > { %v17341_v3 = vpop.permute.xlu1 %1751  ;;  %v1901_v35 = vpop.permute.xlu0 %1900 }
 0x1aa   : > { %v1975_v36 = vsel %vm1504_vm15, %v1965_v34, %v1901_v35  ;;  %v1928_v18 = vsel %vm1484_vm5, %v17174_v60, %v17341_v3 }
 0x1ab   : > { %15509 = vmatmul.mubr.msk.f32.vlgmr.msra.gmra.mrb[22].mxu0 %vm1508_vm2, %v1975_v36 }
 0x1ac   : > { %16492 = vmatpush3.bf16.msra.mxu0 %v17058_v17  ;;  %15542 = vmatprep.mubr.msk.f32.mxu0 %vm16745_vm1, %v16744_v1 }
 0x1ad   : > { %v1899_v29 = vpop.permute.xlu1 %1898  ;;  %v1812_v42 = vpop.permute.xlu0 %1811  ;;  %16493 = vmatprep.subr.bf16.mxu0 %v16761_v38 }
 0x1ae   : > { %v1974_v44 = vsel %vm1504_vm15, %v1964_v20, %v1899_v29  ;;  %v1947_v10 = vsel %vm1492_vm9, %v1937_v12, %v1812_v42  ;;  %v17438_v20 = vld [vmem:[%s19201_s2 + $0xf8] ss:$0 sm:$0xff] }
 0x1af   : > { %15492 = vmatmul.mubr.msk.f32.vlgmr.msra.gmra.mrb[22].mxu1 %vm1508_vm2, %v1974_v44 }
 0x1b0   : > { %16483 = vmatpush3.bf16.msra.mxu1 %v17058_v17  ;;  %16495 = vmatpush3.bf16.msra.mxu0 %v17076_v25 }
 0x1b1   : > { %v1841_v45 = vpop.permute.xlu1 %1840  ;;  %v1843_v48 = vpop.permute.xlu0 %1842  ;;  %16484 = vmatprep.subr.bf16.mxu1 %v16761_v38  ;;  %16496 = vmatprep.subr.bf16.mxu0 %v16761_v38 }
 0x1b2   : > { %15525 = vmatprep.mubr.msk.f32.mxu1 %vm16745_vm1, %v16744_v1  ;;  %v1956_v63 = vsel %vm1496_vm11, %v1946_v62, %v1841_v45  ;;  %v1957_v11 = vsel %vm1496_vm11, %v1947_v10, %v1843_v48 }
 0x1b4   : > { %16486 = vmatpush3.bf16.msra.mxu1 %v17076_v25  ;;  %16498 = vmatpush3.bf16.msra.mxu0 %v17095_v33 }
 0x1b5   : > { %v1872_v49 = vpop.permute.xlu1 %1871  ;;  %v1754_v51 = vpop.permute.xlu0 %1753  ;;  %16487 = vmatprep.subr.bf16.mxu1 %v16761_v38  ;;  %15540 = vmatprep.subr.mxu0 %v16744_v1 }
 0x1b6   : > { %v1966_v2 = vsel %vm1500_vm13, %v1956_v63, %v1872_v49 }
 0x1b8   : > { %16489 = vmatpush3.bf16.msra.mxu1 %v17095_v33  ;;  %15541 = vmatpush3.msra.mxu0 %v17115_v43 }
 0x1b9   : > { %v1783_v55 = vpop.permute.xlu1 %1782  ;;  %v1785_v56 = vpop.permute.xlu0 %1784  ;;  %15523 = vmatprep.subr.mxu1 %v16744_v1  ;;  %16508 = vmatprep.subr.bf16.mxu0 %v16761_v38 }
 0x1bc   : > { %15524 = vmatpush3.msra.mxu1 %v17115_v43 }
 0x1bd   : > { %v1903_v5 = vpop.permute.xlu1 %1902  ;;  %v1874_v7 = vpop.permute.xlu0 %1873  ;;  %16499 = vmatprep.subr.bf16.mxu1 %v16761_v38 }
 0x1be   : > { %v1976_v8 = vsel %vm1504_vm15, %v1966_v2, %v1903_v5  ;;  %v1967_v9 = vsel %vm1500_vm13, %v1957_v11, %v1874_v7 }
 0x1bf   : > { %15526 = vmatmul.mubr.msk.f32.vlgmr.msra.gmra.mrb[24].mxu1 %vm1508_vm2, %v1976_v8 }
 0x1c0   : > { %16501 = vmatpush3.bf16.msra.mxu1 %v17058_v17  ;;  %15559 = vmatprep.mubr.msk.f32.mxu1 %vm16745_vm1, %v16744_v1 }
 0x1c1   : > { %v1814_v6 = vpop.permute.xlu1 %1813  ;;  %v1905_v13 = vpop.permute.xlu0 %1904  ;;  %16502 = vmatprep.subr.bf16.mxu1 %v16761_v38 }
 0x1c2   : > { %v1977_v14 = vsel %vm1504_vm15, %v1967_v9, %v1905_v13 }
 0x1c3   : > { %15543 = vmatmul.mubr.msk.f32.vlgmr.msra.gmra.mrb[24].mxu0 %vm1508_vm2, %v1977_v14 }
 0x1c4   : > { %16504 = vmatpush3.bf16.msra.mxu1 %v17076_v25  ;;  %16510 = vmatpush3.bf16.msra.mxu0 %v17058_v17  ;;  %v1938_v17 = vsel %vm1488_vm7, %v1928_v18, %v1783_v55 }
 0x1c5   : > { %v1845_v15 = vpop.permute.xlu1 %1844  ;;  %v1816_v16 = vpop.permute.xlu0 %1815  ;;  %16505 = vmatprep.subr.bf16.mxu1 %v16761_v38  ;;  %16511 = vmatprep.subr.bf16.mxu0 %v16761_v38  ;;  %v1948_v22 = vsel %vm1492_vm9, %v1938_v17, %v1814_v6 }
 0x1c6   : > { %15576 = vmatprep.mubr.msk.f32.mxu0 %vm16745_vm1, %v16744_v1  ;;  %v1958_v23 = vsel %vm1496_vm11, %v1948_v22, %v1845_v15 }
 0x1c8   : > { %16507 = vmatpush3.bf16.msra.mxu1 %v17095_v33  ;;  %16513 = vmatpush3.bf16.msra.mxu0 %v17076_v25  ;;  %v1929_v25 = vsel %vm1484_vm5, %v17177_v61, %v1754_v51 }
 0x1c9   : > { %v1876_v19 = vpop.permute.xlu1 %1875  ;;  %v1847_v21 = vpop.permute.xlu0 %1846  ;;  %15557 = vmatprep.subr.mxu1 %v16744_v1  ;;  %16514 = vmatprep.subr.bf16.mxu0 %v16761_v38  ;;  %v1939_v4 = vsel %vm1488_vm7, %v1929_v25, %v1785_v56 }
 0x1ca   : > { %v1968_v26 = vsel %vm1500_vm13, %v1958_v23, %v1876_v19  ;;  %v1949_v32 = vsel %vm1492_vm9, %v1939_v4, %v1816_v16 }
 0x1cc   : > { %15558 = vmatpush3.msra.mxu1 %v17115_v43  ;;  %16516 = vmatpush3.bf16.msra.mxu0 %v17095_v33  ;;  %v1959_v33 = vsel %vm1496_vm11, %v1949_v32, %v1847_v21 }
 0x1cd   : > { %v1907_v27 = vpop.permute.xlu1 %1906  ;;  %v1878_v30 = vpop.permute.xlu0 %1877  ;;  %15574 = vmatprep.subr.mxu0 %v16744_v1  ;;  %15602 = vmatprep.subr.mxu1 %v16744_v1 }
 0x1ce   : > { %v1978_v31 = vsel %vm1504_vm15, %v1968_v26, %v1907_v27  ;;  %v1969_v34 = vsel %vm1500_vm13, %v1959_v33, %v1878_v30 }
 0x1cf   : > { %15560 = vmatmul.mubr.msk.f32.vlgmr.msra.gmra.mrb[26].mxu1 %vm1508_vm2, %v1978_v31 }
 0x1d0   : > { %15575 = vmatpush3.msra.mxu0 %v17115_v43  ;;  %15604 = vmatprep.mubr.msk.f32.mxu1 %vm16745_vm1, %v16744_v1 }
 0x1d1   : > { %v1909_v3 = vpop.permute.xlu0 %1908  ;;  %16517 = vmatprep.subr.bf16.mxu0 %v16761_v38 }
 0x1d2   : > { %v1979_v35 = vsel %vm1504_vm15, %v1969_v34, %v1909_v3 }
 0x1d3   : > { %15577 = vmatmul.mubr.msk.f32.vlgmr.msra.gmra.mrb[26].mxu0 %vm1508_vm2, %v1979_v35 }
 0x1d4   : > { %15599 = vmatprep.mubr.msk.f32.mxu0 %vm16745_vm1, %v16744_v1 }
 0x20c   : > { %v1684_v28 = vpop.xlane.xlu1 %1683 }
 0x20d   : > { %v1685_v36 = vsub.f32 %v1680_v24, %v1684_v28 }
 0x20f   : > { %v1686_v43 = vmul.f32 1.442695, %v1685_v36 }
 0x211   : > { %16640 = vpow2.f32 %v1686_v43 }
 0x21b   : > { %v17431_v37 = vpop.eup %16640 }
 0x21c   : > { %v1688_v40 = vsel %vm1681_vm10, %v17431_v37, 0.0 }
 0x21d   : > { %1689 = vadd.xlane.f32.xlu0 %v1688_v40 }
 0x24e   : > { %v2134_v29 = vpop.f32.mrb[18].mxu0 }
 0x24f   : > { %v17441_v42 = vadd.f32 %v17438_v20, %v2134_v29  ;;  %v15442_v44 = vpop.f32.mrb[19].mxu0 }
 0x251   : > { %v14595_v58 = vmul.f32 -1.442695, %v17441_v42 }
 0x252   : > { %v2061_v24 = vpop.f32.mrb[18].mxu1 }
 0x253   : > { %16642 = vpow2.f32 %v14595_v58  ;;  %v15425_v45 = vpop.f32.mrb[19].mxu1  ;;  %v17473_v35 = vadd.f32 %v17438_v20, %v2061_v24 }
 0x255   : > { %v14594_v36 = vmul.f32 -1.442695, %v17473_v35 }
 0x25d   : > { %v16643_v48 = vpop.eup %16642 }
 0x25e   : > { %v2763_v49 = vadd.f32 1.0, %v16643_v48 }
 0x260   : > { %16644 = vrcp.f32 %v2763_v49 }
 0x266   : > { %v2280_v51 = vpop.f32.mrb[20].mxu0 }
 0x267   : > { %v17445_v52 = vadd.f32 %v17438_v20, %v2280_v51  ;;  %v15476_v55 = vpop.f32.mrb[21].mxu0 }
 0x269   : > { %v14597_v59 = vmul.f32 -1.442695, %v17445_v52 }
 0x26a   : > { %v16645_v56 = vpop.eup %16644  ;;  %v2207_v62 = vpop.f32.mrb[20].mxu1 }
 0x26b   : > { %v17449_v63 = vadd.f32 %v17438_v20, %v2207_v62  ;;  %v15459_v0 = vpop.f32.mrb[21].mxu1  ;;  %2804 = vrot.lane.b32.xlu0 %v16645_v56, %s16762_s26  ;;  %16646 = vpow2.f32 %v14597_v59 }
 0x26d   : > { %v14596_v2 = vmul.f32 -1.442695, %v17449_v63 }
 0x26f   : > { %16648 = vpow2.f32 %v14596_v2 }
 0x275   : > { %v16647_v5 = vpop.eup %16646 }
 0x276   : > { %v2765_v8 = vadd.f32 1.0, %v16647_v5 }
 0x279   : > { %v16649_v7 = vpop.eup %16648 }
 0x27a   : > { %v2764_v12 = vadd.f32 1.0, %v16649_v7 }
 0x27c   : > { %16650 = vrcp.f32 %v2764_v12 }
 0x27d   : > { %16652 = vrcp.f32 %v2765_v8 }
 0x27e   : > { %v2426_v10 = vpop.f32.mrb[22].mxu0 }
 0x27f   : > { %v17454_v11 = vadd.f32 %v17438_v20, %v2426_v10  ;;  %v15510_v9 = vpop.f32.mrb[23].mxu0 }
 0x281   : > { %v14599_v6 = vmul.f32 -1.442695, %v17454_v11 }
 0x282   : > { %v2353_v13 = vpop.f32.mrb[22].mxu1 }
 0x283   : > { %16654 = vpow2.f32 %v14599_v6  ;;  %v17458_v14 = vadd.f32 %v17438_v20, %v2353_v13  ;;  %v15493_v15 = vpop.f32.mrb[23].mxu1 }
 0x285   : > { %v14598_v16 = vmul.f32 -1.442695, %v17458_v14 }
 0x286   : > { %v16651_v18 = vpop.eup %16650 }
 0x287   : > { %16656 = vpow2.f32 %v14598_v16  ;;  %2806 = vrot.lane.b32.xlu1 %v16651_v18, %s16762_s26  ;;  %v16653_v19 = vpop.eup %16652 }
 0x28b   : > { %2808 = vrot.lane.b32.xlu1 %v16653_v19, %s16762_s26 }
 0x28d   : > { %v16655_v21 = vpop.eup %16654 }
 0x28e   : > { %v2767_v17 = vadd.f32 1.0, %v16655_v21 }
 0x290   : > { %16658 = vrcp.f32 %v2767_v17 }
 0x291   : > { %v16657_v22 = vpop.eup %16656 }
 0x292   : > { %v2766_v23 = vadd.f32 1.0, %v16657_v22  ;;  %v2499_v25 = vpop.f32.mrb[24].mxu1 }
 0x293   : > { %v17464_v26 = vadd.f32 %v17438_v20, %v2499_v25  ;;  %v15527_v27 = vpop.f32.mrb[25].mxu1 }
 0x294   : > { %16660 = vrcp.f32 %v2766_v23 }
 0x295   : > { %v14600_v30 = vmul.f32 -1.442695, %v17464_v26 }
 0x296   : > { %v2572_v4 = vpop.f32.mrb[24].mxu0 }
 0x297   : > { %16662 = vpow2.f32 %v14600_v30  ;;  %v17468_v31 = vadd.f32 %v17438_v20, %v2572_v4  ;;  %v15544_v32 = vpop.f32.mrb[25].mxu0  ;;  %v2890_v4 = vld [vmem:[%s19201_s2 + $0x110] sm:$0xff] }
 0x298   : > { %v2891_v32 = vld [vmem:[%s19201_s2 + $0x118] sm:$0xff] }
 0x299   : > { %v14601_v33 = vmul.f32 -1.442695, %v17468_v31 }
 0x29a   : > { %v16659_v34 = vpop.eup %16658 }
 0x29b   : > { %16664 = vpow2.f32 %v14601_v33  ;;  %2812 = vrot.lane.b32.xlu1 %v16659_v34, %s16762_s26  ;;  %v16521_v33 = vpack.c.bf16 %v2891_v32, %v2890_v4  ;;  %v2892_v34 = vld [vmem:[%s19201_s2 + $0x120] sm:$0xff] }
 0x29c   : > { %v17661_v32 = vld [vmem:[%s19201_s2 + $0x160] sm:$0xff] }
 0x29e   : > { %v16661_v3 = vpop.eup %16660 }
 0x29f   : > { %2810 = vrot.lane.b32.xlu0 %v16661_v3, %s16762_s26 }
 0x2a1   : > { %v16663_v28 = vpop.eup %16662 }
 0x2a2   : > { %v2768_v43 = vadd.f32 1.0, %v16663_v28  ;;  %v2645_v40 = vpop.f32.mrb[26].mxu1  ;;  %v2894_v28 = vld [vmem:[%s19201_s2 + $0x130] sm:$0xff] }
 0x2a3   : > { %v17478_v29 = vadd.f32 %v17438_v20, %v2645_v40  ;;  %v15561_v44 = vpop.f32.mrb[27].mxu1 }
 0x2a4   : > { %16666 = vrcp.f32 %v2768_v43 }
 0x2a5   : > { %v16665_v58 = vpop.eup %16664  ;;  %v14602_v45 = vmul.f32 -1.442695, %v17478_v29  ;;  %16668 = vpow2.f32 %v14594_v36 }
 0x2a6   : > { %v2769_v48 = vadd.f32 1.0, %v16665_v58  ;;  %v2718_v49 = vpop.f32.mrb[26].mxu0 }
 0x2a7   : > { %16670 = vpow2.f32 %v14602_v45  ;;  %v17482_v24 = vadd.f32 %v17438_v20, %v2718_v49  ;;  %v15578_v51 = vpop.f32.mrb[27].mxu0  ;;  %v2896_v49 = vld [vmem:[%s19201_s2 + $0x140] sm:$0xff] }
 0x2a8   : > { %16672 = vrcp.f32 %v2769_v48  ;;  %v2897_v51 = vld [vmem:[%s19201_s2 + $0x148] sm:$0xff] }
 0x2a9   : > { %v14603_v55 = vmul.f32 -1.442695, %v17482_v24 }
 0x2aa   : > { %v1690_v9 = vpop.xlane.xlu0 %1689 }
 0x2ab   : > { %16674 = vpow2.f32 %v14603_v55  ;;  %v16530_v55 = vpack.c.bf16 %v2897_v51, %v2896_v49 }
 0x2ae   : > { %v16667_v56 = vpop.eup %16666 }
 0x2af   : > { %2814 = vrot.lane.b32.xlu0 %v16667_v56, %s16762_s26  ;;  %v16669_v59 = vpop.eup %16668 }
 0x2b0   : > { %v2762_v5 = vadd.f32 1.0, %v16669_v59 }
 0x2b1   : > { %v16671_v62 = vpop.eup %16670 }
 0x2b2   : > { %v16673_v0 = vpop.eup %16672  ;;  %v2770_v2 = vadd.f32 1.0, %v16671_v62 }
 0x2b3   : > { %2816 = vrot.lane.b32.xlu1 %v16673_v0, %s16762_s26 }
 0x2b4   : > { %16676 = vrcp.f32 %v2770_v2 }
 0x2b5   : > { %v16675_v7 = vpop.eup %16674  ;;  %16678 = vrcp.f32 %v2762_v5 }
 0x2b6   : > { %v2771_v12 = vadd.f32 1.0, %v16675_v7 }
 0x2b8   : > { %16680 = vrcp.f32 %v2771_v12 }
 0x2b9   : > { %16682 = vtanh.f32 %v17441_v42 }
 0x2ba   : > { %16684 = vtanh.f32 %v17449_v63 }
 0x2bb   : > { %16686 = vtanh.f32 %v17445_v52 }
 0x2bc   : > { %16688 = vtanh.f32 %v17454_v11  ;;  %v2888_v11 = vld [vmem:[%s19201_s2 + $0x100] sm:$0xff] }
 0x2bd   : > { %16690 = vtanh.f32 %v17458_v14  ;;  %v2889_v14 = vld [vmem:[%s19201_s2 + $0x108] sm:$0xff] }
 0x2be   : > { %v16677_v20 = vpop.eup %16676  ;;  %16692 = vtanh.f32 %v17464_v26  ;;  %v16518_v30 = vpack.c.bf16 %v2889_v14, %v2888_v11  ;;  %v2893_v26 = vld [vmem:[%s19201_s2 + $0x128] sm:$0xff] }
 0x2bf   : > { %2818 = vrot.lane.b32.xlu0 %v16677_v20, %s16762_s26  ;;  %v16679_v8 = vpop.eup %16678  ;;  %16694 = vtanh.f32 %v17468_v31  ;;  %v16524_v3 = vpack.c.bf16 %v2893_v26, %v2892_v34  ;;  %v2895_v31 = vld [vmem:[%s19201_s2 + $0x138] sm:$0xff] }
 0x2c0   : > { %16519 = vmatpush3.bf16.msra.mxu0 %v16518_v30  ;;  %v16527_v40 = vpack.c.bf16 %v2895_v31, %v2894_v28  ;;  %16696 = vtanh.f32 %v17478_v29 }
 0x2c1   : > { %16520 = vmatprep.subr.bf16.mxu0 %v16761_v38  ;;  %16698 = vtanh.f32 %v17473_v35 }
 0x2c2   : > { %v16681_v10 = vpop.eup %16680  ;;  %16700 = vrcp.f32 %v1690_v9 }
 0x2c3   : > { %2802 = vrot.lane.b32.xlu0 %v16679_v8, %s16762_s26  ;;  %2820 = vrot.lane.b32.xlu1 %v16681_v10, %s16762_s26  ;;  %v16683_v6 = vpop.eup %16682  ;;  %16702 = vtanh.f32 %v17482_v24 }
 0x2c4   : > { %v16685_v16 = vpop.eup %16684  ;;  %16522 = vmatpush3.bf16.msra.mxu0 %v16521_v33 }
 0x2c5   : > { %v16687_v42 = vpop.eup %16686  ;;  %16523 = vmatprep.subr.bf16.mxu0 %v16761_v38 }
 0x2c6   : > { %v16689_v63 = vpop.eup %16688 }
 0x2c7   : > { %v16691_v23 = vpop.eup %16690 }
 0x2c8   : > { %v16693_v36 = vpop.eup %16692  ;;  %16525 = vmatpush3.bf16.msra.mxu0 %v16524_v3 }
 0x2c9   : > { %16526 = vmatprep.subr.bf16.mxu0 %v16761_v38  ;;  %v16695_v58 = vpop.eup %16694 }
 0x2ca   : > { %v16697_v56 = vpop.eup %16696 }
 0x2cb   : > { %v16699_v0 = vpop.eup %16698 }
 0x2cc   : > { %16528 = vmatpush3.bf16.msra.mxu0 %v16527_v40  ;;  %v16701_v2 = vpop.eup %16700 }
 0x2cd   : > { %16529 = vmatprep.subr.bf16.mxu0 %v16761_v38  ;;  %v16703_v29 = vpop.eup %16702  ;;  %v17571_v20 = vmul.f32 %v16701_v2, %v17431_v37 }
 0x2d0   : > { %16531 = vmatpush3.bf16.msra.mxu0 %v16530_v55 }
 0x2d1   : > { %15642 = vmatprep.subr.mxu0 %v16744_v1 }
 0x2dd   : > { %v2805_v13 = vpop.permute.xlu0 %2804 }
 0x2de   : > { %v17491_v15 = vmul.f32 %v16683_v6, %v2805_v13 }
 0x2e0   : > { %2843 = vrot.lane.b32.xlu1 %v17491_v15, %s16748_s7  ;;  %v17674_v40 = vmul.f32 0.05, %v17491_v15 }
 0x2f9   : > { %v2807_v18 = vpop.permute.xlu1 %2806 }
 0x2fa   : > { %v17497_v19 = vmul.f32 %v16685_v16, %v2807_v18 }
 0x2fc   : > { %2847 = vrot.lane.b32.xlu0 %v17497_v19, %s16749_s8  ;;  %v17686_v55 = vmul.f32 0.05, %v17497_v19 }
 0x2fd   : > { %v2809_v21 = vpop.permute.xlu1 %2808 }
 0x2fe   : > { %v17501_v17 = vmul.f32 %v16687_v42, %v2809_v21 }
 0x300   : > { %2851 = vrot.lane.b32.xlu1 %v17501_v17, %s16751_s10 }
 0x30d   : > { %v2813_v52 = vpop.permute.xlu1 %2812 }
 0x30e   : > { %v17507_v22 = vmul.f32 %v16689_v63, %v2813_v52 }
 0x310   : > { %2859 = vrot.lane.b32.xlu1 %v17507_v22, %s16755_s14 }
 0x311   : > { %v2811_v25 = vpop.permute.xlu0 %2810 }
 0x312   : > { %v17511_v27 = vmul.f32 %v16691_v23, %v2811_v25 }
 0x314   : > { %2855 = vrot.lane.b32.xlu0 %v17511_v27, %s16753_s12 }
 0x321   : > { %v2815_v43 = vpop.permute.xlu0 %2814 }
 0x322   : > { %v17543_v44 = vmul.f32 %v16693_v36, %v2815_v43 }
 0x324   : > { %2863 = vrot.lane.b32.xlu0 %v17543_v44, %s16757_s16 }
 0x325   : > { %v2817_v45 = vpop.permute.xlu1 %2816 }
 0x326   : > { %v17548_v48 = vmul.f32 %v16695_v58, %v2817_v45 }
 0x328   : > { %2867 = vrot.lane.b32.xlu0 %v17548_v48, %s16759_s20  ;;  %s16764_s20 = smov 72  }
 0x331   : > { %v2819_v59 = vpop.permute.xlu0 %2818 }
 0x332   : > { %v17563_v62 = vmul.f32 %v16697_v56, %v2819_v59 }
 0x334   : > { %2871 = vrot.lane.b32.xlu0 %v17563_v62, %s16763_s13 }
 0x335   : > { %v2803_v5 = vpop.permute.xlu0 %2802  ;;  %v2821_v7 = vpop.permute.xlu1 %2820 }
 0x336   : > { %v17566_v12 = vmul.f32 %v16699_v0, %v2803_v5  ;;  %v17568_v35 = vmul.f32 %v16703_v29, %v2821_v7  ;;  %v17698_v29 = vmul.f32 0.05, %v17501_v17 }
 0x338   : > { %15603 = vmatpush3.msk.msra.mxu1 %vm1606_vm3, %v17566_v12  ;;  %2875 = vrot.lane.b32.xlu0 %v17568_v35, %s16764_s20  ;;  %v17668_v26 = vmul.f32 0.05, %v17566_v12 }
 0x339   : > { %1693 = vxpose.xlu1.b32.start.end [1/1] (short) (narrow) %v17571_v20, 8  ;;  %15607 = vmatprep.subr.mxu1 %v16744_v1 }
 0x352   : > { %v2844_v10 = vpop.permute.xlu1 %2843 }
 0x353   : > { %v2878_v13 = vsel %vm1484_vm5, %v17566_v12, %v2844_v10  ;;  %v17710_v10 = vmul.f32 0.05, %v17511_v27 }
 0x36e   : > { %v2848_v24 = vpop.permute.xlu0 %2847 }
 0x36f   : > { %v2879_v37 = vsel %vm1488_vm7, %v2878_v13, %v2848_v24 }
 0x372   : > { %v2852_v6 = vpop.permute.xlu1 %2851 }
 0x373   : > { %v2880_v18 = vsel %vm1492_vm9, %v2879_v37, %v2852_v6 }
 0x382   : > { %v2860_v21 = vpop.permute.xlu1 %2859 }
 0x386   : > { %v2856_v8 = vpop.permute.xlu0 %2855 }
 0x387   : > { %v2881_v42 = vsel %vm1496_vm11, %v2880_v18, %v2856_v8 }
 0x388   : > { %v2882_v52 = vsel %vm1500_vm13, %v2881_v42, %v2860_v21 }
 0x396   : > { %v2864_v9 = vpop.permute.xlu0 %2863 }
 0x397   : > { %v2883_v23 = vsel %vm1504_vm15, %v2882_v52, %v2864_v9  ;;  %v17734_v52 = vmul.f32 0.05, %v17543_v44 }
 0x39a   : > { %v2868_v16 = vpop.permute.xlu0 %2867 }
 0x39b   : > { %v2884_v25 = vsel %vm1508_vm2, %v2883_v23, %v2868_v16  ;;  %v17722_v16 = vmul.f32 0.05, %v17507_v22 }
 0x3a6   : > { %v2872_v63 = vpop.permute.xlu0 %2871 }
 0x3a7   : > { %v2885_v11 = vsel %vm1525_vm8, %v2884_v25, %v2872_v63 }
 0x3aa   : > { %v2876_v14 = vpop.permute.xlu0 %2875 }
 0x3ab   : > { %v2887_v30 = vsel %vm2886_vm12, %v2885_v11, %v2876_v14 }
 0x3ac   : > { %15600 = vmatmul.mubr.msk.f32.vlgmr.msra.gmra.mrb[16].mxu0 %vm2903_vm14, %v2887_v30  ;;  %v17746_v30 = vmul.f32 0.05, %v17548_v48 }
 0x3ad   : > { %15643 = vmatpush3.msk.msra.mxu0 %vm1606_vm3, %v17563_v62  ;;  %15644 = vmatprep.mubr.msk.f32.mxu0 %vm16745_vm1, %v16744_v1 }
 0x3ae   : > { %15652 = vmatprep.subr.mxu0 %v16744_v1 }
 0x3b9   : > { %v17592_v4 = vpop.trf.xlu1 }
 0x3ba   : > { %15605 = vmatmul.mubr.msk.f32.vlgmr.msra.gmra.mrb[28].mxu1 %vm1602_vm4, %v17592_v4  ;;  %15645 = vmatmul.mubr.msk.f32.vlgmr.msra.gmra.mrb[28].mxu0 %vm1602_vm4, %v17592_v4 }
 0x3bb   : > { %15608 = vmatpush3.msk.msra.mxu1 %vm1606_vm3, %v17491_v15  ;;  %15609 = vmatprep.mubr.msk.f32.mxu1 %vm16745_vm1, %v16744_v1 }
 0x3bc   : > { %15612 = vmatprep.subr.mxu1 %v16744_v1  ;;  %15654 = vmatprep.mubr.msk.f32.mxu0 %vm16745_vm1, %v16744_v1 }
 0x3bd   : > { %15653 = vmatpush3.msra.mxu0 %v17661_v32 }
 0x3be   : > { %15610 = vmatmul.mubr.msk.f32.vlgmr.msra.gmra.mrb[30].mxu1 %vm1602_vm4, %v17592_v4  ;;  %15662 = vmatprep.subr.mxu0 %v16744_v1 }
 0x3bf   : > { %15613 = vmatpush3.msk.msra.mxu1 %vm1606_vm3, %v17497_v19  ;;  %15614 = vmatprep.mubr.msk.f32.mxu1 %vm16745_vm1, %v16744_v1 }
 0x3c0   : > { %15617 = vmatprep.subr.mxu1 %v16744_v1 }
 0x3c2   : > { %15615 = vmatmul.mubr.msk.f32.vlgmr.msra.gmra.mrb[32].mxu1 %vm1602_vm4, %v17592_v4 }
 0x3c3   : > { %15618 = vmatpush3.msk.msra.mxu1 %vm1606_vm3, %v17501_v17  ;;  %15619 = vmatprep.mubr.msk.f32.mxu1 %vm16745_vm1, %v16744_v1 }
 0x3c4   : > { %15622 = vmatprep.subr.mxu1 %v16744_v1 }
 0x3c6   : > { %15620 = vmatmul.mubr.msk.f32.vlgmr.msra.gmra.mrb[34].mxu1 %vm1602_vm4, %v17592_v4 }
 0x3c7   : > { %15623 = vmatpush3.msk.msra.mxu1 %vm1606_vm3, %v17511_v27  ;;  %15624 = vmatprep.mubr.msk.f32.mxu1 %vm16745_vm1, %v16744_v1 }
 0x3c8   : > { %15627 = vmatprep.subr.mxu1 %v16744_v1 }
 0x3ca   : > { %15625 = vmatmul.mubr.msk.f32.vlgmr.msra.gmra.mrb[36].mxu1 %vm1602_vm4, %v17592_v4 }
 0x3cb   : > { %15628 = vmatpush3.msk.msra.mxu1 %vm1606_vm3, %v17507_v22  ;;  %15629 = vmatprep.mubr.msk.f32.mxu1 %vm16745_vm1, %v16744_v1 }
 0x3cc   : > { %15632 = vmatprep.subr.mxu1 %v16744_v1 }
 0x3ce   : > { %15630 = vmatmul.mubr.msk.f32.vlgmr.msra.gmra.mrb[38].mxu1 %vm1602_vm4, %v17592_v4 }
 0x3cf   : > { %15633 = vmatpush3.msk.msra.mxu1 %vm1606_vm3, %v17543_v44  ;;  %15634 = vmatprep.mubr.msk.f32.mxu1 %vm16745_vm1, %v16744_v1 }
 0x3d0   : > { %15637 = vmatprep.subr.mxu1 %v16744_v1 }
 0x3d2   : > { %15635 = vmatmul.mubr.msk.f32.vlgmr.msra.gmra.mrb[40].mxu1 %vm1602_vm4, %v17592_v4 }
 0x3d3   : > { %15638 = vmatpush3.msk.msra.mxu1 %vm1606_vm3, %v17548_v48  ;;  %15639 = vmatprep.mubr.msk.f32.mxu1 %vm16745_vm1, %v16744_v1 }
 0x3d4   : > { %15647 = vmatprep.subr.mxu1 %v16744_v1 }
 0x3d6   : > { %15640 = vmatmul.mubr.msk.f32.vlgmr.msra.gmra.mrb[42].mxu1 %vm1602_vm4, %v17592_v4 }
 0x3d7   : > { %15648 = vmatpush3.msk.msra.mxu1 %vm1606_vm3, %v17568_v35  ;;  %15649 = vmatprep.mubr.msk.f32.mxu1 %vm16745_vm1, %v16744_v1 }
 0x3d8   : > { %15657 = vmatprep.subr.mxu1 %v16744_v1 }
 0x3da   : > { %15650 = vmatmul.mubr.msk.f32.vlgmr.msra.gmra.mrb[44].mxu1 %vm1602_vm4, %v17592_v4 }
 0x3db   : > { %15659 = vmatprep.mubr.msk.f32.mxu1 %vm16745_vm1, %v16744_v1  ;;  %15658 = vmatpush3.msra.mxu1 %v17661_v32 }
 0x3dc   : > { %15667 = vmatprep.subr.mxu1 %v16744_v1 }
 0x48d   : > { %v3063_v33 = vpop.f32.mrb[28].mxu1  ;;  %v3639_v34 = vpop.f32.mrb[28].mxu0 }
 0x48e   : > { %v3715_v3 = vmul.f32 0.95, %v3063_v33  ;;  %v15606_v28 = vpop.f32.mrb[29].mxu1  ;;  %v15646_v31 = vpop.f32.mrb[29].mxu0  ;;  %v3723_v11 = vmul.f32 0.95, %v3639_v34 }
 0x490   : > { %v17671_v36 = vadd.f32 %v3715_v3, %v17668_v26  ;;  %v17749_v3 = vmul.f32 0.05, %v17563_v62 }
 0x491   : > { %v3135_v43 = vpop.f32.mrb[30].mxu1 }
 0x492   : > { %v3716_v58 = vmul.f32 0.95, %v3135_v43  ;;  %v15611_v45 = vpop.f32.mrb[31].mxu1  ;;  %15655 = vmatmul.mubr.msk.f32.vlgmr.msra.gmra.mrb[30].mxu0 %vm1484_vm5, %v17671_v36  ;;  %v17757_v34 = vadd.f32 %v3723_v11, %v17749_v3 }
 0x493   : > { %15663 = vmatpush3.msra.mxu0 %v17661_v32  ;;  %15664 = vmatprep.mubr.msk.f32.mxu0 %vm16745_vm1, %v16744_v1 }
 0x494   : > { %v17682_v49 = vadd.f32 %v3716_v58, %v17674_v40  ;;  %15672 = vmatprep.subr.mxu0 %v16744_v1  ;;  %v2978_v58 = vld [vmem:[%s19201_s2 + $0x158] sm:$0xff] }
 0x495   : > { %v3207_v51 = vpop.f32.mrb[32].mxu1 }
 0x496   : > { %v3717_v56 = vmul.f32 0.95, %v3207_v51  ;;  %v15616_v59 = vpop.f32.mrb[33].mxu1  ;;  %15660 = vmatmul.mubr.msk.f32.vlgmr.msra.gmra.mrb[46].mxu1 %vm1484_vm5, %v17682_v49  ;;  %v17767_v51 = vmul.f32 0.05, %v17568_v35 }
 0x497   : > { %15668 = vmatpush3.msra.mxu1 %v17661_v32  ;;  %15669 = vmatprep.mubr.msk.f32.mxu1 %vm16745_vm1, %v16744_v1 }
 0x498   : > { %v17694_v0 = vadd.f32 %v3717_v56, %v17686_v55  ;;  %15677 = vmatprep.subr.mxu1 %v16744_v1 }
 0x499   : > { %v3279_v2 = vpop.f32.mrb[34].mxu1 }
 0x49a   : > { %v3718_v5 = vmul.f32 0.95, %v3279_v2  ;;  %v15621_v7 = vpop.f32.mrb[35].mxu1  ;;  %15665 = vmatmul.mubr.msk.f32.vlgmr.msra.gmra.mrb[32].mxu0 %vm1484_vm5, %v17694_v0 }
 0x49b   : > { %15673 = vmatpush3.msra.mxu0 %v17661_v32  ;;  %15674 = vmatprep.mubr.msk.f32.mxu0 %vm16745_vm1, %v16744_v1 }
 0x49c   : > { %v17706_v24 = vadd.f32 %v3718_v5, %v17698_v29  ;;  %15682 = vmatprep.subr.mxu0 %v16744_v1 }
 0x49d   : > { %v3351_v8 = vpop.f32.mrb[36].mxu1 }
 0x49e   : > { %v3719_v9 = vmul.f32 0.95, %v3351_v8  ;;  %v15626_v6 = vpop.f32.mrb[37].mxu1  ;;  %15670 = vmatmul.mubr.msk.f32.vlgmr.msra.gmra.mrb[48].mxu1 %vm1484_vm5, %v17706_v24 }
 0x49f   : > { %15678 = vmatpush3.msra.mxu1 %v17661_v32  ;;  %15679 = vmatprep.mubr.msk.f32.mxu1 %vm16745_vm1, %v16744_v1 }
 0x4a0   : > { %v17718_v13 = vadd.f32 %v3719_v9, %v17710_v10  ;;  %15687 = vmatprep.subr.mxu1 %v16744_v1 }
 0x4a1   : > { %v3423_v37 = vpop.f32.mrb[38].mxu1 }
 0x4a2   : > { %v3720_v18 = vmul.f32 0.95, %v3423_v37  ;;  %v15631_v42 = vpop.f32.mrb[39].mxu1  ;;  %15675 = vmatmul.mubr.msk.f32.vlgmr.msra.gmra.mrb[34].mxu0 %vm1484_vm5, %v17718_v13 }
 0x4a3   : > { %15683 = vmatpush3.msra.mxu0 %v17661_v32  ;;  %15684 = vmatprep.mubr.msk.f32.mxu0 %vm16745_vm1, %v16744_v1 }
 0x4a4   : > { %v17730_v21 = vadd.f32 %v3720_v18, %v17722_v16  ;;  %15692 = vmatprep.subr.mxu0 %v16744_v1 }
 0x4a5   : > { %v3495_v63 = vpop.f32.mrb[40].mxu1 }
 0x4a6   : > { %v3721_v23 = vmul.f32 0.95, %v3495_v63  ;;  %v15636_v25 = vpop.f32.mrb[41].mxu1  ;;  %15680 = vmatmul.mubr.msk.f32.vlgmr.msra.gmra.mrb[50].mxu1 %vm1484_vm5, %v17730_v21 }
 0x4a7   : > { %15688 = vmatpush3.msra.mxu1 %v17661_v32  ;;  %15689 = vmatprep.mubr.msk.f32.mxu1 %vm16745_vm1, %v16744_v1 }
 0x4a8   : > { %v17742_v14 = vadd.f32 %v3721_v23, %v17734_v52  ;;  %15697 = vmatprep.subr.mxu1 %v16744_v1 }
 0x4a9   : > { %v3567_v33 = vpop.f32.mrb[42].mxu1 }
 0x4aa   : > { %v3722_v28 = vmul.f32 0.95, %v3567_v33  ;;  %v15641_v31 = vpop.f32.mrb[43].mxu1  ;;  %15685 = vmatmul.mubr.msk.f32.vlgmr.msra.gmra.mrb[36].mxu0 %vm1484_vm5, %v17742_v14 }
 0x4ab   : > { %15693 = vmatpush3.msra.mxu0 %v17661_v32  ;;  %15694 = vmatprep.mubr.msk.f32.mxu0 %vm16745_vm1, %v16744_v1 }
 0x4ac   : > { %v17760_v43 = vadd.f32 %v3722_v28, %v17746_v30  ;;  %15702 = vmatprep.subr.mxu0 %v16744_v1 }
 0x4ad   : > { %v3711_v45 = vpop.f32.mrb[44].mxu1 }
 0x4ae   : > { %v3724_v56 = vmul.f32 0.95, %v3711_v45  ;;  %v15651_v59 = vpop.f32.mrb[45].mxu1  ;;  %15690 = vmatmul.mubr.msk.f32.vlgmr.msra.gmra.mrb[52].mxu1 %vm1484_vm5, %v17760_v43  ;;  %15695 = vmatmul.mubr.msk.f32.vlgmr.msra.gmra.mrb[38].mxu0 %vm1484_vm5, %v17757_v34 }
 0x4af   : > { %15698 = vmatpush3.msra.mxu1 %v17661_v32  ;;  %15703 = vmatpush3.msra.mxu0 %v2978_v58  ;;  %v17909_v32 = vld [vmem:[%s19201_s2 + $0x168] sm:$0xff] }
 0x4b0   : > { %v17775_v2 = vadd.f32 %v3724_v56, %v17767_v51  ;;  %15699 = vmatprep.mubr.msk.f32.mxu1 %vm16745_vm1, %v16744_v1  ;;  %15704 = vmatprep.mubr.msk.f32.mxu0 %vm16745_vm1, %v16744_v1 }
 0x4b1   : > { %15707 = vmatprep.subr.mxu1 %v16744_v1  ;;  %15712 = vmatprep.subr.mxu0 %v16744_v1 }
 0x4b2   : > { %15700 = vmatmul.mubr.msk.f32.vlgmr.msra.gmra.mrb[54].mxu1 %vm1484_vm5, %v17775_v2  ;;  %15705 = vmatmul.mubr.msk.f32.vlgmr.msra.gmra.mrb[40].mxu0 %vm1484_vm5, %v17566_v12 }
 0x4b3   : > { %15708 = vmatpush3.msra.mxu1 %v2978_v58  ;;  %15713 = vmatpush3.msra.mxu0 %v2978_v58 }
 0x4b4   : > { %15709 = vmatprep.mubr.msk.f32.mxu1 %vm16745_vm1, %v16744_v1  ;;  %15714 = vmatprep.mubr.msk.f32.mxu0 %vm16745_vm1, %v16744_v1 }
 0x4b5   : > { %15717 = vmatprep.subr.mxu1 %v16744_v1  ;;  %15722 = vmatprep.subr.mxu0 %v16744_v1 }
 0x4b6   : > { %15710 = vmatmul.mubr.msk.f32.vlgmr.msra.gmra.mrb[56].mxu1 %vm1484_vm5, %v17491_v15  ;;  %15715 = vmatmul.mubr.msk.f32.vlgmr.msra.gmra.mrb[42].mxu0 %vm1484_vm5, %v17497_v19 }
 0x4b7   : > { %15718 = vmatpush3.msra.mxu1 %v2978_v58  ;;  %15723 = vmatpush3.msra.mxu0 %v2978_v58 }
 0x4b8   : > { %15719 = vmatprep.mubr.msk.f32.mxu1 %vm16745_vm1, %v16744_v1  ;;  %15724 = vmatprep.mubr.msk.f32.mxu0 %vm16745_vm1, %v16744_v1 }
 0x4b9   : > { %15727 = vmatprep.subr.mxu1 %v16744_v1  ;;  %15732 = vmatprep.subr.mxu0 %v16744_v1 }
 0x4ba   : > { %15720 = vmatmul.mubr.msk.f32.vlgmr.msra.gmra.mrb[58].mxu1 %vm1484_vm5, %v17501_v17  ;;  %15725 = vmatmul.mubr.msk.f32.vlgmr.msra.gmra.mrb[44].mxu0 %vm1484_vm5, %v17511_v27 }
 0x4bb   : > { %15728 = vmatpush3.msra.mxu1 %v2978_v58  ;;  %15733 = vmatpush3.msra.mxu0 %v2978_v58 }
 0x4bc   : > { %15729 = vmatprep.mubr.msk.f32.mxu1 %vm16745_vm1, %v16744_v1  ;;  %15734 = vmatprep.mubr.msk.f32.mxu0 %vm16745_vm1, %v16744_v1 }
 0x4bd   : > { %15737 = vmatprep.subr.mxu1 %v16744_v1  ;;  %15742 = vmatprep.subr.mxu0 %v16744_v1 }
 0x4be   : > { %15730 = vmatmul.mubr.msk.f32.vlgmr.msra.gmra.mrb[60].mxu1 %vm1484_vm5, %v17507_v22  ;;  %15735 = vmatmul.mubr.msk.f32.vlgmr.msra.gmra.mrb[46].mxu0 %vm1484_vm5, %v17543_v44 }
 0x4bf   : > { %15738 = vmatpush3.msra.mxu1 %v2978_v58  ;;  %15743 = vmatpush3.msra.mxu0 %v2978_v58 }
 0x4c0   : > { %15739 = vmatprep.mubr.msk.f32.mxu1 %vm16745_vm1, %v16744_v1  ;;  %15744 = vmatprep.mubr.msk.f32.mxu0 %vm16745_vm1, %v16744_v1 }
 0x4c1   : > { %15747 = vmatprep.subr.mxu1 %v16744_v1  ;;  %15752 = vmatprep.subr.mxu0 %v16744_v1 }
 0x4c2   : > { %15740 = vmatmul.mubr.msk.f32.vlgmr.msra.gmra.mrb[62].mxu1 %vm1484_vm5, %v17548_v48  ;;  %15745 = vmatmul.mubr.msk.f32.vlgmr.msra.gmra.mrb[48].mxu0 %vm1484_vm5, %v17563_v62 }
 0x4c3   : > { %15748 = vmatpush3.msra.mxu1 %v2978_v58  ;;  %15753 = vmatpush3.msk.msra.mxu0 %vm1606_vm3, %v17671_v36 }
 0x4c4   : > { %15749 = vmatprep.mubr.msk.f32.mxu1 %vm16745_vm1, %v16744_v1  ;;  %15754 = vmatprep.mubr.msk.f32.mxu0 %vm16745_vm1, %v16744_v1 }
 0x4c5   : > { %15757 = vmatprep.subr.mxu1 %v16744_v1  ;;  %15762 = vmatprep.subr.mxu0 %v16744_v1 }
 0x4c6   : > { %15750 = vmatmul.mubr.msk.f32.vlgmr.msra.gmra.mrb[64].mxu1 %vm1484_vm5, %v17568_v35  ;;  %15755 = vmatmul.mubr.msk.f32.vlgmr.msra.gmra.mrb[50].mxu0 %vm1602_vm4, %v17592_v4 }
 0x4c7   : > { %15758 = vmatpush3.msk.msra.mxu1 %vm1606_vm3, %v17682_v49  ;;  %15763 = vmatpush3.msk.msra.mxu0 %vm1606_vm3, %v17694_v0 }
 0x4c8   : > { %15759 = vmatprep.mubr.msk.f32.mxu1 %vm16745_vm1, %v16744_v1  ;;  %15764 = vmatprep.mubr.msk.f32.mxu0 %vm16745_vm1, %v16744_v1 }
 0x4c9   : > { %15767 = vmatprep.subr.mxu1 %v16744_v1  ;;  %15772 = vmatprep.subr.mxu0 %v16744_v1 }
 0x4ca   : > { %15760 = vmatmul.mubr.msk.f32.vlgmr.msra.gmra.mrb[66].mxu1 %vm1602_vm4, %v17592_v4  ;;  %15765 = vmatmul.mubr.msk.f32.vlgmr.msra.gmra.mrb[52].mxu0 %vm1602_vm4, %v17592_v4 }
 0x4cb   : > { %15768 = vmatpush3.msk.msra.mxu1 %vm1606_vm3, %v17706_v24  ;;  %15773 = vmatpush3.msk.msra.mxu0 %vm1606_vm3, %v17718_v13 }
 0x4cc   : > { %15769 = vmatprep.mubr.msk.f32.mxu1 %vm16745_vm1, %v16744_v1  ;;  %15774 = vmatprep.mubr.msk.f32.mxu0 %vm16745_vm1, %v16744_v1 }
 0x4cd   : > { %15777 = vmatprep.subr.mxu1 %v16744_v1  ;;  %15782 = vmatprep.subr.mxu0 %v16744_v1 }
 0x4ce   : > { %15770 = vmatmul.mubr.msk.f32.vlgmr.msra.gmra.mrb[68].mxu1 %vm1602_vm4, %v17592_v4  ;;  %15775 = vmatmul.mubr.msk.f32.vlgmr.msra.gmra.mrb[54].mxu0 %vm1602_vm4, %v17592_v4 }
 0x4cf   : > { %15778 = vmatpush3.msk.msra.mxu1 %vm1606_vm3, %v17730_v21  ;;  %15783 = vmatpush3.msk.msra.mxu0 %vm1606_vm3, %v17742_v14 }
 0x4d0   : > { %15779 = vmatprep.mubr.msk.f32.mxu1 %vm16745_vm1, %v16744_v1  ;;  %15784 = vmatprep.mubr.msk.f32.mxu0 %vm16745_vm1, %v16744_v1 }
 0x4d1   : > { %15787 = vmatprep.subr.mxu1 %v16744_v1  ;;  %15792 = vmatprep.subr.mxu0 %v16744_v1 }
 0x4d2   : > { %15780 = vmatmul.mubr.msk.f32.vlgmr.msra.gmra.mrb[70].mxu1 %vm1602_vm4, %v17592_v4  ;;  %15785 = vmatmul.mubr.msk.f32.vlgmr.msra.gmra.mrb[56].mxu0 %vm1602_vm4, %v17592_v4 }
 0x4d3   : > { %15788 = vmatpush3.msk.msra.mxu1 %vm1606_vm3, %v17760_v43  ;;  %15793 = vmatpush3.msk.msra.mxu0 %vm1606_vm3, %v17757_v34 }
 0x4d4   : > { %15789 = vmatprep.mubr.msk.f32.mxu1 %vm16745_vm1, %v16744_v1  ;;  %15794 = vmatprep.mubr.msk.f32.mxu0 %vm16745_vm1, %v16744_v1 }
 0x4d5   : > { %15797 = vmatprep.subr.mxu1 %v16744_v1  ;;  %15802 = vmatprep.subr.mxu0 %v16744_v1 }
 0x4d6   : > { %15790 = vmatmul.mubr.msk.f32.vlgmr.msra.gmra.mrb[72].mxu1 %vm1602_vm4, %v17592_v4  ;;  %15795 = vmatmul.mubr.msk.f32.vlgmr.msra.gmra.mrb[58].mxu0 %vm1602_vm4, %v17592_v4 }
 0x4d7   : > { %15798 = vmatpush3.msk.msra.mxu1 %vm1606_vm3, %v17775_v2  ;;  %15799 = vmatprep.mubr.msk.f32.mxu1 %vm16745_vm1, %v16744_v1 }
 0x4d8   : > { %15804 = vmatprep.mubr.msk.f32.mxu0 %vm16745_vm1, %v16744_v1  ;;  %15807 = vmatprep.subr.mxu1 %v16744_v1 }
 0x4d9   : > { %15803 = vmatpush3.msra.mxu0 %v17909_v32 }
 0x4da   : > { %15800 = vmatmul.mubr.msk.f32.vlgmr.msra.gmra.mrb[74].mxu1 %vm1602_vm4, %v17592_v4  ;;  %15812 = vmatprep.subr.mxu0 %v16744_v1 }
 0x4db   : > { %15809 = vmatprep.mubr.msk.f32.mxu1 %vm16745_vm1, %v16744_v1  ;;  %15808 = vmatpush3.msra.mxu1 %v17909_v32 }
 0x4dc   : > { %15817 = vmatprep.subr.mxu1 %v16744_v1 }
 0x565   : > { %v3804_v36 = vpop.f32.mrb[30].mxu0 }
 0x566   : > { %v15656_v49 = vpop.f32.mrb[31].mxu0 }
 0x569   : > { %v3877_v0 = vpop.f32.mrb[46].mxu1 }
 0x56a   : > { %v15661_v4 = vpop.f32.mrb[47].mxu1 }
 0x56d   : > { %v3950_v5 = vpop.f32.mrb[32].mxu0 }
 0x56e   : > { %v15666_v7 = vpop.f32.mrb[33].mxu0 }
 0x571   : > { %v4023_v24 = vpop.f32.mrb[48].mxu1 }
 0x572   : > { %v15671_v8 = vpop.f32.mrb[49].mxu1 }
 0x575   : > { %v4096_v9 = vpop.f32.mrb[34].mxu0 }
 0x576   : > { %v15676_v6 = vpop.f32.mrb[35].mxu0 }
 0x579   : > { %v4169_v13 = vpop.f32.mrb[50].mxu1 }
 0x57a   : > { %v15681_v37 = vpop.f32.mrb[51].mxu1 }
 0x57d   : > { %v4242_v18 = vpop.f32.mrb[36].mxu0 }
 0x57e   : > { %v15686_v42 = vpop.f32.mrb[37].mxu0 }
 0x581   : > { %v4315_v21 = vpop.f32.mrb[52].mxu1  ;;  %v4388_v63 = vpop.f32.mrb[38].mxu0 }
 0x582   : > { %v15691_v23 = vpop.f32.mrb[53].mxu1  ;;  %v15696_v25 = vpop.f32.mrb[39].mxu0 }
 0x585   : > { %v4461_v11 = vpop.f32.mrb[54].mxu1  ;;  %v4533_v14 = vpop.f32.mrb[40].mxu0 }
 0x586   : > { %v17915_v33 = vadd.f32 %v4533_v14, %v3804_v36  ;;  %v15701_v28 = vpop.f32.mrb[55].mxu1  ;;  %v15706_v31 = vpop.f32.mrb[41].mxu0 }
 0x589   : > { %v4605_v34 = vpop.f32.mrb[56].mxu1  ;;  %v4677_v43 = vpop.f32.mrb[42].mxu0 }
 0x58a   : > { %v17917_v58 = vadd.f32 %v4605_v34, %v3877_v0  ;;  %v17919_v45 = vadd.f32 %v4677_v43, %v3950_v5  ;;  %v15711_v56 = vpop.f32.mrb[57].mxu1  ;;  %v15716_v59 = vpop.f32.mrb[43].mxu0 }
 0x58d   : > { %v4749_v2 = vpop.f32.mrb[58].mxu1  ;;  %v4821_v49 = vpop.f32.mrb[44].mxu0 }
 0x58e   : > { %v17921_v4 = vadd.f32 %v4749_v2, %v4023_v24  ;;  %v17923_v7 = vadd.f32 %v4821_v49, %v4096_v9  ;;  %v15721_v8 = vpop.f32.mrb[59].mxu1  ;;  %v15726_v6 = vpop.f32.mrb[45].mxu0 }
 0x591   : > { %v4893_v36 = vpop.f32.mrb[60].mxu1  ;;  %v4965_v37 = vpop.f32.mrb[46].mxu0 }
 0x592   : > { %v17925_v42 = vadd.f32 %v4893_v36, %v4169_v13  ;;  %v17927_v23 = vadd.f32 %v4965_v37, %v4242_v18  ;;  %v15731_v0 = vpop.f32.mrb[61].mxu1  ;;  %v15736_v25 = vpop.f32.mrb[47].mxu0 }
 0x595   : > { %v5037_v5 = vpop.f32.mrb[62].mxu1  ;;  %v5109_v14 = vpop.f32.mrb[48].mxu0 }
 0x596   : > { %v17929_v28 = vadd.f32 %v5037_v5, %v4315_v21  ;;  %v17931_v31 = vadd.f32 %v5109_v14, %v4388_v63  ;;  %v15741_v24 = vpop.f32.mrb[63].mxu1  ;;  %v15746_v34 = vpop.f32.mrb[49].mxu0 }
 0x599   : > { %v5181_v9 = vpop.f32.mrb[64].mxu1  ;;  %v5253_v43 = vpop.f32.mrb[50].mxu0 }
 0x59a   : > { %v17933_v56 = vadd.f32 %v5181_v9, %v4461_v11  ;;  %v5905_v59 = vmul.f32 0.95, %v5253_v43  ;;  %v15751_v2 = vpop.f32.mrb[65].mxu1  ;;  %v15756_v13 = vpop.f32.mrb[51].mxu0 }
 0x59c   : > { %v5915_v18 = vadd.f32 %v5905_v59, %v17668_v26 }
 0x59d   : > { %v5325_v49 = vpop.f32.mrb[66].mxu1  ;;  %v5397_v8 = vpop.f32.mrb[52].mxu0 }
 0x59e   : > { %v5906_v6 = vmul.f32 0.95, %v5325_v49  ;;  %v5907_v36 = vmul.f32 0.95, %v5397_v8  ;;  %v15761_v37 = vpop.f32.mrb[67].mxu1  ;;  %v15766_v21 = vpop.f32.mrb[53].mxu0  ;;  %15805 = vmatmul.mubr.msk.f32.vlgmr.msra.gmra.mrb[60].mxu0 %vm1484_vm5, %v5915_v18 }
 0x59f   : > { %15813 = vmatpush3.msra.mxu0 %v17909_v32  ;;  %15814 = vmatprep.mubr.msk.f32.mxu0 %vm16745_vm1, %v16744_v1 }
 0x5a0   : > { %v5916_v63 = vadd.f32 %v5906_v6, %v17674_v40  ;;  %v5917_v11 = vadd.f32 %v5907_v36, %v17686_v55  ;;  %15822 = vmatprep.subr.mxu0 %v16744_v1 }
 0x5a1   : > { %v5469_v0 = vpop.f32.mrb[68].mxu1  ;;  %v5541_v25 = vpop.f32.mrb[54].mxu0 }
 0x5a2   : > { %v5908_v5 = vmul.f32 0.95, %v5469_v0  ;;  %v5909_v14 = vmul.f32 0.95, %v5541_v25  ;;  %v15771_v24 = vpop.f32.mrb[69].mxu1  ;;  %v15776_v34 = vpop.f32.mrb[55].mxu0  ;;  %15810 = vmatmul.mubr.msk.f32.vlgmr.msra.gmra.mrb[76].mxu1 %vm1484_vm5, %v5916_v63  ;;  %15815 = vmatmul.mubr.msk.f32.vlgmr.msra.gmra.mrb[62].mxu0 %vm1484_vm5, %v5917_v11 }
 0x5a3   : > { %15818 = vmatpush3.msra.mxu1 %v17909_v32  ;;  %15823 = vmatpush3.msra.mxu0 %v17909_v32 }
 0x5a4   : > { %v5918_v9 = vadd.f32 %v5908_v5, %v17698_v29  ;;  %v5919_v43 = vadd.f32 %v5909_v14, %v17710_v10  ;;  %15819 = vmatprep.mubr.msk.f32.mxu1 %vm16745_vm1, %v16744_v1  ;;  %15824 = vmatprep.mubr.msk.f32.mxu0 %vm16745_vm1, %v16744_v1 }
 0x5a5   : > { %v5613_v59 = vpop.f32.mrb[70].mxu1  ;;  %v5685_v2 = vpop.f32.mrb[56].mxu0  ;;  %15827 = vmatprep.subr.mxu1 %v16744_v1  ;;  %15832 = vmatprep.subr.mxu0 %v16744_v1 }
 0x5a6   : > { %v5910_v13 = vmul.f32 0.95, %v5613_v59  ;;  %v5911_v18 = vmul.f32 0.95, %v5685_v2  ;;  %v15781_v49 = vpop.f32.mrb[71].mxu1  ;;  %v15786_v8 = vpop.f32.mrb[57].mxu0  ;;  %15820 = vmatmul.mubr.msk.f32.vlgmr.msra.gmra.mrb[78].mxu1 %vm1484_vm5, %v5918_v9  ;;  %15825 = vmatmul.mubr.msk.f32.vlgmr.msra.gmra.mrb[64].mxu0 %vm1484_vm5, %v5919_v43 }
 0x5a7   : > { %15828 = vmatpush3.msra.mxu1 %v17909_v32  ;;  %15833 = vmatpush3.msra.mxu0 %v17909_v32 }
 0x5a8   : > { %v5920_v6 = vadd.f32 %v5910_v13, %v17722_v16  ;;  %v5921_v36 = vadd.f32 %v5911_v18, %v17734_v52  ;;  %15829 = vmatprep.mubr.msk.f32.mxu1 %vm16745_vm1, %v16744_v1  ;;  %15834 = vmatprep.mubr.msk.f32.mxu0 %vm16745_vm1, %v16744_v1 }
 0x5a9   : > { %v5757_v37 = vpop.f32.mrb[72].mxu1  ;;  %v5829_v21 = vpop.f32.mrb[58].mxu0  ;;  %15837 = vmatprep.subr.mxu1 %v16744_v1  ;;  %15842 = vmatprep.subr.mxu0 %v16744_v1 }
 0x5aa   : > { %v5912_v63 = vmul.f32 0.95, %v5757_v37  ;;  %v5913_v11 = vmul.f32 0.95, %v5829_v21  ;;  %v15791_v0 = vpop.f32.mrb[73].mxu1  ;;  %v15796_v25 = vpop.f32.mrb[59].mxu0  ;;  %15830 = vmatmul.mubr.msk.f32.vlgmr.msra.gmra.mrb[80].mxu1 %vm1484_vm5, %v5920_v6  ;;  %15835 = vmatmul.mubr.msk.f32.vlgmr.msra.gmra.mrb[66].mxu0 %vm1484_vm5, %v5921_v36 }
 0x5ab   : > { %15838 = vmatpush3.msra.mxu1 %v17909_v32  ;;  %15843 = vmatpush3.msra.mxu0 %v17909_v32 }
 0x5ac   : > { %v5922_v5 = vadd.f32 %v5912_v63, %v17746_v30  ;;  %v5923_v14 = vadd.f32 %v5913_v11, %v17749_v3  ;;  %15839 = vmatprep.mubr.msk.f32.mxu1 %vm16745_vm1, %v16744_v1  ;;  %15844 = vmatprep.mubr.msk.f32.mxu0 %vm16745_vm1, %v16744_v1 }
 0x5ad   : > { %v5901_v24 = vpop.f32.mrb[74].mxu1  ;;  %15847 = vmatprep.subr.mxu1 %v16744_v1  ;;  %15852 = vmatprep.subr.mxu0 %v16744_v1 }
 0x5ae   : > { %v5914_v34 = vmul.f32 0.95, %v5901_v24  ;;  %v15801_v9 = vpop.f32.mrb[75].mxu1  ;;  %15840 = vmatmul.mubr.msk.f32.vlgmr.msra.gmra.mrb[82].mxu1 %vm1484_vm5, %v5922_v5  ;;  %15845 = vmatmul.mubr.msk.f32.vlgmr.msra.gmra.mrb[68].mxu0 %vm1484_vm5, %v5923_v14 }
 0x5af   : > { %15848 = vmatpush3.msra.mxu1 %v17909_v32  ;;  %15853 = vmatpush3.msk.msra.mxu0 %vm1606_vm3, %v17566_v12  ;;  %v18064_v32 = vld [vmem:[%s19201_s2 + $0x180] sm:$0xff] }
 0x5b0   : > { %v5924_v43 = vadd.f32 %v5914_v34, %v17767_v51  ;;  %15849 = vmatprep.mubr.msk.f32.mxu1 %vm16745_vm1, %v16744_v1  ;;  %15854 = vmatprep.mubr.msk.f32.mxu0 %vm16745_vm1, %v16744_v1 }
 0x5b1   : > { %15857 = vmatprep.subr.mxu1 %v16744_v1  ;;  %15862 = vmatprep.subr.mxu0 %v16744_v1 }
 0x5b2   : > { %15850 = vmatmul.mubr.msk.f32.vlgmr.msra.gmra.mrb[84].mxu1 %vm1484_vm5, %v5924_v43  ;;  %15855 = vmatmul.mubr.msk.f32.vlgmr.msra.gmra.mrb[70].mxu0 %vm1602_vm4, %v17571_v20 }
 0x5b3   : > { %15858 = vmatpush3.msk.msra.mxu1 %vm1606_vm3, %v17491_v15  ;;  %15863 = vmatpush3.msk.msra.mxu0 %vm1606_vm3, %v17497_v19 }
 0x5b4   : > { %15859 = vmatprep.mubr.msk.f32.mxu1 %vm16745_vm1, %v16744_v1  ;;  %15864 = vmatprep.mubr.msk.f32.mxu0 %vm16745_vm1, %v16744_v1 }
 0x5b5   : > { %15867 = vmatprep.subr.mxu1 %v16744_v1  ;;  %15872 = vmatprep.subr.mxu0 %v16744_v1 }
 0x5b6   : > { %15860 = vmatmul.mubr.msk.f32.vlgmr.msra.gmra.mrb[86].mxu1 %vm1602_vm4, %v17571_v20  ;;  %15865 = vmatmul.mubr.msk.f32.vlgmr.msra.gmra.mrb[72].mxu0 %vm1602_vm4, %v17571_v20 }
 0x5b7   : > { %15868 = vmatpush3.msk.msra.mxu1 %vm1606_vm3, %v17501_v17  ;;  %15873 = vmatpush3.msk.msra.mxu0 %vm1606_vm3, %v17511_v27 }
 0x5b8   : > { %15869 = vmatprep.mubr.msk.f32.mxu1 %vm16745_vm1, %v16744_v1  ;;  %15874 = vmatprep.mubr.msk.f32.mxu0 %vm16745_vm1, %v16744_v1 }
 0x5b9   : > { %15877 = vmatprep.subr.mxu1 %v16744_v1  ;;  %15882 = vmatprep.subr.mxu0 %v16744_v1 }
 0x5ba   : > { %15870 = vmatmul.mubr.msk.f32.vlgmr.msra.gmra.mrb[88].mxu1 %vm1602_vm4, %v17571_v20  ;;  %15875 = vmatmul.mubr.msk.f32.vlgmr.msra.gmra.mrb[74].mxu0 %vm1602_vm4, %v17571_v20 }
 0x5bb   : > { %15878 = vmatpush3.msk.msra.mxu1 %vm1606_vm3, %v17507_v22  ;;  %15883 = vmatpush3.msk.msra.mxu0 %vm1606_vm3, %v17543_v44 }
 0x5bc   : > { %15879 = vmatprep.mubr.msk.f32.mxu1 %vm16745_vm1, %v16744_v1  ;;  %15884 = vmatprep.mubr.msk.f32.mxu0 %vm16745_vm1, %v16744_v1 }
 0x5bd   : > { %15887 = vmatprep.subr.mxu1 %v16744_v1  ;;  %15892 = vmatprep.subr.mxu0 %v16744_v1 }
 0x5be   : > { %15880 = vmatmul.mubr.msk.f32.vlgmr.msra.gmra.mrb[90].mxu1 %vm1602_vm4, %v17571_v20  ;;  %15885 = vmatmul.mubr.msk.f32.vlgmr.msra.gmra.mrb[76].mxu0 %vm1602_vm4, %v17571_v20 }
 0x5bf   : > { %15888 = vmatpush3.msk.msra.mxu1 %vm1606_vm3, %v17548_v48  ;;  %15893 = vmatpush3.msk.msra.mxu0 %vm1606_vm3, %v17563_v62 }
 0x5c0   : > { %15889 = vmatprep.mubr.msk.f32.mxu1 %vm16745_vm1, %v16744_v1  ;;  %15894 = vmatprep.mubr.msk.f32.mxu0 %vm16745_vm1, %v16744_v1 }
 0x5c1   : > { %15897 = vmatprep.subr.mxu1 %v16744_v1  ;;  %15902 = vmatprep.subr.mxu0 %v16744_v1 }
 0x5c2   : > { %15890 = vmatmul.mubr.msk.f32.vlgmr.msra.gmra.mrb[92].mxu1 %vm1602_vm4, %v17571_v20  ;;  %15895 = vmatmul.mubr.msk.f32.vlgmr.msra.gmra.mrb[78].mxu0 %vm1602_vm4, %v17571_v20 }
 0x5c3   : > { %15898 = vmatpush3.msk.msra.mxu1 %vm1606_vm3, %v17568_v35  ;;  %15899 = vmatprep.mubr.msk.f32.mxu1 %vm16745_vm1, %v16744_v1 }
 0x5c4   : > { %15904 = vmatprep.mubr.msk.f32.mxu0 %vm16745_vm1, %v16744_v1  ;;  %15907 = vmatprep.subr.mxu1 %v16744_v1 }
 0x5c5   : > { %15903 = vmatpush3.msra.mxu0 %v18064_v32 }
 0x5c6   : > { %15900 = vmatmul.mubr.msk.f32.vlgmr.msra.gmra.mrb[94].mxu1 %vm1602_vm4, %v17571_v20  ;;  %15912 = vmatprep.subr.mxu0 %v16744_v1 }
 0x5c7   : > { %15909 = vmatprep.mubr.msk.f32.mxu1 %vm16745_vm1, %v16744_v1  ;;  %15908 = vmatpush3.msra.mxu1 %v18064_v32 }
 0x5c8   : > { %15917 = vmatprep.subr.mxu1 %v16744_v1 }
 0x671   : > { %v5994_v59 = vpop.f32.mrb[60].mxu0 }
 0x672   : > { %v18071_v2 = vadd.f32 %v5994_v59, %v17915_v33  ;;  %v15806_v13 = vpop.f32.mrb[61].mxu0 }
 0x675   : > { %v6067_v18 = vpop.f32.mrb[76].mxu1  ;;  %v6140_v49 = vpop.f32.mrb[62].mxu0 }
 0x676   : > { %v18074_v8 = vadd.f32 %v6067_v18, %v17917_v58  ;;  %v18077_v6 = vadd.f32 %v6140_v49, %v17919_v45  ;;  %v15811_v36 = vpop.f32.mrb[77].mxu1  ;;  %v15816_v37 = vpop.f32.mrb[63].mxu0 }
 0x679   : > { %v6213_v21 = vpop.f32.mrb[78].mxu1  ;;  %v6286_v63 = vpop.f32.mrb[64].mxu0 }
 0x67a   : > { %v18080_v11 = vadd.f32 %v6213_v21, %v17921_v4  ;;  %v18083_v0 = vadd.f32 %v6286_v63, %v17923_v7  ;;  %v15821_v33 = vpop.f32.mrb[79].mxu1  ;;  %v15826_v25 = vpop.f32.mrb[65].mxu0 }
 0x67d   : > { %v6359_v5 = vpop.f32.mrb[80].mxu1  ;;  %v6432_v14 = vpop.f32.mrb[66].mxu0 }
 0x67e   : > { %v18086_v58 = vadd.f32 %v6359_v5, %v17925_v42  ;;  %v18089_v45 = vadd.f32 %v6432_v14, %v17927_v23  ;;  %v15831_v24 = vpop.f32.mrb[81].mxu1  ;;  %v15836_v34 = vpop.f32.mrb[67].mxu0 }
 0x681   : > { %v6505_v9 = vpop.f32.mrb[82].mxu1  ;;  %v6578_v43 = vpop.f32.mrb[68].mxu0 }
 0x682   : > { %v18092_v4 = vadd.f32 %v6505_v9, %v17929_v28  ;;  %v18095_v7 = vadd.f32 %v6578_v43, %v17931_v31  ;;  %v15841_v59 = vpop.f32.mrb[83].mxu1  ;;  %v15846_v13 = vpop.f32.mrb[69].mxu0 }
 0x685   : > { %v6651_v18 = vpop.f32.mrb[84].mxu1  ;;  %v6752_v49 = vpop.f32.mrb[70].mxu0 }
 0x686   : > { %v18098_v42 = vadd.f32 %v6651_v18, %v17933_v56  ;;  %v7386_v36 = vmul.f32 0.95, %v6752_v49  ;;  %v15851_v23 = vpop.f32.mrb[85].mxu1  ;;  %v15856_v37 = vpop.f32.mrb[71].mxu0 }
 0x688   : > { %v18101_v21 = vadd.f32 %v7386_v36, %v17668_v26 }
 0x689   : > { %v6822_v63 = vpop.f32.mrb[86].mxu1  ;;  %v6892_v33 = vpop.f32.mrb[72].mxu0 }
 0x68a   : > { %v7387_v28 = vmul.f32 0.95, %v6822_v63  ;;  %v7388_v25 = vmul.f32 0.95, %v6892_v33  ;;  %v15861_v5 = vpop.f32.mrb[87].mxu1  ;;  %v15866_v31 = vpop.f32.mrb[73].mxu0  ;;  %15905 = vmatmul.mubr.msk.f32.vlgmr.msra.gmra.mrb[80].mxu0 %vm1484_vm5, %v18101_v21 }
 0x68b   : > { %15913 = vmatpush3.msra.mxu0 %v18064_v32  ;;  %15914 = vmatprep.mubr.msk.f32.mxu0 %vm16745_vm1, %v16744_v1 }
 0x68c   : > { %v18109_v56 = vadd.f32 %v7387_v28, %v17674_v40  ;;  %v18112_v14 = vadd.f32 %v7388_v25, %v17686_v55  ;;  %15922 = vmatprep.subr.mxu0 %v16744_v1 }
 0x68d   : > { %v6962_v24 = vpop.f32.mrb[88].mxu1  ;;  %v7032_v34 = vpop.f32.mrb[74].mxu0 }
 0x68e   : > { %v7389_v9 = vmul.f32 0.95, %v6962_v24  ;;  %v7390_v43 = vmul.f32 0.95, %v7032_v34  ;;  %v15871_v59 = vpop.f32.mrb[89].mxu1  ;;  %v15876_v13 = vpop.f32.mrb[75].mxu0  ;;  %15910 = vmatmul.mubr.msk.f32.vlgmr.msra.gmra.mrb[96].mxu1 %vm1484_vm5, %v18109_v56  ;;  %15915 = vmatmul.mubr.msk.f32.vlgmr.msra.gmra.mrb[82].mxu0 %vm1484_vm5, %v18112_v14 }
 0x68f   : > { %15918 = vmatpush3.msra.mxu1 %v18064_v32  ;;  %15923 = vmatpush3.msra.mxu0 %v18064_v32 }
 0x690   : > { %v18122_v18 = vadd.f32 %v7389_v9, %v17698_v29  ;;  %v18125_v49 = vadd.f32 %v7390_v43, %v17710_v10  ;;  %15919 = vmatprep.mubr.msk.f32.mxu1 %vm16745_vm1, %v16744_v1  ;;  %15924 = vmatprep.mubr.msk.f32.mxu0 %vm16745_vm1, %v16744_v1 }
 0x691   : > { %v7102_v36 = vpop.f32.mrb[90].mxu1  ;;  %v7172_v23 = vpop.f32.mrb[76].mxu0  ;;  %15927 = vmatprep.subr.mxu1 %v16744_v1  ;;  %15932 = vmatprep.subr.mxu0 %v16744_v1 }
 0x692   : > { %v7391_v37 = vmul.f32 0.95, %v7102_v36  ;;  %v7392_v63 = vmul.f32 0.95, %v7172_v23  ;;  %v15881_v33 = vpop.f32.mrb[91].mxu1  ;;  %v15886_v28 = vpop.f32.mrb[77].mxu0  ;;  %15920 = vmatmul.mubr.msk.f32.vlgmr.msra.gmra.mrb[98].mxu1 %vm1484_vm5, %v18122_v18  ;;  %15925 = vmatmul.mubr.msk.f32.vlgmr.msra.gmra.mrb[84].mxu0 %vm1484_vm5, %v18125_v49 }
 0x693   : > { %15928 = vmatpush3.msra.mxu1 %v18064_v32  ;;  %15933 = vmatpush3.msra.mxu0 %v18064_v32  ;;  %v6680_v23 = vld [vmem:[%s19201_s2 + $0x178] sm:$0xff] }
 0x694   : > { %v18140_v25 = vadd.f32 %v7391_v37, %v17722_v16  ;;  %v18143_v5 = vadd.f32 %v7392_v63, %v17734_v52  ;;  %15929 = vmatprep.mubr.msk.f32.mxu1 %vm16745_vm1, %v16744_v1  ;;  %15934 = vmatprep.mubr.msk.f32.mxu0 %vm16745_vm1, %v16744_v1 }
 0x695   : > { %v7242_v31 = vpop.f32.mrb[92].mxu1  ;;  %v7312_v24 = vpop.f32.mrb[78].mxu0  ;;  %15937 = vmatprep.subr.mxu1 %v16744_v1  ;;  %15942 = vmatprep.subr.mxu0 %v16744_v1 }
 0x696   : > { %v7393_v34 = vmul.f32 0.95, %v7242_v31  ;;  %v7394_v9 = vmul.f32 0.95, %v7312_v24  ;;  %v15891_v43 = vpop.f32.mrb[93].mxu1  ;;  %v15896_v59 = vpop.f32.mrb[79].mxu0  ;;  %15930 = vmatmul.mubr.msk.f32.vlgmr.msra.gmra.mrb[100].mxu1 %vm1484_vm5, %v18140_v25  ;;  %15935 = vmatmul.mubr.msk.f32.vlgmr.msra.gmra.mrb[86].mxu0 %vm1484_vm5, %v18143_v5 }
 0x697   : > { %15938 = vmatpush3.msra.mxu1 %v18064_v32  ;;  %15943 = vmatpush3.msra.mxu0 %v18064_v32 }
 0x698   : > { %v18158_v13 = vadd.f32 %v7393_v34, %v17746_v30  ;;  %v18161_v36 = vadd.f32 %v7394_v9, %v17749_v3  ;;  %15939 = vmatprep.mubr.msk.f32.mxu1 %vm16745_vm1, %v16744_v1  ;;  %15944 = vmatprep.mubr.msk.f32.mxu0 %vm16745_vm1, %v16744_v1 }
 0x699   : > { %v7382_v37 = vpop.f32.mrb[94].mxu1  ;;  %15947 = vmatprep.subr.mxu1 %v16744_v1  ;;  %15952 = vmatprep.subr.mxu0 %v16744_v1 }
 0x69a   : > { %v7395_v63 = vmul.f32 0.95, %v7382_v37  ;;  %v15901_v33 = vpop.f32.mrb[95].mxu1  ;;  %15940 = vmatmul.mubr.msk.f32.vlgmr.msra.gmra.mrb[102].mxu1 %vm1484_vm5, %v18158_v13  ;;  %15945 = vmatmul.mubr.msk.f32.vlgmr.msra.gmra.mrb[88].mxu0 %vm1484_vm5, %v18161_v36 }
 0x69b   : > { %15948 = vmatpush3.msra.mxu1 %v18064_v32  ;;  %15953 = vmatpush3.msra.mxu0 %v6680_v23 }
 0x69c   : > { %v18178_v28 = vadd.f32 %v7395_v63, %v17767_v51  ;;  %15949 = vmatprep.mubr.msk.f32.mxu1 %vm16745_vm1, %v16744_v1  ;;  %15954 = vmatprep.mubr.msk.f32.mxu0 %vm16745_vm1, %v16744_v1 }
 0x69d   : > { %15957 = vmatprep.subr.mxu1 %v16744_v1  ;;  %15962 = vmatprep.subr.mxu0 %v16744_v1 }
 0x69e   : > { %15950 = vmatmul.mubr.msk.f32.vlgmr.msra.gmra.mrb[104].mxu1 %vm1484_vm5, %v18178_v28  ;;  %15955 = vmatmul.mubr.msk.f32.vlgmr.msra.gmra.mrb[90].mxu0 %vm1484_vm5, %v17566_v12 }
 0x69f   : > { %15958 = vmatpush3.msra.mxu1 %v6680_v23  ;;  %15963 = vmatpush3.msra.mxu0 %v6680_v23 }
 0x6a0   : > { %15959 = vmatprep.mubr.msk.f32.mxu1 %vm16745_vm1, %v16744_v1  ;;  %15964 = vmatprep.mubr.msk.f32.mxu0 %vm16745_vm1, %v16744_v1 }
 0x6a1   : > { %15967 = vmatprep.subr.mxu1 %v16744_v1  ;;  %15972 = vmatprep.subr.mxu0 %v16744_v1 }
 0x6a2   : > { %15960 = vmatmul.mubr.msk.f32.vlgmr.msra.gmra.mrb[106].mxu1 %vm1484_vm5, %v17491_v15  ;;  %15965 = vmatmul.mubr.msk.f32.vlgmr.msra.gmra.mrb[92].mxu0 %vm1484_vm5, %v17497_v19  ;;  %v18312_v15 = vld [vmem:[%s19201_s2 + $0x188] sm:$0xff] }
 0x6a3   : > { %15968 = vmatpush3.msra.mxu1 %v6680_v23  ;;  %15973 = vmatpush3.msra.mxu0 %v6680_v23 }
 0x6a4   : > { %15969 = vmatprep.mubr.msk.f32.mxu1 %vm16745_vm1, %v16744_v1  ;;  %15974 = vmatprep.mubr.msk.f32.mxu0 %vm16745_vm1, %v16744_v1 }
 0x6a5   : > { %15977 = vmatprep.subr.mxu1 %v16744_v1  ;;  %15982 = vmatprep.subr.mxu0 %v16744_v1 }
 0x6a6   : > { %15970 = vmatmul.mubr.msk.f32.vlgmr.msra.gmra.mrb[108].mxu1 %vm1484_vm5, %v17501_v17  ;;  %15975 = vmatmul.mubr.msk.f32.vlgmr.msra.gmra.mrb[94].mxu0 %vm1484_vm5, %v17511_v27 }
 0x6a7   : > { %15978 = vmatpush3.msra.mxu1 %v6680_v23  ;;  %15983 = vmatpush3.msra.mxu0 %v6680_v23 }
 0x6a8   : > { %15979 = vmatprep.mubr.msk.f32.mxu1 %vm16745_vm1, %v16744_v1  ;;  %15984 = vmatprep.mubr.msk.f32.mxu0 %vm16745_vm1, %v16744_v1 }
 0x6a9   : > { %15987 = vmatprep.subr.mxu1 %v16744_v1  ;;  %15992 = vmatprep.subr.mxu0 %v16744_v1 }
 0x6aa   : > { %15980 = vmatmul.mubr.msk.f32.vlgmr.msra.gmra.mrb[110].mxu1 %vm1484_vm5, %v17507_v22  ;;  %15985 = vmatmul.mubr.msk.f32.vlgmr.msra.gmra.mrb[96].mxu0 %vm1484_vm5, %v17543_v44 }
 0x6ab   : > { %15988 = vmatpush3.msra.mxu1 %v6680_v23  ;;  %15993 = vmatpush3.msra.mxu0 %v6680_v23 }
 0x6ac   : > { %15989 = vmatprep.mubr.msk.f32.mxu1 %vm16745_vm1, %v16744_v1  ;;  %15994 = vmatprep.mubr.msk.f32.mxu0 %vm16745_vm1, %v16744_v1 }
 0x6ad   : > { %15997 = vmatprep.subr.mxu1 %v16744_v1  ;;  %16002 = vmatprep.subr.mxu0 %v16744_v1 }
 0x6ae   : > { %15990 = vmatmul.mubr.msk.f32.vlgmr.msra.gmra.mrb[112].mxu1 %vm1484_vm5, %v17548_v48  ;;  %15995 = vmatmul.mubr.msk.f32.vlgmr.msra.gmra.mrb[98].mxu0 %vm1484_vm5, %v17563_v62 }
 0x6af   : > { %15998 = vmatpush3.msra.mxu1 %v6680_v23  ;;  %16003 = vmatpush3.msk.msra.mxu0 %vm1606_vm3, %v18101_v21 }
 0x6b0   : > { %15999 = vmatprep.mubr.msk.f32.mxu1 %vm16745_vm1, %v16744_v1  ;;  %16004 = vmatprep.mubr.msk.f32.mxu0 %vm16745_vm1, %v16744_v1 }
 0x6b1   : > { %16007 = vmatprep.subr.mxu1 %v16744_v1  ;;  %16012 = vmatprep.subr.mxu0 %v16744_v1 }
 0x6b2   : > { %16000 = vmatmul.mubr.msk.f32.vlgmr.msra.gmra.mrb[114].mxu1 %vm1484_vm5, %v17568_v35  ;;  %16005 = vmatmul.mubr.msk.f32.vlgmr.msra.gmra.mrb[100].mxu0 %vm1602_vm4, %v17571_v20 }
 0x6b3   : > { %16008 = vmatpush3.msk.msra.mxu1 %vm1606_vm3, %v18109_v56  ;;  %16013 = vmatpush3.msk.msra.mxu0 %vm1606_vm3, %v18112_v14 }
 0x6b4   : > { %16009 = vmatprep.mubr.msk.f32.mxu1 %vm16745_vm1, %v16744_v1  ;;  %16014 = vmatprep.mubr.msk.f32.mxu0 %vm16745_vm1, %v16744_v1 }
 0x6b5   : > { %16017 = vmatprep.subr.mxu1 %v16744_v1  ;;  %16022 = vmatprep.subr.mxu0 %v16744_v1 }
 0x6b6   : > { %16010 = vmatmul.mubr.msk.f32.vlgmr.msra.gmra.mrb[116].mxu1 %vm1602_vm4, %v17571_v20  ;;  %16015 = vmatmul.mubr.msk.f32.vlgmr.msra.gmra.mrb[102].mxu0 %vm1602_vm4, %v17571_v20 }
 0x6b7   : > { %16018 = vmatpush3.msk.msra.mxu1 %vm1606_vm3, %v18122_v18  ;;  %16023 = vmatpush3.msk.msra.mxu0 %vm1606_vm3, %v18125_v49 }
 0x6b8   : > { %16019 = vmatprep.mubr.msk.f32.mxu1 %vm16745_vm1, %v16744_v1  ;;  %16024 = vmatprep.mubr.msk.f32.mxu0 %vm16745_vm1, %v16744_v1 }
 0x6b9   : > { %16027 = vmatprep.subr.mxu1 %v16744_v1  ;;  %16032 = vmatprep.subr.mxu0 %v16744_v1 }
 0x6ba   : > { %16020 = vmatmul.mubr.msk.f32.vlgmr.msra.gmra.mrb[118].mxu1 %vm1602_vm4, %v17571_v20  ;;  %16025 = vmatmul.mubr.msk.f32.vlgmr.msra.gmra.mrb[104].mxu0 %vm1602_vm4, %v17571_v20 }
 0x6bb   : > { %16028 = vmatpush3.msk.msra.mxu1 %vm1606_vm3, %v18140_v25  ;;  %16033 = vmatpush3.msk.msra.mxu0 %vm1606_vm3, %v18143_v5 }
 0x6bc   : > { %16029 = vmatprep.mubr.msk.f32.mxu1 %vm16745_vm1, %v16744_v1  ;;  %16034 = vmatprep.mubr.msk.f32.mxu0 %vm16745_vm1, %v16744_v1 }
 0x6bd   : > { %16037 = vmatprep.subr.mxu1 %v16744_v1  ;;  %16042 = vmatprep.subr.mxu0 %v16744_v1 }
 0x6be   : > { %16030 = vmatmul.mubr.msk.f32.vlgmr.msra.gmra.mrb[120].mxu1 %vm1602_vm4, %v17571_v20  ;;  %16035 = vmatmul.mubr.msk.f32.vlgmr.msra.gmra.mrb[106].mxu0 %vm1602_vm4, %v17571_v20 }
 0x6bf   : > { %16038 = vmatpush3.msk.msra.mxu1 %vm1606_vm3, %v18158_v13  ;;  %16043 = vmatpush3.msk.msra.mxu0 %vm1606_vm3, %v18161_v36 }
 0x6c0   : > { %16039 = vmatprep.mubr.msk.f32.mxu1 %vm16745_vm1, %v16744_v1  ;;  %16044 = vmatprep.mubr.msk.f32.mxu0 %vm16745_vm1, %v16744_v1 }
 0x6c1   : > { %16047 = vmatprep.subr.mxu1 %v16744_v1  ;;  %16052 = vmatprep.subr.mxu0 %v16744_v1 }
 0x6c2   : > { %16040 = vmatmul.mubr.msk.f32.vlgmr.msra.gmra.mrb[122].mxu1 %vm1602_vm4, %v17571_v20  ;;  %16045 = vmatmul.mubr.msk.f32.vlgmr.msra.gmra.mrb[108].mxu0 %vm1602_vm4, %v17571_v20 }
 0x6c3   : > { %16048 = vmatpush3.msk.msra.mxu1 %vm1606_vm3, %v18178_v28  ;;  %16049 = vmatprep.mubr.msk.f32.mxu1 %vm16745_vm1, %v16744_v1 }
 0x6c4   : > { %16054 = vmatprep.mubr.msk.f32.mxu0 %vm16745_vm1, %v16744_v1  ;;  %16057 = vmatprep.subr.mxu1 %v16744_v1 }
 0x6c5   : > { %16053 = vmatpush3.msra.mxu0 %v18312_v15 }
 0x6c6   : > { %16050 = vmatmul.mubr.msk.f32.vlgmr.msra.gmra.mrb[124].mxu1 %vm1602_vm4, %v17571_v20  ;;  %16062 = vmatprep.subr.mxu0 %v16744_v1 }
 0x6c7   : > { %16059 = vmatprep.mubr.msk.f32.mxu1 %vm16745_vm1, %v16744_v1  ;;  %16058 = vmatpush3.msra.mxu1 %v18312_v15 }
 0x6c8   : > { %16067 = vmatprep.subr.mxu1 %v16744_v1 }
 0x75d   : > { %v7475_v19 = vpop.f32.mrb[80].mxu0 }
 0x75e   : > { %v15906_v17 = vpop.f32.mrb[81].mxu0 }
 0x761   : > { %v7548_v22 = vpop.f32.mrb[96].mxu1  ;;  %v7621_v27 = vpop.f32.mrb[82].mxu0 }
 0x762   : > { %v15911_v44 = vpop.f32.mrb[97].mxu1  ;;  %v15916_v48 = vpop.f32.mrb[83].mxu0 }
 0x765   : > { %v7694_v62 = vpop.f32.mrb[98].mxu1  ;;  %v7767_v12 = vpop.f32.mrb[84].mxu0 }
 0x766   : > { %v15921_v35 = vpop.f32.mrb[99].mxu1  ;;  %v15926_v20 = vpop.f32.mrb[85].mxu0 }
 0x769   : > { %v7840_v32 = vpop.f32.mrb[100].mxu1  ;;  %v7913_v21 = vpop.f32.mrb[86].mxu0 }
 0x76a   : > { %v15931_v56 = vpop.f32.mrb[101].mxu1  ;;  %v15936_v14 = vpop.f32.mrb[87].mxu0 }
 0x76d   : > { %v7986_v18 = vpop.f32.mrb[102].mxu1  ;;  %v8059_v49 = vpop.f32.mrb[88].mxu0 }
 0x76e   : > { %v15941_v25 = vpop.f32.mrb[103].mxu1  ;;  %v15946_v5 = vpop.f32.mrb[89].mxu0 }
 0x771   : > { %v8132_v31 = vpop.f32.mrb[104].mxu1  ;;  %v8202_v24 = vpop.f32.mrb[90].mxu0 }
 0x772   : > { %v18318_v34 = vadd.f32 %v8202_v24, %v7475_v19  ;;  %v15951_v9 = vpop.f32.mrb[105].mxu1  ;;  %v15956_v43 = vpop.f32.mrb[91].mxu0 }
 0x775   : > { %v8272_v59 = vpop.f32.mrb[106].mxu1  ;;  %v8342_v13 = vpop.f32.mrb[92].mxu0 }
 0x776   : > { %v18320_v36 = vadd.f32 %v8272_v59, %v7548_v22  ;;  %v18322_v23 = vadd.f32 %v8342_v13, %v7621_v27  ;;  %v15961_v37 = vpop.f32.mrb[107].mxu1  ;;  %v15966_v63 = vpop.f32.mrb[93].mxu0 }
 0x779   : > { %v8412_v33 = vpop.f32.mrb[108].mxu1  ;;  %v8482_v28 = vpop.f32.mrb[94].mxu0 }
 0x77a   : > { %v18324_v17 = vadd.f32 %v8412_v33, %v7694_v62  ;;  %v18326_v44 = vadd.f32 %v8482_v28, %v7767_v12  ;;  %v15971_v48 = vpop.f32.mrb[109].mxu1  ;;  %v15976_v35 = vpop.f32.mrb[95].mxu0 }
 0x77d   : > { %v8552_v19 = vpop.f32.mrb[110].mxu1  ;;  %v8622_v20 = vpop.f32.mrb[96].mxu0 }
 0x77e   : > { %v18328_v56 = vadd.f32 %v8552_v19, %v7840_v32  ;;  %v18330_v14 = vadd.f32 %v8622_v20, %v7913_v21  ;;  %v15981_v22 = vpop.f32.mrb[111].mxu1  ;;  %v15986_v25 = vpop.f32.mrb[97].mxu0 }
 0x781   : > { %v8692_v27 = vpop.f32.mrb[112].mxu1  ;;  %v8762_v5 = vpop.f32.mrb[98].mxu0 }
 0x782   : > { %v18332_v24 = vadd.f32 %v8692_v27, %v7986_v18  ;;  %v18334_v9 = vadd.f32 %v8762_v5, %v8059_v49  ;;  %v15991_v62 = vpop.f32.mrb[113].mxu1  ;;  %v15996_v43 = vpop.f32.mrb[99].mxu0 }
 0x785   : > { %v8832_v12 = vpop.f32.mrb[114].mxu1  ;;  %v8904_v59 = vpop.f32.mrb[100].mxu0 }
 0x786   : > { %v18336_v13 = vadd.f32 %v8832_v12, %v8132_v31  ;;  %v9556_v37 = vmul.f32 0.95, %v8904_v59  ;;  %v16001_v63 = vpop.f32.mrb[115].mxu1  ;;  %v16006_v32 = vpop.f32.mrb[101].mxu0 }
 0x788   : > { %v9566_v21 = vadd.f32 %v9556_v37, %v17668_v26 }
 0x789   : > { %v8976_v33 = vpop.f32.mrb[116].mxu1  ;;  %v9048_v28 = vpop.f32.mrb[102].mxu0 }
 0x78a   : > { %v9557_v48 = vmul.f32 0.95, %v8976_v33  ;;  %v9558_v35 = vmul.f32 0.95, %v9048_v28  ;;  %v16011_v19 = vpop.f32.mrb[117].mxu1  ;;  %v16016_v18 = vpop.f32.mrb[103].mxu0  ;;  %16055 = vmatmul.mubr.msk.f32.vlgmr.msra.gmra.mrb[110].mxu0 %vm1484_vm5, %v9566_v21 }
 0x78b   : > { %16063 = vmatpush3.msra.mxu0 %v18312_v15  ;;  %16064 = vmatprep.mubr.msk.f32.mxu0 %vm16745_vm1, %v16744_v1 }
 0x78c   : > { %v9567_v49 = vadd.f32 %v9557_v48, %v17674_v40  ;;  %v9568_v31 = vadd.f32 %v9558_v35, %v17686_v55  ;;  %16072 = vmatprep.subr.mxu0 %v16744_v1 }
 0x78d   : > { %v9120_v26 = vpop.f32.mrb[118].mxu1  ;;  %v9192_v20 = vpop.f32.mrb[104].mxu0 }
 0x78e   : > { %v9559_v22 = vmul.f32 0.95, %v9120_v26  ;;  %v9560_v25 = vmul.f32 0.95, %v9192_v20  ;;  %v16021_v27 = vpop.f32.mrb[119].mxu1  ;;  %v16026_v5 = vpop.f32.mrb[105].mxu0  ;;  %16060 = vmatmul.mubr.msk.f32.vlgmr.msra.gmra.mrb[126].mxu1 %vm1484_vm5, %v9567_v49  ;;  %16065 = vmatmul.mubr.msk.f32.vlgmr.msra.gmra.mrb[112].mxu0 %vm1484_vm5, %v9568_v31 }
 0x78f   : > { %16068 = vmatpush3.msra.mxu1 %v18312_v15  ;;  %16073 = vmatpush3.msra.mxu0 %v18312_v15 }
 0x790   : > { %v9569_v40 = vadd.f32 %v9559_v22, %v17698_v29  ;;  %v9570_v55 = vadd.f32 %v9560_v25, %v17710_v10  ;;  %16069 = vmatprep.mubr.msk.f32.mxu1 %vm16745_vm1, %v16744_v1  ;;  %16074 = vmatprep.mubr.msk.f32.mxu0 %vm16745_vm1, %v16744_v1 }
 0x791   : > { %v9264_v62 = vpop.f32.mrb[120].mxu1  ;;  %v9336_v43 = vpop.f32.mrb[106].mxu0  ;;  %16077 = vmatprep.subr.mxu1 %v16744_v1  ;;  %16082 = vmatprep.subr.mxu0 %v16744_v1 }
 0x792   : > { %v9561_v12 = vmul.f32 0.95, %v9264_v62  ;;  %v9562_v59 = vmul.f32 0.95, %v9336_v43  ;;  %v16031_v37 = vpop.f32.mrb[121].mxu1  ;;  %v16036_v63 = vpop.f32.mrb[107].mxu0  ;;  %16070 = vmatmul.mubr.msk.f32.vlgmr.msra.gmra.mrb[128].mxu1 %vm1484_vm5, %v9569_v40  ;;  %16075 = vmatmul.mubr.msk.f32.vlgmr.msra.gmra.mrb[114].mxu0 %vm1484_vm5, %v9570_v55 }
 0x793   : > { %16078 = vmatpush3.msra.mxu1 %v18312_v15  ;;  %16083 = vmatpush3.msra.mxu0 %v18312_v15 }
 0x794   : > { %v9571_v29 = vadd.f32 %v9561_v12, %v17722_v16  ;;  %v9572_v10 = vadd.f32 %v9562_v59, %v17734_v52  ;;  %16079 = vmatprep.mubr.msk.f32.mxu1 %vm16745_vm1, %v16744_v1  ;;  %16084 = vmatprep.mubr.msk.f32.mxu0 %vm16745_vm1, %v16744_v1 }
 0x795   : > { %v9408_v32 = vpop.f32.mrb[122].mxu1  ;;  %v9480_v21 = vpop.f32.mrb[108].mxu0  ;;  %16087 = vmatprep.subr.mxu1 %v16744_v1  ;;  %16092 = vmatprep.subr.mxu0 %v16744_v1 }
 0x796   : > { %v9563_v33 = vmul.f32 0.95, %v9408_v32  ;;  %v9564_v28 = vmul.f32 0.95, %v9480_v21  ;;  %v16041_v48 = vpop.f32.mrb[123].mxu1  ;;  %v16046_v35 = vpop.f32.mrb[109].mxu0  ;;  %16080 = vmatmul.mubr.msk.f32.vlgmr.msra.gmra.mrb[130].mxu1 %vm1484_vm5, %v9571_v29  ;;  %16085 = vmatmul.mubr.msk.f32.vlgmr.msra.gmra.mrb[116].mxu0 %vm1484_vm5, %v9572_v10 }
 0x797   : > { %16088 = vmatpush3.msra.mxu1 %v18312_v15  ;;  %16093 = vmatpush3.msra.mxu0 %v18312_v15 }
 0x798   : > { %v9573_v16 = vadd.f32 %v9563_v33, %v17746_v30  ;;  %v9574_v52 = vadd.f32 %v9564_v28, %v17749_v3  ;;  %16089 = vmatprep.mubr.msk.f32.mxu1 %vm16745_vm1, %v16744_v1  ;;  %16094 = vmatprep.mubr.msk.f32.mxu0 %vm16745_vm1, %v16744_v1  ;;  %v18397_v3 = vld [vmem:[%s19201_s2 + $0x170] ss:$0 sm:$0xff] }
 0x799   : > { %v9552_v19 = vpop.f32.mrb[124].mxu1  ;;  %16097 = vmatprep.subr.mxu1 %v16744_v1  ;;  %16102 = vmatprep.subr.mxu0 %v16744_v1  ;;  %v6670_v20 = vadd.f32 %v18397_v3, %v18071_v2  ;;  %v6671_v12 = vadd.f32 %v18397_v3, %v18074_v8  ;;  %v6674_v48 = vadd.f32 %v18397_v3, %v18083_v0 }
 0x79a   : > { %v9565_v18 = vmul.f32 0.95, %v9552_v19  ;;  %v16051_v49 = vpop.f32.mrb[125].mxu1  ;;  %16090 = vmatmul.mubr.msk.f32.vlgmr.msra.gmra.mrb[132].mxu1 %vm1484_vm5, %v9573_v16  ;;  %16095 = vmatmul.mubr.msk.f32.vlgmr.msra.gmra.mrb[118].mxu0 %vm1484_vm5, %v9574_v52  ;;  %v6675_v0 = vadd.f32 %v18397_v3, %v18086_v58 }
 0x79b   : > { %16098 = vmatpush3.msra.mxu1 %v18312_v15  ;;  %16099 = vmatprep.mubr.msk.f32.mxu1 %vm16745_vm1, %v16744_v1 }
 0x79c   : > { %v9575_v30 = vadd.f32 %v9565_v18, %v17767_v51  ;;  %16104 = vmatprep.mubr.msk.f32.mxu0 %vm16745_vm1, %v16744_v1  ;;  %16532 = vmatprep.subr.bf16.mxu1 %v16761_v38  ;;  %v18402_v51 = vld [vmem:[%s19201_s2 + $0x190] ss:$0 sm:$0xff] }
 0x79e   : > { %16100 = vmatmul.mubr.msk.f32.vlgmr.msra.gmra.mrb[134].mxu1 %vm1484_vm5, %v9575_v30 }
 0x79f   : > { %16121 = vmatprep.mubr.msk.f32.mxu1 %vm16745_vm1, %v16744_v1 }
 0x85d   : > { %v9645_v15 = vpop.f32.mrb[110].mxu0 }
 0x85e   : > { %v10306_v31 = vadd.f32 %v9645_v15, %v18318_v34  ;;  %v16056_v26 = vpop.f32.mrb[111].mxu0  ;;  %v6672_v34 = vadd.f32 %v18397_v3, %v18077_v6  ;;  %v6673_v6 = vadd.f32 %v18397_v3, %v18080_v11 }
 0x860   : > { %v10321_v22 = vadd.f32 %v18402_v51, %v10306_v31 }
 0x861   : > { %v9718_v25 = vpop.f32.mrb[126].mxu1  ;;  %v9791_v27 = vpop.f32.mrb[112].mxu0 }
 0x862   : > { %v10331_v5 = vadd.f32 %v10321_v22, %v6670_v20  ;;  %v10307_v40 = vadd.f32 %v9718_v25, %v18320_v36  ;;  %v10308_v55 = vadd.f32 %v9791_v27, %v18322_v23  ;;  %v16061_v62 = vpop.f32.mrb[127].mxu1  ;;  %v16066_v43 = vpop.f32.mrb[113].mxu0 }
 0x864   : > { %v10322_v59 = vadd.f32 %v18402_v51, %v10307_v40  ;;  %v10323_v2 = vadd.f32 %v18402_v51, %v10308_v55  ;;  %v18417_v29 = vadd.f32 %v10331_v5, %v17136_v50 }
 0x865   : > { %v9864_v37 = vpop.f32.mrb[128].mxu1  ;;  %v9937_v63 = vpop.f32.mrb[114].mxu0 }
 0x866   : > { %v10332_v36 = vadd.f32 %v10322_v59, %v6671_v12  ;;  %v10333_v10 = vadd.f32 %v10323_v2, %v6672_v34  ;;  %v10309_v23 = vadd.f32 %v9864_v37, %v18324_v17  ;;  %v16071_v32 = vpop.f32.mrb[129].mxu1  ;;  %v16076_v21 = vpop.f32.mrb[115].mxu0  ;;  %v10310_v8 = vadd.f32 %v9937_v63, %v18326_v44 }
 0x867   : > { %v10372_v44 = vsel %vm10371_vm0, %v18417_v29, 0.0  ;;  %v6679_v32 = vadd.f32 %v18397_v3, %v18098_v42 }
 0x868   : > { %v18424_v33 = vadd.f32 %v10332_v36, %v17145_v57  ;;  %v18427_v28 = vadd.f32 %v10333_v10, %v17174_v60  ;;  %v10324_v50 = vadd.f32 %v18402_v51, %v10309_v23  ;;  %v10325_v17 = vadd.f32 %v18402_v51, %v10310_v8 }
 0x869   : > { %v10010_v35 = vpop.f32.mrb[130].mxu1  ;;  %v10083_v16 = vpop.f32.mrb[116].mxu0 }
 0x86a   : > { %v10373_v11 = vsel %vm10371_vm0, %v18424_v33, 0.0  ;;  %v10334_v57 = vadd.f32 %v10324_v50, %v6673_v6  ;;  %v10311_v52 = vadd.f32 %v10010_v35, %v18328_v56  ;;  %v16081_v60 = vpop.f32.mrb[131].mxu1  ;;  %v16086_v19 = vpop.f32.mrb[117].mxu0  ;;  %v10335_v49 = vadd.f32 %v10325_v17, %v6674_v48 }
 0x86b   : > { %v10374_v18 = vadd.f32 %v10373_v11, %v10372_v44  ;;  %v10312_v30 = vadd.f32 %v10083_v16, %v18330_v14  ;;  %v10375_v15 = vsel %vm10371_vm0, %v18427_v28, 0.0  ;;  %v6676_v56 = vadd.f32 %v18397_v3, %v18089_v45  ;;  %v14749_v11 = vld [vmem:[%s16945_s29 + $0xc] sm:$0x7] }
 0x86c   : > { %v18444_v31 = vadd.f32 %v10334_v57, %v17177_v61  ;;  %v10326_v26 = vadd.f32 %v18402_v51, %v10311_v52  ;;  %v18450_v22 = vadd.f32 %v10335_v49, %v17107_v39  ;;  %v6677_v45 = vadd.f32 %v18397_v3, %v18092_v4  ;;  %16103 = vmatpush3.msk.msra.mxu0 %vm1606_vm3, %v14749_v11  ;;  %v10352_v11 = vld [vmem:[%s19202_s3 + $0x4] sm:$0x7] }
 0x86d   : > { %v10376_v20 = vadd.f32 %v10375_v15, %v10374_v18  ;;  %v10327_v14 = vadd.f32 %v18402_v51, %v10312_v30  ;;  %v10156_v25 = vpop.f32.mrb[132].mxu1  ;;  %v10229_v27 = vpop.f32.mrb[118].mxu0  ;;  %v6678_v39 = vadd.f32 %v18397_v3, %v18095_v7  ;;  %16541 = vmatprep.subr.bf16.mxu0 %v16761_v38 }
 0x86e   : > { %v10377_v58 = vsel %vm10371_vm0, %v18444_v31, 0.0  ;;  %v10336_v5 = vadd.f32 %v10326_v26, %v6675_v0  ;;  %v10313_v61 = vadd.f32 %v10156_v25, %v18332_v24  ;;  %v10314_v40 = vadd.f32 %v10229_v27, %v18334_v9  ;;  %v16091_v55 = vpop.f32.mrb[133].mxu1  ;;  %v16096_v62 = vpop.f32.mrb[119].mxu0 }
 0x86f   : > { %v10378_v43 = vadd.f32 %v10377_v58, %v10376_v20  ;;  %v10337_v12 = vadd.f32 %v10327_v14, %v6676_v56  ;;  %v10379_v34 = vsel %vm10371_vm0, %v18450_v22, 0.0 }
 0x870   : > { %v10346_v59 = vadd.f32 %v10336_v5, %v17110_v41  ;;  %v10328_v2 = vadd.f32 %v18402_v51, %v10313_v61  ;;  %v10329_v24 = vadd.f32 %v18402_v51, %v10314_v40 }
 0x871   : > { %v10380_v9 = vadd.f32 %v10379_v34, %v10378_v43  ;;  %v10347_v37 = vadd.f32 %v10337_v12, %v17126_v46  ;;  %v10302_v63 = vpop.f32.mrb[134].mxu1 }
 0x872   : > { %v10381_v4 = vsel %vm10371_vm0, %v10346_v59, 0.0  ;;  %v10338_v36 = vadd.f32 %v10328_v2, %v6677_v45  ;;  %v10339_v10 = vadd.f32 %v10329_v24, %v6678_v39  ;;  %v10315_v7 = vadd.f32 %v10302_v63, %v18336_v13  ;;  %v16101_v23 = vpop.f32.mrb[135].mxu1 }
 0x873   : > { %v10382_v41 = vadd.f32 %v10381_v4, %v10380_v9  ;;  %v10383_v21 = vsel %vm10371_vm0, %v10347_v37, 0.0 }
 0x874   : > { %v10348_v8 = vadd.f32 %v10338_v36, %v17129_v47  ;;  %v10349_v46 = vadd.f32 %v10339_v10, %v17139_v53  ;;  %v10330_v6 = vadd.f32 %v18402_v51, %v10315_v7  ;;  %v14748_v47 = vld [vmem:[%s16945_s29 + $0x8] sm:$0x7] }
 0x875   : > { %v10384_v50 = vadd.f32 %v10383_v21, %v10382_v41  ;;  %16105 = vmatmul.mubr.msk.f32.vlgmr.msra.gmra.mrb[120].mxu0 %vm1602_vm4, %v14748_v47  ;;  %v10364_v47 = vld [vmem:[%s19203_s4 + $0xc] sm:$0x7] }
 0x876   : > { %v10385_v48 = vsel %vm10371_vm0, %v10348_v8, 0.0  ;;  %v10340_v17 = vadd.f32 %v10330_v6, %v6679_v32  ;;  %v10387_v42 = vsel %vm10371_vm0, %v10349_v46, 0.0  ;;  %16138 = vmatprep.mubr.msk.f32.mxu0 %vm16745_vm1, %v16744_v1 }
 0x877   : > { %v10386_v13 = vadd.f32 %v10385_v48, %v10384_v50 }
 0x878   : > { %v10350_v35 = vadd.f32 %v10340_v17, %v17142_v54 }
 0x879   : > { %v10388_v3 = vadd.f32 %v10387_v42, %v10386_v13 }
 0x87a   : > { %v10389_v16 = vsel %vm10371_vm0, %v10350_v35, 0.0 }
 0x87b   : > { %v10390_v44 = vadd.f32 %v10389_v16, %v10388_v3 }
 0x87d   : > { %10391 = vadd.xlane.f32.xlu0 %v10390_v44  ;;  %v10354_v44 = vld [vmem:[%s19202_s3 + $0xc] sm:$0x7] }
 0x90a   : > { %v10392_v53 = vpop.xlane.xlu0 %10391 }
 0x90b   : > { %v10393_v54 = vrot.slane %v10392_v53, 4 }
 0x90d   : > { %v10394_v51 = vadd.f32 %v10393_v54, %v10392_v53 }
 0x90f   : > { %v10395_v57 = vrot.slane %v10394_v51, 2 }
 0x911   : > { %v10396_v52 = vadd.f32 %v10395_v57, %v10394_v51 }
 0x913   : > { %v10397_v60 = vrot.slane %v10396_v52, 1 }
 0x915   : > { %v10398_v19 = vadd.f32 %v10397_v60, %v10396_v52  ;;  %v10362_v52 = vld [vmem:[%s19203_s4 + $0x4] sm:$0x7]  ;;  %v10357_v60 = vld [vmem:[%s19202_s3 + $0x18] sm:$0x7] }
 0x917   : > { %16599 = vpush %v10398_v19  ;;  %v10353_v19 = vld [vmem:[%s19202_s3 + $0x8] sm:$0x7] }
 0x948   : > { %s16600_s17 = spop %16599 }
 0x949   : > { %s10402_s21 = smul.f32 0.004166667, %s16600_s17 }
 0x94b   : > { %v10403_v18 = vstv %s10402_s21 }
 0x94c   : > { %v18487_v49 = vsub.f32 %v18417_v29, %v10403_v18  ;;  %v10405_v30 = vsub.f32 %v18424_v33, %v10403_v18  ;;  %v18491_v0 = vsub.f32 %v18427_v28, %v10403_v18  ;;  %v10407_v15 = vsub.f32 %v18444_v31, %v10403_v18 }
 0x94d   : > { %v18497_v20 = vsub.f32 %v18450_v22, %v10403_v18  ;;  %v18501_v25 = vsub.f32 %v10346_v59, %v10403_v18  ;;  %v10410_v58 = vsub.f32 %v10347_v37, %v10403_v18  ;;  %v18508_v22 = vsub.f32 %v10348_v8, %v10403_v18 }
 0x94e   : > { %v10414_v26 = vmul.f32 %v18487_v49, %v18487_v49  ;;  %v10415_v56 = vmul.f32 %v10405_v30, %v10405_v30  ;;  %v10416_v14 = vmul.f32 %v18491_v0, %v18491_v0  ;;  %v10417_v29 = vmul.f32 %v10407_v15, %v10407_v15 }
 0x94f   : > { %v10418_v31 = vmul.f32 %v18497_v20, %v18497_v20  ;;  %v10419_v40 = vmul.f32 %v18501_v25, %v18501_v25  ;;  %v18513_v45 = vsub.f32 %v10349_v46, %v10403_v18  ;;  %v10420_v39 = vmul.f32 %v10410_v58, %v10410_v58 }
 0x950   : > { %v10424_v33 = vsel %vm10371_vm0, %v10414_v26, 0.0  ;;  %v10425_v28 = vsel %vm10371_vm0, %v10415_v56, 0.0  ;;  %v10427_v5 = vsel %vm10371_vm0, %v10416_v14, 0.0  ;;  %v10429_v55 = vsel %vm10371_vm0, %v10417_v29, 0.0  ;;  %v10367_v14 = vld [vmem:[%s19203_s4 + $0x18] sm:$0x7] }
 0x951   : > { %v10426_v27 = vadd.f32 %v10425_v28, %v10424_v33  ;;  %v10431_v43 = vsel %vm10371_vm0, %v10418_v31, 0.0  ;;  %v18516_v34 = vsub.f32 %v10350_v35, %v10403_v18  ;;  %v10421_v59 = vmul.f32 %v18508_v22, %v18508_v22  ;;  %v18529_v35 = vpop.f32.mrb[120].mxu0  ;;  %v10363_v29 = vld [vmem:[%s19203_s4 + $0x8] sm:$0x7]  ;;  %v10719_v31 = vld [vmem:[%s19201_s2 + $0x198] sm:$0xff] }
 0x952   : > { %v10433_v2 = vsel %vm10371_vm0, %v10419_v40, 0.0  ;;  %v10422_v9 = vmul.f32 %v18513_v45, %v18513_v45  ;;  %v10435_v37 = vsel %vm10371_vm0, %v10420_v39, 0.0  ;;  %v16106_v42 = vpop.f32.mrb[121].mxu0  ;;  %v10356_v40 = vld [vmem:[%s19202_s3 + $0x14] sm:$0x7]  ;;  %v10721_v39 = vld [vmem:[%s19201_s2 + $0x1a8] sm:$0xff] }
 0x953   : > { %v10428_v61 = vadd.f32 %v10427_v5, %v10426_v27  ;;  %v10423_v4 = vmul.f32 %v18516_v34, %v18516_v34  ;;  %v10437_v36 = vsel %vm10371_vm0, %v10421_v59, 0.0  ;;  %v10720_v5 = vld [vmem:[%s19201_s2 + $0x1a0] sm:$0xff] }
 0x954   : > { %v10439_v7 = vsel %vm10371_vm0, %v10422_v9, 0.0  ;;  %v10724_v9 = vld [vmem:[%s19201_s2 + $0x1c0] sm:$0xff] }
 0x955   : > { %v10430_v62 = vadd.f32 %v10429_v55, %v10428_v61  ;;  %v10441_v32 = vsel %vm10371_vm0, %v10423_v4, 0.0  ;;  %v18589_v61 = vpack.c.bf16 %v10720_v5, %v10719_v31 }
 0x957   : > { %v10432_v12 = vadd.f32 %v10431_v43, %v10430_v62  ;;  %16534 = vmatpush3.bf16.msra.mxu1 %v18589_v61  ;;  %16543 = vmatpush3.bf16.msra.mxu0 %v18589_v61  ;;  %v10365_v62 = vld [vmem:[%s19203_s4 + $0x10] sm:$0x7] }
 0x958   : > { %16535 = vmatprep.subr.bf16.mxu1 %v16761_v38  ;;  %v10722_v43 = vld [vmem:[%s19201_s2 + $0x1b0] sm:$0xff]  ;;  %16544 = vmatprep.subr.bf16.mxu0 %v16761_v38 }
 0x959   : > { %v10434_v24 = vadd.f32 %v10433_v2, %v10432_v12  ;;  %v10366_v2 = vld [vmem:[%s19203_s4 + $0x14] sm:$0x7] }
 0x95b   : > { %v10436_v63 = vadd.f32 %v10435_v37, %v10434_v24  ;;  %v10723_v24 = vld [vmem:[%s19201_s2 + $0x1b8] sm:$0xff] }
 0x95c   : > { %v18631_v37 = vpack.c.bf16 %v10724_v9, %v10723_v24 }
 0x95d   : > { %v10438_v10 = vadd.f32 %v10437_v36, %v10436_v63  ;;  %v10358_v36 = vld [vmem:[%s19202_s3 + $0x1c] sm:$0x7] }
 0x95f   : > { %v10440_v23 = vadd.f32 %v10439_v7, %v10438_v10 }
 0x961   : > { %v10442_v41 = vadd.f32 %v10441_v32, %v10440_v23  ;;  %v10368_v23 = vld [vmem:[%s19203_s4 + $0x1c] sm:$0x7]  ;;  %v10359_v32 = vld [vmem:[%s19202_s3 + $0x20] sm:$0x7] }
 0x963   : > { %10443 = vadd.xlane.f32.xlu1 %v10442_v41 }
 0x9f0   : > { %v10444_v21 = vpop.xlane.xlu1 %10443 }
 0x9f1   : > { %v10445_v8 = vrot.slane %v10444_v21, 4 }
 0x9f3   : > { %v10446_v46 = vadd.f32 %v10445_v8, %v10444_v21  ;;  %v10369_v21 = vld [vmem:[%s19203_s4 + $0x20] sm:$0x7] }
 0x9f5   : > { %v10447_v6 = vrot.slane %v10446_v46, 2 }
 0x9f7   : > { %v10448_v50 = vadd.f32 %v10447_v6, %v10446_v46  ;;  %v10360_v6 = vld [vmem:[%s19202_s3 + $0x24] sm:$0x7] }
 0x9f9   : > { %v10449_v48 = vrot.slane %v10448_v50, 1 }
 0x9fb   : > { %v10450_v17 = vadd.f32 %v10449_v48, %v10448_v50  ;;  %v10370_v48 = vld [vmem:[%s19203_s4 + $0x24] sm:$0x7] }
 0x9fd   : > { %16601 = vpush %v10450_v17  ;;  %v10570_v17 = vmax.f32 %v18529_v35, 0.0 }
 0xa2e   : > { %s16602_s29 = spop %16601 }
 0xa2f   : > { %s10454_s22 = smul.f32 0.004166667, %s16602_s29 }
 0xa31   : > { %s10455_s23 = sadd.f32 1e-05, %s10454_s22 }
 0xa33   : > { %v10456_v13 = vstv %s10455_s23 }
 0xa34   : > { %16704 = vrsqrt.f32 %v10456_v13 }
 0xa3e   : > { %v16705_v3 = vpop.eup %16704 }
 0xa3f   : > { %16603 = vpush %v16705_v3 }
 0xa70   : > { %s16604_s24 = spop %16603 }
 0xa71   : > { %v18531_v16 = vstv %s16604_s24 }
 0xa72   : > { %v10463_v53 = vmul.f32 %v18531_v16, %v10407_v15  ;;  %v10461_v54 = vmul.f32 %v18531_v16, %v10405_v30  ;;  %v10466_v51 = vmul.f32 %v18531_v16, %v10410_v58  ;;  %v10462_v57 = vmul.f32 %v18531_v16, %v18491_v0  ;;  %v10355_v58 = vld [vmem:[%s19202_s3 + $0x10] sm:$0x7] }
 0xa73   : > { %v10464_v27 = vmul.f32 %v18531_v16, %v18497_v20  ;;  %v10465_v55 = vmul.f32 %v18531_v16, %v18501_v25  ;;  %v18613_v25 = vpack.c.bf16 %v10722_v43, %v10721_v39  ;;  %v10467_v4 = vmul.f32 %v18531_v16, %v18508_v22  ;;  %v18647_v22 = vld [vmem:[%s19201_s2 + $0x1c8] sm:$0xff] }
 0xa74   : > { %v10473_v18 = vmul.f32 %v10463_v53, %v10354_v44  ;;  %v10471_v15 = vmul.f32 %v10461_v54, %v10352_v11  ;;  %v10476_v56 = vmul.f32 %v10466_v51, %v10357_v60  ;;  %v10472_v0 = vmul.f32 %v10462_v57, %v10353_v19  ;;  %v10351_v57 = vld [vmem:[%s19202_s3] sm:$0x7] }
 0xa75   : > { %v10474_v20 = vmul.f32 %v10464_v27, %v10355_v58  ;;  %v10475_v59 = vmul.f32 %v10465_v55, %v10356_v40  ;;  %16537 = vmatpush3.bf16.msra.mxu1 %v18613_v25  ;;  %16546 = vmatpush3.bf16.msra.mxu0 %v18613_v25  ;;  %v10477_v10 = vmul.f32 %v10467_v4, %v10358_v36 }
 0xa76   : > { %v18556_v30 = vadd.f32 %v10473_v18, %v10364_v47  ;;  %v18558_v26 = vadd.f32 %v10471_v15, %v10362_v52  ;;  %v18570_v33 = vadd.f32 %v10476_v56, %v10367_v14  ;;  %v18572_v28 = vadd.f32 %v10472_v0, %v10363_v29  ;;  %16538 = vmatprep.subr.bf16.mxu1 %v16761_v38  ;;  %v10361_v18 = vld [vmem:[%s19203_s4] sm:$0x7] }
 0xa77   : > { %v10484_v12 = vadd.f32 %v10474_v20, %v10365_v62  ;;  %16547 = vmatprep.subr.bf16.mxu0 %v16761_v38  ;;  %v10485_v63 = vadd.f32 %v10475_v59, %v10366_v2  ;;  %v10468_v7 = vmul.f32 %v18531_v16, %v18513_v45  ;;  %v18664_v45 = vadd.f32 %v10477_v10, %v10368_v23 }
 0xa78   : > { %10644 = vrot.lane.b32.xlu1 %v18556_v30, %s16751_s10  ;;  %10618 = vrot.lane.b32.xlu0 %v18558_v26, %s16748_s7  ;;  %v10469_v46 = vmul.f32 %v18531_v16, %v18516_v34  ;;  %v10571_v34 = vsel %vm1681_vm10, %v10570_v17, -inf  ;;  %v10460_v51 = vmul.f32 %v18531_v16, %v18487_v49 }
 0xa79   : > { %16540 = vmatpush3.bf16.msra.mxu1 %v18631_v37  ;;  %16549 = vmatpush3.bf16.msra.mxu0 %v18631_v37  ;;  %v10478_v41 = vmul.f32 %v10468_v7, %v10359_v32 }
 0xa7a   : > { %16119 = vmatprep.subr.mxu1 %v16744_v1  ;;  %16136 = vmatprep.subr.mxu0 %v16744_v1  ;;  %v10479_v50 = vmul.f32 %v10469_v46, %v10360_v6  ;;  %v10470_v60 = vmul.f32 %v10460_v51, %v10351_v57 }
 0xa7b   : > { %v18672_v8 = vadd.f32 %v10478_v41, %v10369_v21 }
 0xa7c   : > { %10683 = vrot.lane.b32.xlu1 %v18570_v33, %s16757_s16  ;;  %10620 = vrot.lane.b32.xlu0 %v18572_v28, %s16748_s7  ;;  %v18698_v13 = vadd.f32 %v10479_v50, %v10370_v48  ;;  %v10480_v56 = vadd.f32 %v10470_v60, %v10361_v18 }
 0xa7d   : > { %16120 = vmatpush3.msra.mxu1 %v18647_v22  ;;  %16137 = vmatpush3.msra.mxu0 %v18647_v22 }
 0xa7e   : > { %16550 = vmatprep.subr.bf16.mxu1 %v16761_v38  ;;  %16559 = vmatprep.subr.bf16.mxu0 %v16761_v38 }
 0xa80   : > { %10622 = vrot.lane.b32.xlu1 %v18556_v30, %s16748_s7  ;;  %10631 = vrot.lane.b32.xlu0 %v18572_v28, %s16749_s8 }
 0xa84   : > { %10635 = vrot.lane.b32.xlu1 %v10484_v12, %s16749_s8  ;;  %10633 = vrot.lane.b32.xlu0 %v18556_v30, %s16749_s8 }
 0xa88   : > { %10648 = vrot.lane.b32.xlu1 %v10485_v63, %s16751_s10  ;;  %10646 = vrot.lane.b32.xlu0 %v10484_v12, %s16751_s10 }
 0xa8c   : > { %10661 = vrot.lane.b32.xlu1 %v18570_v33, %s16753_s12  ;;  %10657 = vrot.lane.b32.xlu0 %v10484_v12, %s16753_s12 }
 0xa90   : > { %10674 = vrot.lane.b32.xlu1 %v18664_v45, %s16755_s14  ;;  %10659 = vrot.lane.b32.xlu0 %v10485_v63, %s16753_s12 }
 0xa94   : > { %10687 = vrot.lane.b32.xlu1 %v18672_v8, %s16757_s16  ;;  %10670 = vrot.lane.b32.xlu0 %v10485_v63, %s16755_s14 }
 0xa98   : > { %10672 = vrot.lane.b32.xlu0 %v18570_v33, %s16755_s14 }
 0xa9c   : > { %10685 = vrot.lane.b32.xlu0 %v18664_v45, %s16757_s16 }
 0xaa0   : > { %10624 = vrot.lane.b32.xlu0 %v10484_v12, %s16748_s7 }
 0xaa4   : > { %10637 = vrot.lane.b32.xlu0 %v10485_v63, %s16749_s8 }
 0xaa8   : > { %10650 = vrot.lane.b32.xlu0 %v18570_v33, %s16751_s10 }
 0xaac   : > { %10663 = vrot.lane.b32.xlu0 %v18664_v45, %s16753_s12 }
 0xab0   : > { %10676 = vrot.lane.b32.xlu0 %v18672_v8, %s16755_s14 }
 0xab4   : > { %10689 = vrot.lane.b32.xlu0 %v18698_v13, %s16757_s16 }
 0xab8   : > { %10572 = vmax.xlane.f32.xlu1 %v10571_v34 }
 0xaea   : > { %v10645_v42 = vpop.permute.xlu1 %10644  ;;  %v10619_v3 = vpop.permute.xlu0 %10618 }
 0xaeb   : > { %v10695_v0 = vsel %vm1484_vm5, %v10480_v56, %v10619_v3 }
 0xaee   : > { %v10621_v44 = vpop.permute.xlu0 %10620  ;;  %v10684_v11 = vpop.permute.xlu1 %10683 }
 0xaef   : > { %v10696_v40 = vsel %vm1484_vm5, %v18558_v26, %v10621_v44  ;;  %v14752_v44 = vld [vmem:[%s19201_s2 + $0x1d0] ss:$0 sm:$0xff] }
 0xaf2   : > { %v10632_v47 = vpop.permute.xlu0 %10631  ;;  %v10623_v53 = vpop.permute.xlu1 %10622 }
 0xaf3   : > { %v10699_v29 = vsel %vm1488_vm7, %v10695_v0, %v10632_v47  ;;  %v10697_v24 = vsel %vm1484_vm5, %v18572_v28, %v10623_v53 }
 0xaf4   : > { %v10703_v49 = vsel %vm1492_vm9, %v10699_v29, %v10645_v42 }
 0xaf6   : > { %v10634_v54 = vpop.permute.xlu0 %10633  ;;  %v10636_v19 = vpop.permute.xlu1 %10635 }
 0xaf7   : > { %v10700_v62 = vsel %vm1488_vm7, %v10696_v40, %v10634_v54  ;;  %v10701_v9 = vsel %vm1488_vm7, %v10697_v24, %v10636_v19  ;;  %v11089_v24 = vld [vmem:[%s19201_s2 + $0x1f0] sm:$0xff] }
 0xafa   : > { %v10647_v52 = vpop.permute.xlu0 %10646  ;;  %v10649_v14 = vpop.permute.xlu1 %10648 }
 0xafb   : > { %v10704_v39 = vsel %vm1492_vm9, %v10700_v62, %v10647_v52  ;;  %v10705_v4 = vsel %vm1492_vm9, %v10701_v9, %v10649_v14 }
 0xafe   : > { %v10658_v15 = vpop.permute.xlu0 %10657  ;;  %v10662_v31 = vpop.permute.xlu1 %10661 }
 0xaff   : > { %v10707_v16 = vsel %vm1496_vm11, %v10703_v49, %v10658_v15  ;;  %v10709_v10 = vsel %vm1496_vm11, %v10705_v4, %v10662_v31 }
 0xb02   : > { %v10660_v27 = vpop.permute.xlu0 %10659  ;;  %v10675_v43 = vpop.permute.xlu1 %10674 }
 0xb03   : > { %v10708_v12 = vsel %vm1496_vm11, %v10704_v39, %v10660_v27  ;;  %v10713_v28 = vsel %vm1500_vm13, %v10709_v10, %v10675_v43 }
 0xb06   : > { %v10671_v58 = vpop.permute.xlu0 %10670  ;;  %v10688_v36 = vpop.permute.xlu1 %10687 }
 0xb07   : > { %v10711_v5 = vsel %vm1500_vm13, %v10707_v16, %v10671_v58 }
 0xb08   : > { %v10715_v20 = vsel %vm1504_vm15, %v10711_v5, %v10684_v11 }
 0xb09   : > { %16122 = vmatmul.mubr.msk.f32.vlgmr.msra.gmra.mrb[136].mxu1 %vm1508_vm2, %v10715_v20 }
 0xb0a   : > { %16552 = vmatpush3.bf16.msra.mxu1 %v18589_v61  ;;  %v10673_v55 = vpop.permute.xlu0 %10672  ;;  %16155 = vmatprep.mubr.msk.f32.mxu1 %vm16745_vm1, %v16744_v1 }
 0xb0b   : > { %16553 = vmatprep.subr.bf16.mxu1 %v16761_v38  ;;  %v10712_v59 = vsel %vm1500_vm13, %v10708_v12, %v10673_v55  ;;  %v11086_v12 = vld [vmem:[%s19201_s2 + $0x1d8] sm:$0xff] }
 0xb0e   : > { %16555 = vmatpush3.bf16.msra.mxu1 %v18613_v25  ;;  %v10686_v26 = vpop.permute.xlu0 %10685 }
 0xb0f   : > { %v10716_v2 = vsel %vm1504_vm15, %v10712_v59, %v10686_v26  ;;  %16556 = vmatprep.subr.bf16.mxu1 %v16761_v38  ;;  %v11087_v59 = vld [vmem:[%s19201_s2 + $0x1e0] sm:$0xff]  ;;  %v11088_v26 = vld [vmem:[%s19201_s2 + $0x1e8] sm:$0xff] }
 0xb10   : > { %16139 = vmatmul.mubr.msk.f32.vlgmr.msra.gmra.mrb[122].mxu0 %vm1508_vm2, %v10716_v2  ;;  %v16569_v2 = vpack.c.bf16 %v11087_v59, %v11086_v12  ;;  %v16572_v4 = vpack.c.bf16 %v11089_v24, %v11088_v26 }
 0xb11   : > { %16561 = vmatpush3.bf16.msra.mxu0 %v18589_v61  ;;  %16172 = vmatprep.mubr.msk.f32.mxu0 %vm16745_vm1, %v16744_v1  ;;  %v10717_v61 = vsel %vm1504_vm15, %v10713_v28, %v10688_v36 }
 0xb12   : > { %16558 = vmatpush3.bf16.msra.mxu1 %v18631_v37  ;;  %v10625_v63 = vpop.permute.xlu0 %10624  ;;  %16562 = vmatprep.subr.bf16.mxu0 %v16761_v38 }
 0xb13   : > { %16153 = vmatprep.subr.mxu1 %v16744_v1  ;;  %v10698_v32 = vsel %vm1484_vm5, %v18556_v30, %v10625_v63 }
 0xb15   : > { %16564 = vmatpush3.bf16.msra.mxu0 %v18613_v25 }
 0xb16   : > { %16154 = vmatpush3.msra.mxu1 %v18647_v22  ;;  %v10638_v7 = vpop.permute.xlu0 %10637  ;;  %16565 = vmatprep.subr.bf16.mxu0 %v16761_v38 }
 0xb17   : > { %16156 = vmatmul.mubr.msk.f32.vlgmr.msra.gmra.mrb[138].mxu1 %vm1508_vm2, %v10717_v61  ;;  %16186 = vmatprep.subr.mxu1 %v16744_v1  ;;  %v10702_v21 = vsel %vm1488_vm7, %v10698_v32, %v10638_v7 }
 0xb18   : > { %16188 = vmatprep.mubr.msk.f32.mxu1 %vm16745_vm1, %v16744_v1 }
 0xb19   : > { %16567 = vmatpush3.bf16.msra.mxu0 %v18631_v37 }
 0xb1a   : > { %v10651_v23 = vpop.permute.xlu0 %10650  ;;  %16170 = vmatprep.subr.mxu0 %v16744_v1 }
 0xb1b   : > { %v10706_v46 = vsel %vm1492_vm9, %v10702_v21, %v10651_v23 }
 0xb1d   : > { %16171 = vmatpush3.msra.mxu0 %v18647_v22 }
 0xb1e   : > { %v10664_v25 = vpop.permute.xlu0 %10663  ;;  %16568 = vmatprep.subr.bf16.mxu0 %v16761_v38 }
 0xb1f   : > { %v10710_v6 = vsel %vm1496_vm11, %v10706_v46, %v10664_v25 }
 0xb22   : > { %v10677_v41 = vpop.permute.xlu0 %10676 }
 0xb23   : > { %v10714_v37 = vsel %vm1500_vm13, %v10710_v6, %v10677_v41 }
 0xb26   : > { %v10690_v50 = vpop.permute.xlu0 %10689 }
 0xb27   : > { %v10718_v48 = vsel %vm1504_vm15, %v10714_v37, %v10690_v50 }
 0xb28   : > { %16173 = vmatmul.mubr.msk.f32.vlgmr.msra.gmra.mrb[124].mxu0 %vm1508_vm2, %v10718_v48 }
 0xb29   : > { %16183 = vmatprep.mubr.msk.f32.mxu0 %vm16745_vm1, %v16744_v1  ;;  %16570 = vmatpush3.bf16.msra.mxu0 %v16569_v2 }
 0xb2a   : > { %16571 = vmatprep.subr.bf16.mxu0 %v16761_v38 }
 0xb2d   : > { %16573 = vmatpush3.bf16.msra.mxu0 %v16572_v4 }
 0xb2e   : > { %16201 = vmatprep.subr.mxu0 %v16744_v1 }
 0xb45   : > { %v10573_v22 = vpop.xlane.xlu1 %10572 }
 0xb46   : > { %v10574_v30 = vsub.f32 %v10570_v17, %v10573_v22 }
 0xb48   : > { %v10575_v34 = vmul.f32 1.442695, %v10574_v30 }
 0xb4a   : > { %16706 = vpow2.f32 %v10575_v34 }
 0xb54   : > { %v18770_v42 = vpop.eup %16706 }
 0xb55   : > { %v10577_v3 = vsel %vm1681_vm10, %v18770_v42, 0.0 }
 0xb56   : > { %10578 = vadd.xlane.f32.xlu0 %v10577_v3  ;;  %v11170_v3 = vld [vmem:[%s19201_s2 + $0x208] sm:$0xff] }
 0xbdc   : > { %v10800_v11 = vpop.f32.mrb[136].mxu1 }
 0xbdd   : > { %v16123_v47 = vpop.f32.mrb[137].mxu1  ;;  %v10801_v53 = vadd.f32 %v14752_v44, %v10800_v11 }
 0xbdf   : > { %v14757_v54 = vmul.f32 -1.442695, %v10801_v53 }
 0xbe1   : > { %16708 = vpow2.f32 %v14757_v54 }
 0xbe3   : > { %v10873_v51 = vpop.f32.mrb[122].mxu0  ;;  %v10579_v43 = vpop.xlane.xlu0 %10578 }
 0xbe4   : > { %v10874_v57 = vadd.f32 %v14752_v44, %v10873_v51  ;;  %v16140_v35 = vpop.f32.mrb[123].mxu0 }
 0xbe6   : > { %v14758_v17 = vmul.f32 -1.442695, %v10874_v57 }
 0xbe8   : > { %16710 = vpow2.f32 %v14758_v17 }
 0xbea   : > { %v10946_v52 = vpop.f32.mrb[138].mxu1 }
 0xbeb   : > { %v10947_v60 = vadd.f32 %v14752_v44, %v10946_v52  ;;  %v16157_v19 = vpop.f32.mrb[139].mxu1  ;;  %v16709_v15 = vpop.eup %16708 }
 0xbec   : > { %v11039_v14 = vadd.f32 1.0, %v16709_v15 }
 0xbed   : > { %v14759_v18 = vmul.f32 -1.442695, %v10947_v60 }
 0xbef   : > { %16712 = vpow2.f32 %v14759_v18 }
 0xbf2   : > { %v16711_v56 = vpop.eup %16710 }
 0xbf3   : > { %v11040_v0 = vadd.f32 1.0, %v16711_v56 }
 0xbf5   : > { %16714 = vrcp.f32 %v11040_v0 }
 0xbf6   : > { %16716 = vrcp.f32 %v11039_v14 }
 0xbf9   : > { %v16713_v29 = vpop.eup %16712 }
 0xbfa   : > { %v11041_v27 = vadd.f32 1.0, %v16713_v29 }
 0xbfb   : > { %v11019_v49 = vpop.f32.mrb[124].mxu0 }
 0xbfc   : > { %16718 = vrcp.f32 %v11041_v27  ;;  %v11020_v16 = vadd.f32 %v14752_v44, %v11019_v49  ;;  %v16174_v58 = vpop.f32.mrb[125].mxu0 }
 0xbfd   : > { %v11171_v58 = vld [vmem:[%s19201_s2 + $0x210] sm:$0xff] }
 0xbfe   : > { %v14760_v31 = vmul.f32 -1.442695, %v11020_v16 }
 0xbff   : > { %v16715_v5 = vpop.eup %16714 }
 0xc00   : > { %16720 = vpow2.f32 %v14760_v31  ;;  %11057 = vrot.lane.b32.xlu0 %v16715_v5, %s16762_s26  ;;  %v16717_v20 = vpop.eup %16716 }
 0xc04   : > { %11055 = vrot.lane.b32.xlu0 %v16717_v20, %s16762_s26 }
 0xc06   : > { %v16719_v40 = vpop.eup %16718 }
 0xc07   : > { %11059 = vrot.lane.b32.xlu1 %v16719_v40, %s16762_s26 }
 0xc0a   : > { %v16721_v55 = vpop.eup %16720 }
 0xc0b   : > { %v11042_v62 = vadd.f32 1.0, %v16721_v55 }
 0xc0d   : > { %16722 = vrcp.f32 %v11042_v62 }
 0xc0e   : > { %16724 = vtanh.f32 %v10874_v57 }
 0xc0f   : > { %16726 = vtanh.f32 %v10801_v53 }
 0xc10   : > { %16728 = vtanh.f32 %v10947_v60 }
 0xc11   : > { %16730 = vtanh.f32 %v11020_v16  ;;  %v11169_v16 = vld [vmem:[%s19201_s2 + $0x200] sm:$0xff] }
 0xc12   : > { %16732 = vrcp.f32 %v10579_v43 }
 0xc17   : > { %v16723_v39 = vpop.eup %16722 }
 0xc18   : > { %11061 = vrot.lane.b32.xlu1 %v16723_v39, %s16762_s26  ;;  %v16725_v9 = vpop.eup %16724 }
 0xc19   : > { %v16727_v10 = vpop.eup %16726 }
 0xc1a   : > { %v16729_v7 = vpop.eup %16728 }
 0xc1b   : > { %v16731_v32 = vpop.eup %16730 }
 0xc1c   : > { %v16733_v46 = vpop.eup %16732 }
 0xc1d   : > { %v18813_v6 = vmul.f32 %v16733_v46, %v18770_v42 }
 0xc72   : > { %v11058_v63 = vpop.permute.xlu0 %11057 }
 0xc73   : > { %v18793_v36 = vmul.f32 %v16725_v9, %v11058_v63 }
 0xc75   : > { %11072 = vrot.lane.b32.xlu1 %v18793_v36, %s16748_s7  ;;  %v18860_v17 = vmul.f32 0.05, %v18793_v36 }
 0xc76   : > { %v11056_v28 = vpop.permute.xlu0 %11055 }
 0xc77   : > { %v18798_v61 = vmul.f32 %v16727_v10, %v11056_v28 }
 0xc79   : > { %v11060_v23 = vpop.permute.xlu1 %11059  ;;  %16187 = vmatpush3.msk.msra.mxu1 %vm1606_vm3, %v18798_v61  ;;  %v18856_v47 = vmul.f32 0.05, %v18798_v61 }
 0xc7a   : > { %v18803_v25 = vmul.f32 %v16729_v7, %v11060_v23  ;;  %16191 = vmatprep.subr.mxu1 %v16744_v1 }
 0xc7c   : > { %11076 = vrot.lane.b32.xlu0 %v18803_v25, %s16749_s8  ;;  %v18868_v15 = vmul.f32 0.05, %v18803_v25 }
 0xc8a   : > { %v11062_v41 = vpop.permute.xlu1 %11061 }
 0xc8b   : > { %v18808_v21 = vmul.f32 %v16731_v32, %v11062_v41 }
 0xc8d   : > { %11080 = vrot.lane.b32.xlu1 %v18808_v21, %s16751_s10  ;;  %v18871_v0 = vmul.f32 0.05, %v18808_v21 }
 0xc9a   : > { %10582 = vxpose.xlu0.b32.start.end [1/1] (short) (narrow) %v18813_v6, 8 }
 0xce7   : > { %v11073_v37 = vpop.permute.xlu1 %11072 }
 0xce8   : > { %v11083_v48 = vsel %vm1484_vm5, %v18798_v61, %v11073_v37 }
 0xcee   : > { %v11077_v50 = vpop.permute.xlu0 %11076 }
 0xcef   : > { %v11084_v22 = vsel %vm1488_vm7, %v11083_v48, %v11077_v50 }
 0xcff   : > { %v11081_v30 = vpop.permute.xlu1 %11080 }
 0xd00   : > { %v11085_v34 = vsel %vm1492_vm9, %v11084_v22, %v11081_v30 }
 0xd01   : > { %16184 = vmatmul.mubr.msk.f32.vlgmr.msra.gmra.mrb[16].mxu0 %vm1496_vm11, %v11085_v34 }
 0xd02   : > { %16202 = vmatpush3.msk.msra.mxu0 %vm1606_vm3, %v18808_v21  ;;  %16203 = vmatprep.mubr.msk.f32.mxu0 %vm16745_vm1, %v16744_v1 }
 0xd03   : > { %16211 = vmatprep.subr.mxu0 %v16744_v1 }
 0xd1a   : > { %v18826_v42 = vpop.trf.xlu0 }
 0xd1b   : > { %16189 = vmatmul.mubr.msk.f32.vlgmr.msra.gmra.mrb[140].mxu1 %vm1602_vm4, %v18826_v42  ;;  %16204 = vmatmul.mubr.msk.f32.vlgmr.msra.gmra.mrb[126].mxu0 %vm1602_vm4, %v18826_v42 }
 0xd1c   : > { %16192 = vmatpush3.msk.msra.mxu1 %vm1606_vm3, %v18793_v36  ;;  %16193 = vmatprep.mubr.msk.f32.mxu1 %vm16745_vm1, %v16744_v1 }
 0xd1d   : > { %16196 = vmatprep.subr.mxu1 %v16744_v1  ;;  %16213 = vmatprep.mubr.msk.f32.mxu0 %vm16745_vm1, %v16744_v1 }
 0xd1e   : > { %16212 = vmatpush3.msra.mxu0 %v11170_v3 }
 0xd1f   : > { %16194 = vmatmul.mubr.msk.f32.vlgmr.msra.gmra.mrb[142].mxu1 %vm1602_vm4, %v18826_v42  ;;  %16221 = vmatprep.subr.mxu0 %v16744_v1 }
 0xd20   : > { %16197 = vmatpush3.msk.msra.mxu1 %vm1606_vm3, %v18803_v25  ;;  %16198 = vmatprep.mubr.msk.f32.mxu1 %vm16745_vm1, %v16744_v1 }
 0xd21   : > { %16206 = vmatprep.subr.mxu1 %v16744_v1 }
 0xd23   : > { %16199 = vmatmul.mubr.msk.f32.vlgmr.msra.gmra.mrb[144].mxu1 %vm1602_vm4, %v18826_v42 }
 0xd24   : > { %16208 = vmatprep.mubr.msk.f32.mxu1 %vm16745_vm1, %v16744_v1  ;;  %16207 = vmatpush3.msra.mxu1 %v11170_v3 }
 0xd25   : > { %16216 = vmatprep.subr.mxu1 %v16744_v1 }
 0xdee   : > { %v11248_v44 = vpop.f32.mrb[140].mxu1  ;;  %v11464_v11 = vpop.f32.mrb[126].mxu0 }
 0xdef   : > { %v11468_v53 = vmul.f32 0.95, %v11248_v44  ;;  %v16190_v54 = vpop.f32.mrb[141].mxu1  ;;  %v16205_v51 = vpop.f32.mrb[127].mxu0  ;;  %v11471_v19 = vmul.f32 0.95, %v11464_v11 }
 0xdf1   : > { %v11472_v57 = vadd.f32 %v11468_v53, %v18856_v47  ;;  %v11475_v27 = vadd.f32 %v11471_v19, %v18871_v0 }
 0xdf2   : > { %v11320_v35 = vpop.f32.mrb[142].mxu1 }
 0xdf3   : > { %v11469_v52 = vmul.f32 0.95, %v11320_v35  ;;  %v16195_v60 = vpop.f32.mrb[143].mxu1  ;;  %16209 = vmatmul.mubr.msk.f32.vlgmr.msra.gmra.mrb[146].mxu1 %vm1484_vm5, %v11472_v57 }
 0xdf4   : > { %16217 = vmatpush3.msra.mxu1 %v11170_v3  ;;  %16218 = vmatprep.mubr.msk.f32.mxu1 %vm16745_vm1, %v16744_v1 }
 0xdf5   : > { %v11473_v18 = vadd.f32 %v11469_v52, %v18860_v17  ;;  %16226 = vmatprep.subr.mxu1 %v16744_v1 }
 0xdf6   : > { %v11392_v56 = vpop.f32.mrb[144].mxu1 }
 0xdf7   : > { %v11470_v14 = vmul.f32 0.95, %v11392_v56  ;;  %v16200_v29 = vpop.f32.mrb[145].mxu1  ;;  %16214 = vmatmul.mubr.msk.f32.vlgmr.msra.gmra.mrb[128].mxu0 %vm1484_vm5, %v11473_v18 }
 0xdf8   : > { %16222 = vmatpush3.msra.mxu0 %v11170_v3  ;;  %16223 = vmatprep.mubr.msk.f32.mxu0 %vm16745_vm1, %v16744_v1 }
 0xdf9   : > { %v11474_v49 = vadd.f32 %v11470_v14, %v18868_v15  ;;  %16231 = vmatprep.subr.mxu0 %v16744_v1 }
 0xdfb   : > { %16219 = vmatmul.mubr.msk.f32.vlgmr.msra.gmra.mrb[148].mxu1 %vm1484_vm5, %v11474_v49  ;;  %16224 = vmatmul.mubr.msk.f32.vlgmr.msra.gmra.mrb[130].mxu0 %vm1484_vm5, %v11475_v27 }
 0xdfc   : > { %16227 = vmatpush3.msra.mxu1 %v11169_v16  ;;  %16232 = vmatpush3.msra.mxu0 %v11169_v16 }
 0xdfd   : > { %16228 = vmatprep.mubr.msk.f32.mxu1 %vm16745_vm1, %v16744_v1  ;;  %16233 = vmatprep.mubr.msk.f32.mxu0 %vm16745_vm1, %v16744_v1 }
 0xdfe   : > { %16236 = vmatprep.subr.mxu1 %v16744_v1  ;;  %16241 = vmatprep.subr.mxu0 %v16744_v1 }
 0xdff   : > { %16229 = vmatmul.mubr.msk.f32.vlgmr.msra.gmra.mrb[150].mxu1 %vm1484_vm5, %v18798_v61  ;;  %16234 = vmatmul.mubr.msk.f32.vlgmr.msra.gmra.mrb[132].mxu0 %vm1484_vm5, %v18793_v36 }
 0xe00   : > { %16237 = vmatpush3.msra.mxu1 %v11169_v16  ;;  %16242 = vmatpush3.msra.mxu0 %v11169_v16 }
 0xe01   : > { %16238 = vmatprep.mubr.msk.f32.mxu1 %vm16745_vm1, %v16744_v1  ;;  %16243 = vmatprep.mubr.msk.f32.mxu0 %vm16745_vm1, %v16744_v1 }
 0xe02   : > { %16246 = vmatprep.subr.mxu1 %v16744_v1  ;;  %16251 = vmatprep.subr.mxu0 %v16744_v1 }
 0xe03   : > { %16239 = vmatmul.mubr.msk.f32.vlgmr.msra.gmra.mrb[152].mxu1 %vm1484_vm5, %v18803_v25  ;;  %16244 = vmatmul.mubr.msk.f32.vlgmr.msra.gmra.mrb[134].mxu0 %vm1484_vm5, %v18808_v21 }
 0xe04   : > { %16247 = vmatpush3.msk.msra.mxu1 %vm1606_vm3, %v11472_v57  ;;  %16252 = vmatpush3.msk.msra.mxu0 %vm1606_vm3, %v11473_v18  ;;  %v12658_v57 = vld [vmem:[%s19201_s2 + $0x228] sm:$0xff] }
 0xe05   : > { %16248 = vmatprep.mubr.msk.f32.mxu1 %vm16745_vm1, %v16744_v1  ;;  %16253 = vmatprep.mubr.msk.f32.mxu0 %vm16745_vm1, %v16744_v1 }
 0xe06   : > { %16256 = vmatprep.subr.mxu1 %v16744_v1  ;;  %16261 = vmatprep.subr.mxu0 %v16744_v1 }
 0xe07   : > { %16249 = vmatmul.mubr.msk.f32.vlgmr.msra.gmra.mrb[154].mxu1 %vm1602_vm4, %v18826_v42  ;;  %16254 = vmatmul.mubr.msk.f32.vlgmr.msra.gmra.mrb[136].mxu0 %vm1602_vm4, %v18826_v42 }
 0xe08   : > { %16257 = vmatpush3.msk.msra.mxu1 %vm1606_vm3, %v11474_v49  ;;  %16262 = vmatpush3.msk.msra.mxu0 %vm1606_vm3, %v11475_v27 }
 0xe09   : > { %16258 = vmatprep.mubr.msk.f32.mxu1 %vm16745_vm1, %v16744_v1  ;;  %16263 = vmatprep.mubr.msk.f32.mxu0 %vm16745_vm1, %v16744_v1 }
 0xe0a   : > { %16266 = vmatprep.subr.mxu1 %v16744_v1  ;;  %16271 = vmatprep.subr.mxu0 %v16744_v1 }
 0xe0b   : > { %16259 = vmatmul.mubr.msk.f32.vlgmr.msra.gmra.mrb[156].mxu1 %vm1602_vm4, %v18826_v42  ;;  %16264 = vmatmul.mubr.msk.f32.vlgmr.msra.gmra.mrb[138].mxu0 %vm1602_vm4, %v18826_v42 }
 0xe0c   : > { %16268 = vmatprep.mubr.msk.f32.mxu1 %vm16745_vm1, %v16744_v1  ;;  %16273 = vmatprep.mubr.msk.f32.mxu0 %vm16745_vm1, %v16744_v1 }
 0xe0d   : > { %16267 = vmatpush3.msra.mxu1 %v11171_v58  ;;  %16272 = vmatpush3.msra.mxu0 %v11171_v58 }
 0xe0e   : > { %16276 = vmatprep.subr.mxu1 %v16744_v1  ;;  %16281 = vmatprep.subr.mxu0 %v16744_v1 }
 0xec6   : > { %v11545_v31 = vpop.f32.mrb[146].mxu1 }
 0xec7   : > { %v16210_v5 = vpop.f32.mrb[147].mxu1 }
 0xeca   : > { %v11618_v20 = vpop.f32.mrb[128].mxu0 }
 0xecb   : > { %v16215_v40 = vpop.f32.mrb[129].mxu0 }
 0xece   : > { %v11691_v55 = vpop.f32.mrb[148].mxu1  ;;  %v11764_v62 = vpop.f32.mrb[130].mxu0 }
 0xecf   : > { %v16220_v39 = vpop.f32.mrb[149].mxu1  ;;  %v16225_v43 = vpop.f32.mrb[131].mxu0 }
 0xed2   : > { %v11836_v12 = vpop.f32.mrb[150].mxu1  ;;  %v11908_v59 = vpop.f32.mrb[132].mxu0 }
 0xed3   : > { %v11837_v26 = vadd.f32 %v11836_v12, %v11545_v31  ;;  %v11909_v2 = vadd.f32 %v11908_v59, %v11618_v20  ;;  %v16230_v24 = vpop.f32.mrb[151].mxu1  ;;  %v16235_v9 = vpop.f32.mrb[133].mxu0 }
 0xed6   : > { %v11980_v63 = vpop.f32.mrb[152].mxu1  ;;  %v12052_v4 = vpop.f32.mrb[134].mxu0 }
 0xed7   : > { %v11981_v10 = vadd.f32 %v11980_v63, %v11691_v55  ;;  %v12053_v28 = vadd.f32 %v12052_v4, %v11764_v62  ;;  %v16240_v7 = vpop.f32.mrb[153].mxu1  ;;  %v16245_v23 = vpop.f32.mrb[135].mxu0 }
 0xeda   : > { %v12124_v32 = vpop.f32.mrb[154].mxu1  ;;  %v12196_v41 = vpop.f32.mrb[136].mxu0 }
 0xedb   : > { %v12344_v46 = vmul.f32 0.95, %v12124_v32  ;;  %v12345_v37 = vmul.f32 0.95, %v12196_v41  ;;  %v16250_v50 = vpop.f32.mrb[155].mxu1  ;;  %v16255_v48 = vpop.f32.mrb[137].mxu0 }
 0xedd   : > { %v12348_v22 = vadd.f32 %v12344_v46, %v18856_v47  ;;  %v12349_v30 = vadd.f32 %v12345_v37, %v18860_v17 }
 0xede   : > { %v12268_v34 = vpop.f32.mrb[156].mxu1  ;;  %v12340_v42 = vpop.f32.mrb[138].mxu0 }
 0xedf   : > { %v12346_v3 = vmul.f32 0.95, %v12268_v34  ;;  %v12347_v44 = vmul.f32 0.95, %v12340_v42  ;;  %v16260_v11 = vpop.f32.mrb[157].mxu1  ;;  %v16265_v53 = vpop.f32.mrb[139].mxu0  ;;  %16269 = vmatmul.mubr.msk.f32.vlgmr.msra.gmra.mrb[158].mxu1 %vm1484_vm5, %v12348_v22  ;;  %16274 = vmatmul.mubr.msk.f32.vlgmr.msra.gmra.mrb[140].mxu0 %vm1484_vm5, %v12349_v30 }
 0xee0   : > { %16277 = vmatpush3.msra.mxu1 %v11171_v58  ;;  %16282 = vmatpush3.msra.mxu0 %v11171_v58 }
 0xee1   : > { %v12350_v54 = vadd.f32 %v12346_v3, %v18868_v15  ;;  %v12351_v51 = vadd.f32 %v12347_v44, %v18871_v0  ;;  %16278 = vmatprep.mubr.msk.f32.mxu1 %vm16745_vm1, %v16744_v1  ;;  %16283 = vmatprep.mubr.msk.f32.mxu0 %vm16745_vm1, %v16744_v1 }
 0xee2   : > { %16286 = vmatprep.subr.mxu1 %v16744_v1  ;;  %16291 = vmatprep.subr.mxu0 %v16744_v1 }
 0xee3   : > { %16279 = vmatmul.mubr.msk.f32.vlgmr.msra.gmra.mrb[160].mxu1 %vm1484_vm5, %v12350_v54  ;;  %16284 = vmatmul.mubr.msk.f32.vlgmr.msra.gmra.mrb[142].mxu0 %vm1484_vm5, %v12351_v51 }
 0xee4   : > { %16287 = vmatpush3.msk.msra.mxu1 %vm1606_vm3, %v18798_v61  ;;  %16292 = vmatpush3.msk.msra.mxu0 %vm1606_vm3, %v18793_v36 }
 0xee5   : > { %16288 = vmatprep.mubr.msk.f32.mxu1 %vm16745_vm1, %v16744_v1  ;;  %16293 = vmatprep.mubr.msk.f32.mxu0 %vm16745_vm1, %v16744_v1 }
 0xee6   : > { %16296 = vmatprep.subr.mxu1 %v16744_v1  ;;  %16301 = vmatprep.subr.mxu0 %v16744_v1 }
 0xee7   : > { %16289 = vmatmul.mubr.msk.f32.vlgmr.msra.gmra.mrb[162].mxu1 %vm1602_vm4, %v18813_v6  ;;  %16294 = vmatmul.mubr.msk.f32.vlgmr.msra.gmra.mrb[144].mxu0 %vm1602_vm4, %v18813_v6 }
 0xee8   : > { %16297 = vmatpush3.msk.msra.mxu1 %vm1606_vm3, %v18803_v25  ;;  %16302 = vmatpush3.msk.msra.mxu0 %vm1606_vm3, %v18808_v21 }
 0xee9   : > { %16298 = vmatprep.mubr.msk.f32.mxu1 %vm16745_vm1, %v16744_v1  ;;  %16303 = vmatprep.mubr.msk.f32.mxu0 %vm16745_vm1, %v16744_v1 }
 0xeea   : > { %16306 = vmatprep.subr.mxu1 %v16744_v1  ;;  %16311 = vmatprep.subr.mxu0 %v16744_v1 }
 0xeeb   : > { %16299 = vmatmul.mubr.msk.f32.vlgmr.msra.gmra.mrb[164].mxu1 %vm1602_vm4, %v18813_v6  ;;  %16304 = vmatmul.mubr.msk.f32.vlgmr.msra.gmra.mrb[146].mxu0 %vm1602_vm4, %v18813_v6 }
 0xeec   : > { %16308 = vmatprep.mubr.msk.f32.mxu1 %vm16745_vm1, %v16744_v1  ;;  %16313 = vmatprep.mubr.msk.f32.mxu0 %vm16745_vm1, %v16744_v1 }
 0xeed   : > { %16307 = vmatpush3.msra.mxu1 %v12658_v57  ;;  %16312 = vmatpush3.msra.mxu0 %v12658_v57 }
 0xeee   : > { %16316 = vmatprep.subr.mxu1 %v16744_v1  ;;  %16321 = vmatprep.subr.mxu0 %v16744_v1 }
 0xfb2   : > { %v12421_v35 = vpop.f32.mrb[158].mxu1  ;;  %v12494_v52 = vpop.f32.mrb[140].mxu0 }
 0xfb3   : > { %v18988_v60 = vadd.f32 %v12421_v35, %v11837_v26  ;;  %v18990_v19 = vadd.f32 %v12494_v52, %v11909_v2  ;;  %v16270_v18 = vpop.f32.mrb[159].mxu1  ;;  %v16275_v56 = vpop.f32.mrb[141].mxu0 }
 0xfb6   : > { %v12567_v14 = vpop.f32.mrb[160].mxu1  ;;  %v12640_v29 = vpop.f32.mrb[142].mxu0 }
 0xfb7   : > { %v18992_v27 = vadd.f32 %v12567_v14, %v11981_v10  ;;  %v18994_v49 = vadd.f32 %v12640_v29, %v12053_v28  ;;  %v16280_v16 = vpop.f32.mrb[161].mxu1  ;;  %v16285_v58 = vpop.f32.mrb[143].mxu0  ;;  %v12657_v10 = vld [vmem:[%s19201_s2 + $0x220] sm:$0xff] }
 0xfba   : > { %v12729_v31 = vpop.f32.mrb[162].mxu1  ;;  %v12799_v5 = vpop.f32.mrb[144].mxu0 }
 0xfbb   : > { %v12943_v20 = vmul.f32 0.95, %v12729_v31  ;;  %v12944_v40 = vmul.f32 0.95, %v12799_v5  ;;  %v16290_v55 = vpop.f32.mrb[163].mxu1  ;;  %v16295_v62 = vpop.f32.mrb[145].mxu0 }
 0xfbd   : > { %v12947_v39 = vadd.f32 %v12943_v20, %v18856_v47  ;;  %v12948_v43 = vadd.f32 %v12944_v40, %v18860_v17 }
 0xfbe   : > { %v12869_v12 = vpop.f32.mrb[164].mxu1  ;;  %v12939_v59 = vpop.f32.mrb[146].mxu0 }
 0xfbf   : > { %v12945_v26 = vmul.f32 0.95, %v12869_v12  ;;  %v12946_v2 = vmul.f32 0.95, %v12939_v59  ;;  %v16300_v24 = vpop.f32.mrb[165].mxu1  ;;  %v16305_v9 = vpop.f32.mrb[147].mxu0  ;;  %16309 = vmatmul.mubr.msk.f32.vlgmr.msra.gmra.mrb[166].mxu1 %vm1484_vm5, %v12947_v39  ;;  %16314 = vmatmul.mubr.msk.f32.vlgmr.msra.gmra.mrb[148].mxu0 %vm1484_vm5, %v12948_v43 }
 0xfc0   : > { %16317 = vmatpush3.msra.mxu1 %v12658_v57  ;;  %16322 = vmatpush3.msra.mxu0 %v12658_v57 }
 0xfc1   : > { %v12949_v63 = vadd.f32 %v12945_v26, %v18868_v15  ;;  %v12950_v4 = vadd.f32 %v12946_v2, %v18871_v0  ;;  %16318 = vmatprep.mubr.msk.f32.mxu1 %vm16745_vm1, %v16744_v1  ;;  %16323 = vmatprep.mubr.msk.f32.mxu0 %vm16745_vm1, %v16744_v1 }
 0xfc2   : > { %16326 = vmatprep.subr.mxu1 %v16744_v1  ;;  %16331 = vmatprep.subr.mxu0 %v16744_v1 }
 0xfc3   : > { %16319 = vmatmul.mubr.msk.f32.vlgmr.msra.gmra.mrb[168].mxu1 %vm1484_vm5, %v12949_v63  ;;  %16324 = vmatmul.mubr.msk.f32.vlgmr.msra.gmra.mrb[150].mxu0 %vm1484_vm5, %v12950_v4 }
 0xfc4   : > { %16327 = vmatpush3.msra.mxu1 %v12657_v10  ;;  %16332 = vmatpush3.msra.mxu0 %v12657_v10 }
 0xfc5   : > { %16328 = vmatprep.mubr.msk.f32.mxu1 %vm16745_vm1, %v16744_v1  ;;  %16333 = vmatprep.mubr.msk.f32.mxu0 %vm16745_vm1, %v16744_v1 }
 0xfc6   : > { %16336 = vmatprep.subr.mxu1 %v16744_v1  ;;  %16341 = vmatprep.subr.mxu0 %v16744_v1 }
 0xfc7   : > { %16329 = vmatmul.mubr.msk.f32.vlgmr.msra.gmra.mrb[170].mxu1 %vm1484_vm5, %v18798_v61  ;;  %16334 = vmatmul.mubr.msk.f32.vlgmr.msra.gmra.mrb[152].mxu0 %vm1484_vm5, %v18793_v36  ;;  %v12659_v36 = vld [vmem:[%s19201_s2 + $0x230] sm:$0xff] }
 0xfc8   : > { %16337 = vmatpush3.msra.mxu1 %v12657_v10  ;;  %16342 = vmatpush3.msra.mxu0 %v12657_v10 }
 0xfc9   : > { %16338 = vmatprep.mubr.msk.f32.mxu1 %vm16745_vm1, %v16744_v1  ;;  %16343 = vmatprep.mubr.msk.f32.mxu0 %vm16745_vm1, %v16744_v1 }
 0xfca   : > { %16346 = vmatprep.subr.mxu1 %v16744_v1  ;;  %16351 = vmatprep.subr.mxu0 %v16744_v1 }
 0xfcb   : > { %16339 = vmatmul.mubr.msk.f32.vlgmr.msra.gmra.mrb[172].mxu1 %vm1484_vm5, %v18803_v25  ;;  %16344 = vmatmul.mubr.msk.f32.vlgmr.msra.gmra.mrb[154].mxu0 %vm1484_vm5, %v18808_v21 }
 0xfcc   : > { %16347 = vmatpush3.msk.msra.mxu1 %vm1606_vm3, %v12947_v39  ;;  %16352 = vmatpush3.msk.msra.mxu0 %vm1606_vm3, %v12948_v43 }
 0xfcd   : > { %16348 = vmatprep.mubr.msk.f32.mxu1 %vm16745_vm1, %v16744_v1  ;;  %16353 = vmatprep.mubr.msk.f32.mxu0 %vm16745_vm1, %v16744_v1 }
 0xfce   : > { %16356 = vmatprep.subr.mxu1 %v16744_v1  ;;  %16361 = vmatprep.subr.mxu0 %v16744_v1 }
 0xfcf   : > { %16349 = vmatmul.mubr.msk.f32.vlgmr.msra.gmra.mrb[174].mxu1 %vm1602_vm4, %v18813_v6  ;;  %16354 = vmatmul.mubr.msk.f32.vlgmr.msra.gmra.mrb[156].mxu0 %vm1602_vm4, %v18813_v6 }
 0xfd0   : > { %16357 = vmatpush3.msk.msra.mxu1 %vm1606_vm3, %v12949_v63  ;;  %16362 = vmatpush3.msk.msra.mxu0 %vm1606_vm3, %v12950_v4 }
 0xfd1   : > { %16358 = vmatprep.mubr.msk.f32.mxu1 %vm16745_vm1, %v16744_v1  ;;  %16363 = vmatprep.mubr.msk.f32.mxu0 %vm16745_vm1, %v16744_v1 }
 0xfd2   : > { %16366 = vmatprep.subr.mxu1 %v16744_v1  ;;  %16371 = vmatprep.subr.mxu0 %v16744_v1 }
 0xfd3   : > { %16359 = vmatmul.mubr.msk.f32.vlgmr.msra.gmra.mrb[176].mxu1 %vm1602_vm4, %v18813_v6  ;;  %16364 = vmatmul.mubr.msk.f32.vlgmr.msra.gmra.mrb[158].mxu0 %vm1602_vm4, %v18813_v6 }
 0xfd4   : > { %16368 = vmatprep.mubr.msk.f32.mxu1 %vm16745_vm1, %v16744_v1  ;;  %16373 = vmatprep.mubr.msk.f32.mxu0 %vm16745_vm1, %v16744_v1 }
 0xfd5   : > { %16367 = vmatpush3.msra.mxu1 %v12659_v36  ;;  %16372 = vmatpush3.msra.mxu0 %v12659_v36 }
 0xfd6   : > { %16376 = vmatprep.subr.mxu1 %v16744_v1  ;;  %16381 = vmatprep.subr.mxu0 %v16744_v1 }
0x1092   : > { %v13020_v61 = vpop.f32.mrb[166].mxu1  ;;  %v13093_v25 = vpop.f32.mrb[148].mxu0 }
0x1093   : > { %v16310_v21 = vpop.f32.mrb[167].mxu1  ;;  %v16315_v6 = vpop.f32.mrb[149].mxu0 }
0x1096   : > { %v13166_v28 = vpop.f32.mrb[168].mxu1  ;;  %v13239_v7 = vpop.f32.mrb[150].mxu0 }
0x1097   : > { %v16320_v23 = vpop.f32.mrb[169].mxu1  ;;  %v16325_v32 = vpop.f32.mrb[151].mxu0 }
0x109a   : > { %v13309_v41 = vpop.f32.mrb[170].mxu1  ;;  %v13379_v46 = vpop.f32.mrb[152].mxu0 }
0x109b   : > { %v13310_v37 = vadd.f32 %v13309_v41, %v13020_v61  ;;  %v13380_v50 = vadd.f32 %v13379_v46, %v13093_v25  ;;  %v16330_v48 = vpop.f32.mrb[171].mxu1  ;;  %v16335_v22 = vpop.f32.mrb[153].mxu0 }
0x109e   : > { %v13449_v30 = vpop.f32.mrb[172].mxu1  ;;  %v13519_v34 = vpop.f32.mrb[154].mxu0 }
0x109f   : > { %v13450_v42 = vadd.f32 %v13449_v30, %v13166_v28  ;;  %v13520_v3 = vadd.f32 %v13519_v34, %v13239_v7  ;;  %v16340_v44 = vpop.f32.mrb[173].mxu1  ;;  %v16345_v11 = vpop.f32.mrb[155].mxu0 }
0x10a2   : > { %v13591_v53 = vpop.f32.mrb[174].mxu1  ;;  %v13663_v54 = vpop.f32.mrb[156].mxu0 }
0x10a3   : > { %v13811_v51 = vmul.f32 0.95, %v13591_v53  ;;  %v13812_v57 = vmul.f32 0.95, %v13663_v54  ;;  %v16350_v35 = vpop.f32.mrb[175].mxu1  ;;  %v16355_v52 = vpop.f32.mrb[157].mxu0 }
0x10a5   : > { %v13815_v18 = vadd.f32 %v13811_v51, %v18856_v47  ;;  %v13816_v56 = vadd.f32 %v13812_v57, %v18860_v17  ;;  %v14791_v47 = vld [vmem:[%s19201_s2 + $0x218] ss:$0 sm:$0xff] }
0x10a6   : > { %v13735_v14 = vpop.f32.mrb[176].mxu1  ;;  %v13807_v29 = vpop.f32.mrb[158].mxu0  ;;  %v12653_v12 = vadd.f32 %v14791_v47, %v18988_v60  ;;  %v12654_v59 = vadd.f32 %v14791_v47, %v18990_v19  ;;  %v12655_v21 = vadd.f32 %v14791_v47, %v18992_v27  ;;  %v12656_v6 = vadd.f32 %v14791_v47, %v18994_v49 }
0x10a7   : > { %v13813_v16 = vmul.f32 0.95, %v13735_v14  ;;  %v13814_v58 = vmul.f32 0.95, %v13807_v29  ;;  %v16360_v31 = vpop.f32.mrb[177].mxu1  ;;  %v16365_v5 = vpop.f32.mrb[159].mxu0  ;;  %16369 = vmatmul.mubr.msk.f32.vlgmr.msra.gmra.mrb[178].mxu1 %vm1484_vm5, %v13815_v18  ;;  %16374 = vmatmul.mubr.msk.f32.vlgmr.msra.gmra.mrb[160].mxu0 %vm1484_vm5, %v13816_v56 }
0x10a8   : > { %16377 = vmatpush3.msra.mxu1 %v12659_v36  ;;  %16382 = vmatpush3.msra.mxu0 %v12659_v36 }
0x10a9   : > { %v13817_v20 = vadd.f32 %v13813_v16, %v18868_v15  ;;  %v13818_v40 = vadd.f32 %v13814_v58, %v18871_v0  ;;  %16378 = vmatprep.mubr.msk.f32.mxu1 %vm16745_vm1, %v16744_v1  ;;  %16383 = vmatprep.mubr.msk.f32.mxu0 %vm16745_vm1, %v16744_v1  ;;  %v14820_v15 = vld [vmem:[%s19201_s2 + $0x238] ss:$0 sm:$0xff] }
0x10aa   : > { %16574 = vmatprep.subr.bf16.mxu0 %v16761_v38  ;;  %16580 = vmatprep.subr.bf16.mxu1 %v16761_v38 }
0x10ab   : > { %16379 = vmatmul.mubr.msk.f32.vlgmr.msra.gmra.mrb[180].mxu1 %vm1484_vm5, %v13817_v20  ;;  %16384 = vmatmul.mubr.msk.f32.vlgmr.msra.gmra.mrb[162].mxu0 %vm1484_vm5, %v13818_v40 }
0x10ac   : > { %16394 = vmatprep.mubr.msk.f32.mxu0 %vm16745_vm1, %v16744_v1  ;;  %16401 = vmatprep.mubr.msk.f32.mxu1 %vm16745_vm1, %v16744_v1 }
0x117a   : > { %v13888_v17 = vpop.f32.mrb[178].mxu1  ;;  %v13961_v0 = vpop.f32.mrb[160].mxu0 }
0x117b   : > { %v14111_v55 = vadd.f32 %v13888_v17, %v13310_v37  ;;  %v14112_v62 = vadd.f32 %v13961_v0, %v13380_v50  ;;  %v16370_v39 = vpop.f32.mrb[179].mxu1  ;;  %v16375_v43 = vpop.f32.mrb[161].mxu0 }
0x117c   : > { %v14221_v43 = vld [vmem:[%s19201_s2 + $0x58] sm:$0xff] }
0x117d   : > { %v14120_v26 = vadd.f32 %v14820_v15, %v14111_v55  ;;  %v14121_v2 = vadd.f32 %v14820_v15, %v14112_v62 }
0x117e   : > { %v14034_v24 = vpop.f32.mrb[180].mxu1  ;;  %v14107_v9 = vpop.f32.mrb[162].mxu0 }
0x117f   : > { %v14124_v63 = vadd.f32 %v14120_v26, %v12653_v12  ;;  %v14125_v4 = vadd.f32 %v14121_v2, %v12654_v59  ;;  %v14113_v10 = vadd.f32 %v14034_v24, %v13450_v42  ;;  %v14114_v36 = vadd.f32 %v14107_v9, %v13520_v3  ;;  %v16380_v61 = vpop.f32.mrb[181].mxu1  ;;  %v16385_v25 = vpop.f32.mrb[163].mxu0  ;;  %v14222_v12 = vld [vmem:[%s19201_s2 + $0x60] sm:$0xff]  ;;  %v14223_v26 = vld [vmem:[%s19201_s2 + $0x68] sm:$0xff]  ;;  %v14224_v2 = vld [vmem:[%s19201_s2 + $0x70] sm:$0xff] }
0x1180   : > { %v16575_v59 = vpack.c.bf16 %v14222_v12, %v14221_v43  ;;  %v16578_v24 = vpack.c.bf16 %v14224_v2, %v14223_v26  ;;  %v14822_v9 = vld [vmem:[%s19202_s3 + $0x2c] sm:$0x7] }
0x1181   : > { %v14128_v28 = vadd.f32 %v14124_v63, %v18570_v33  ;;  %v14129_v60 = vadd.f32 %v14125_v4, %v18664_v45  ;;  %v14122_v7 = vadd.f32 %v14820_v15, %v14113_v10  ;;  %v14123_v19 = vadd.f32 %v14820_v15, %v14114_v36  ;;  %v14823_v36 = vld [vmem:[%s19202_s3 + $0x30] sm:$0x7]  ;;  %v14826_v61 = vld [vmem:[%s19203_s4 + $0x2c] sm:$0x7] }
0x1182   : > { %16576 = vmatpush3.bf16.msra.mxu0 %v16575_v59 }
0x1183   : > { %v14142_v23 = vsel %vm10371_vm0, %v14128_v28, 0.0  ;;  %v14143_v32 = vsel %vm10371_vm0, %v14129_v60, 0.0  ;;  %v14126_v41 = vadd.f32 %v14122_v7, %v12655_v21  ;;  %v14127_v46 = vadd.f32 %v14123_v19, %v12656_v6  ;;  %16577 = vmatprep.subr.bf16.mxu0 %v16761_v38  ;;  %v14827_v7 = vld [vmem:[%s19203_s4 + $0x30] sm:$0x7] }
0x1184   : > { %v14144_v48 = vadd.f32 %v14143_v32, %v14142_v23  ;;  %v14828_v32 = vld [vmem:[%s19203_s4 + $0x34] sm:$0x7] }
0x1185   : > { %v14130_v37 = vadd.f32 %v14126_v41, %v18672_v8  ;;  %v14131_v50 = vadd.f32 %v14127_v46, %v18698_v13 }
0x1186   : > { %16579 = vmatpush3.bf16.msra.mxu0 %v16578_v24 }
0x1187   : > { %v14145_v27 = vsel %vm10371_vm0, %v14130_v37, 0.0  ;;  %v14147_v33 = vsel %vm10371_vm0, %v14131_v50, 0.0 }
0x1188   : > { %v14146_v49 = vadd.f32 %v14145_v27, %v14144_v48  ;;  %v14825_v27 = vld [vmem:[%s19203_s4 + $0x28] sm:$0x7] }
0x118a   : > { %v14148_v22 = vadd.f32 %v14147_v33, %v14146_v49 }
0x118c   : > { %14149 = vadd.xlane.f32.xlu1 %v14148_v22 }
0x1219   : > { %v14150_v45 = vpop.xlane.xlu1 %14149 }
0x121a   : > { %v14151_v30 = vrot.slane %v14150_v45, 4 }
0x121c   : > { %v14152_v34 = vadd.f32 %v14151_v30, %v14150_v45 }
0x121e   : > { %v14153_v42 = vrot.slane %v14152_v34, 2 }
0x1220   : > { %v14154_v3 = vadd.f32 %v14153_v42, %v14152_v34  ;;  %v14305_v42 = vld [vmem:[%s19201_s2 + $0x80] sm:$0xff] }
0x1222   : > { %v14155_v44 = vrot.slane %v14154_v3, 1 }
0x1224   : > { %v14156_v11 = vadd.f32 %v14155_v44, %v14154_v3  ;;  %v14306_v3 = vld [vmem:[%s19201_s2 + $0x88] sm:$0xff] }
0x1225   : > { %v16581_v44 = vpack.c.bf16 %v14306_v3, %v14305_v42 }
0x1226   : > { %16605 = vpush %v14156_v11  ;;  %v14578_v11 = vld [vmem:[%s19201_s2 + $0x50] ss:$0 sm:$0xff] }
0x1227   : > { %16582 = vmatpush3.bf16.msra.mxu1 %v16581_v44 }
0x1228   : > { %16583 = vmatprep.subr.bf16.mxu1 %v16761_v38 }
0x1257   : > { %s16606_s15 = spop %16605 }
0x1258   : > { %s14160_s17 = smul.f32 0.010416667, %s16606_s15 }
0x125a   : > { %v14161_v8 = vstv %s14160_s17 }
0x125b   : > { %v14162_v13 = vsub.f32 %v14128_v28, %v14161_v8  ;;  %v14163_v53 = vsub.f32 %v14129_v60, %v14161_v8  ;;  %v14164_v54 = vsub.f32 %v14130_v37, %v14161_v8  ;;  %v14165_v51 = vsub.f32 %v14131_v50, %v14161_v8  ;;  %v14824_v60 = vld [vmem:[%s19202_s3 + $0x34] sm:$0x7]  ;;  %v14821_v37 = vld [vmem:[%s19202_s3 + $0x28] sm:$0x7]  ;;  %v14604_v8 = vld [vmem:[%s19201_s2 + $0x150] ss:$0 sm:$0xff] }
0x125d   : > { %v14166_v57 = vmul.f32 %v14162_v13, %v14162_v13  ;;  %v14167_v35 = vmul.f32 %v14163_v53, %v14163_v53  ;;  %v14168_v52 = vmul.f32 %v14164_v54, %v14164_v54  ;;  %v14169_v18 = vmul.f32 %v14165_v51, %v14165_v51 }
0x125f   : > { %v14170_v56 = vsel %vm10371_vm0, %v14166_v57, 0.0  ;;  %v14171_v14 = vsel %vm10371_vm0, %v14167_v35, 0.0  ;;  %v14173_v16 = vsel %vm10371_vm0, %v14168_v52, 0.0  ;;  %v14175_v31 = vsel %vm10371_vm0, %v14169_v18, 0.0  ;;  %v14386_v35 = vld [vmem:[%s19201_s2 + $0x98] sm:$0xff]  ;;  %v14387_v52 = vld [vmem:[%s19201_s2 + $0xa0] sm:$0xff] }
0x1260   : > { %v14172_v29 = vadd.f32 %v14171_v14, %v14170_v56 }
0x1262   : > { %v14174_v58 = vadd.f32 %v14173_v16, %v14172_v29  ;;  %v16584_v29 = vpack.c.bf16 %v14387_v52, %v14386_v35 }
0x1264   : > { %v14176_v5 = vadd.f32 %v14175_v31, %v14174_v58  ;;  %v14388_v58 = vld [vmem:[%s19201_s2 + $0xa8] sm:$0xff]  ;;  %v14389_v31 = vld [vmem:[%s19201_s2 + $0xb0] sm:$0xff] }
0x1266   : > { %14177 = vadd.xlane.f32.xlu0 %v14176_v5  ;;  %v16587_v5 = vpack.c.bf16 %v14389_v31, %v14388_v58 }
0x12f3   : > { %v14178_v20 = vpop.xlane.xlu0 %14177 }
0x12f4   : > { %v14179_v40 = vrot.slane %v14178_v20, 4 }
0x12f6   : > { %v14180_v47 = vadd.f32 %v14179_v40, %v14178_v20  ;;  %v14831_v20 = vld [vmem:[%s19201_s2 + $0x90] ss:$0 sm:$0xff] }
0x12f8   : > { %v14181_v17 = vrot.slane %v14180_v47, 2 }
0x12fa   : > { %v14182_v15 = vadd.f32 %v14181_v17, %v14180_v47 }
0x12fc   : > { %v14183_v0 = vrot.slane %v14182_v15, 1 }
0x12fe   : > { %v14184_v55 = vadd.f32 %v14183_v0, %v14182_v15 }
0x1300   : > { %16607 = vpush %v14184_v55 }
0x1331   : > { %s16608_s21 = spop %16607 }
0x1332   : > { %s14188_s29 = smul.f32 0.010416667, %s16608_s21 }
0x1334   : > { %s14189_s26 = sadd.f32 1e-05, %s14188_s29 }
0x1336   : > { %v14190_v62 = vstv %s14189_s26 }
0x1337   : > { %16734 = vrsqrt.f32 %v14190_v62 }
0x1341   : > { %v16735_v39 = vpop.eup %16734 }
0x1342   : > { %16609 = vpush %v16735_v39 }
0x1373   : > { %s16610_s28 = spop %16609 }
0x1374   : > { %v14193_v63 = vstv %s16610_s28 }
0x1375   : > { %v14195_v4 = vmul.f32 %v14193_v63, %v14163_v53  ;;  %v14196_v10 = vmul.f32 %v14193_v63, %v14164_v54  ;;  %v14197_v21 = vmul.f32 %v14193_v63, %v14165_v51  ;;  %v14194_v46 = vmul.f32 %v14193_v63, %v14162_v13  ;;  %v14761_v53 = vld [vmem:[%s19201_s2 + $0x1f8] ss:$0 sm:$0xff] }
0x1376   : > { %v16589_v13 = vadd.f32 %v14604_v8, %v14578_v11  ;;  %v14829_v51 = vld [vmem:[%s19201_s2 + $0x78] ss:$0 sm:$0xff] }
0x1377   : > { %v14199_v25 = vmul.f32 %v14822_v9, %v14195_v4  ;;  %v14200_v6 = vmul.f32 %v14823_v36, %v14196_v10  ;;  %v14201_v19 = vmul.f32 %v14824_v60, %v14197_v21  ;;  %v14198_v48 = vmul.f32 %v14821_v37, %v14194_v46 }
0x1378   : > { %v16590_v54 = vadd.f32 %v16589_v13, %v14761_v53 }
0x1379   : > { %v14203_v28 = vadd.f32 %v14826_v61, %v14199_v25  ;;  %v14204_v23 = vadd.f32 %v14827_v7, %v14200_v6  ;;  %v14205_v41 = vadd.f32 %v14828_v32, %v14201_v19  ;;  %v14202_v33 = vadd.f32 %v14825_v27, %v14198_v48 }
0x137a   : > { %v16591_v57 = vadd.f32 %v16590_v54, %v14829_v51 }
0x137b   : > { %14207 = vrot.lane.b32.xlu1 %v14203_v28, %s16748_s7  ;;  %s14544_s7 = sshll.u32 %s19206_s19, 2 }
0x137c   : > { %s242_s14 = scalar_lea.vmem %s19204_s5, %s14544_s7 }
0x137f   : > { %14211 = vrot.lane.b32.xlu1 %v14204_v23, %s16749_s8 }
0x1383   : > { %14215 = vrot.lane.b32.xlu1 %v14205_v41, %s16751_s10 }
0x13ed   : > { %v14208_v50 = vpop.permute.xlu1 %14207 }
0x13ee   : > { %v14218_v22 = vsel %vm1484_vm5, %v14202_v33, %v14208_v50 }
0x13f1   : > { %v14212_v49 = vpop.permute.xlu1 %14211 }
0x13f2   : > { %v14219_v45 = vsel %vm1488_vm7, %v14218_v22, %v14212_v49 }
0x13f5   : > { %v14216_v30 = vpop.permute.xlu1 %14215 }
0x13f6   : > { %v14220_v34 = vsel %vm1492_vm9, %v14219_v45, %v14216_v30 }
0x13f7   : > { %16395 = vmatmul.mubr.msk.f32.vlgmr.msra.gmra.mrb[16].mxu0 %vm1496_vm11, %v14220_v34 }
0x14ca   : > { %v14299_v18 = vpop.f32.mrb[16].mxu0 }
0x14cb   : > { %v16592_v56 = vadd.f32 %v16591_v57, %v14299_v18  ;;  %v16396_v14 = vpop.f32.mrb[17].mxu0 }
0x14cd   : > { %v14304_v16 = vmax.f32 %v16592_v56, 0.0 }
0x14cf   : > { %16402 = vmatmul.mubr.msk.f32.vlgmr.msra.gmra.mrb[182].mxu1 %vm1488_vm7, %v14304_v16 }
0x14d0   : > { %16585 = vmatpush3.bf16.msra.mxu1 %v16584_v29  ;;  %16412 = vmatprep.mubr.msk.f32.mxu1 %vm16745_vm1, %v16744_v1  ;;  %vm14468_vm1 = vcmask 26624  }
0x14d1   : > { %16586 = vmatprep.subr.bf16.mxu1 %v16761_v38  ;;  %v14833_v38 = vld [vmem:[%s19201_s2 + $0xb8] ss:$0 sm:$0xff] }
0x14d4   : > { %16588 = vmatpush3.bf16.msra.mxu1 %v16587_v5 }
0x15a2   : > { %v14381_v40 = vpop.f32.mrb[182].mxu1 }
0x15a3   : > { %v14382_v47 = vadd.f32 %v14831_v20, %v14381_v40  ;;  %v16403_v17 = vpop.f32.mrb[183].mxu1 }
0x15a5   : > { %v14385_v1 = vmax.f32 %v14382_v47, 0.0 }
0x15a7   : > { %16413 = vmatmul.mubr.msk.f32.vlgmr.msra.gmra.mrb[184].mxu1 %vm1496_vm11, %v14385_v1 }
0x167a   : > { %v14464_v15 = vpop.f32.mrb[184].mxu1 }
0x167b   : > { %v14465_v0 = vadd.f32 %v14833_v38, %v14464_v15  ;;  %v16414_v55 = vpop.f32.mrb[185].mxu1 }
0x167d   : > { %14469 = vst.msk [vmem:[%s242_s14] sm:$0x7] %vm14468_vm1, %v14465_v0 }
0x167e PF: > { %s15_s18 = sadd.s32 1, %s16742_s18  }
0x167f   : > { %p12_p4 = scmp.ge.s32.totalorder %s15_s18, 4  }
0x1681   :  { %14 = sbr.rel (!%p12_p4) target bundleno = 1 (0x1), region = 78 }

</bundles_post_ra>
